<compile_context>
chip_gen: v5e
topology: v5e:2x2
jax: 0.10.0
libtpu: 0.0.40
codegen_flags: <defaults>
</compile_context>

<pallas_src>
import jax
import jax.numpy as jnp
from jax.experimental import pallas as pl
from jax.experimental.pallas import tpu as pltpu


# ----------------------------------------------------------------------------
# Pallas kernels
# ----------------------------------------------------------------------------
def _matmul_bias_relu_kernel(x_ref, w_ref, b_ref, o_ref):
    # y = relu(x @ w + b); bf16 operands, f32 MXU accumulation, bf16 output.
    y = jnp.dot(x_ref[...], w_ref[...], preferred_element_type=jnp.float32)
    y = y + b_ref[...]                      # (1, N) f32 broadcasts over rows
    o_ref[...] = jnp.maximum(y, 0.0).astype(o_ref.dtype)


def _mlp3_kernel(x_ref, w5_ref, b5_ref, w6_ref, b6_ref, w7_ref, b7_ref, o_ref):
    # Fused classifier head: Linear+ReLU -> Linear+ReLU -> Linear, all in VMEM.
    h = jnp.dot(x_ref[...], w5_ref[...], preferred_element_type=jnp.float32)
    h = jnp.maximum(h + b5_ref[...], 0.0).astype(jnp.bfloat16)
    h = jnp.dot(h, w6_ref[...], preferred_element_type=jnp.float32)
    h = jnp.maximum(h + b6_ref[...], 0.0).astype(jnp.bfloat16)
    h = jnp.dot(h, w7_ref[...], preferred_element_type=jnp.float32)
    o_ref[...] = (h + b7_ref[...]).astype(o_ref.dtype)


# ----------------------------------------------------------------------------
# Pallas wrappers
# ----------------------------------------------------------------------------
def matmul_bias_relu(x, w, b2d, m_tile, out_dtype=jnp.bfloat16):
    """x: (M, K) bf16, w: (K, N) bf16, b2d: (1, N) f32 -> relu(x @ w + b)."""
    M, K = x.shape
    N = w.shape[1]
    assert M % m_tile == 0, (M, m_tile)
    grid = (M // m_tile,)
    return pl.pallas_call(
        _matmul_bias_relu_kernel,
        out_shape=jax.ShapeDtypeStruct((M, N), out_dtype),
        grid=grid,
        in_specs=[
            pl.BlockSpec((m_tile, K), lambda i: (i, 0)),
            pl.BlockSpec((K, N), lambda i: (0, 0)),
            pl.BlockSpec((1, N), lambda i: (0, 0)),
        ],
        out_specs=pl.BlockSpec((m_tile, N), lambda i: (i, 0)),
        compiler_params=pltpu.CompilerParams(
            dimension_semantics=("parallel",)),
    )(x, w, b2d)


def mlp3(x, w5t, b5, w6t, b6, w7t, b7):
    """Fused 3-layer MLP head. Weights (in, out) bf16; biases (1, out) f32.

    Note: at B=2 this call is pure weight-DMA latency; bf16 weights halve it.
    A cross-pallas_call semaphore prefetch of the weights behind conv2 would
    hide the rest but total HBM bytes (the real floor here) are unchanged."""
    B = x.shape[0]
    N_out = w7t.shape[1]
    full = lambda *shape: pl.BlockSpec(shape, lambda i: (0,) * len(shape))
    return pl.pallas_call(
        _mlp3_kernel,
        out_shape=jax.ShapeDtypeStruct((B, N_out), jnp.float32),
        grid=(1,),
        in_specs=[
            full(*x.shape),
            full(*w5t.shape), full(*b5.shape),
            full(*w6t.shape), full(*b6.shape),
            full(*w7t.shape), full(*b7.shape),
        ],
        out_specs=full(B, N_out),
        compiler_params=pltpu.CompilerParams(
            dimension_semantics=("arbitrary",)),
    )(x, w5t, b5, w6t, b6, w7t, b7)


# ----------------------------------------------------------------------------
# Glue (indexing / reshapes only; XLA fuses these — no extra Pallas launches)
# ----------------------------------------------------------------------------
def _im2col(x_nhwc, k, k_out=None):
    """x: (B,H,W,C) -> (B*Ho*Wo, k_out) cols, patch order (kh, kw, c).

    If k_out > k*k*C the extra columns are zeros, appended inside the single
    concatenate so XLA fuses the pad into the cols write (no extra copy)."""
    B, H, W, C = x_nhwc.shape
    Ho, Wo = H - k + 1, W - k + 1
    patches = [x_nhwc[:, kh:kh + Ho, kw:kw + Wo, :]
               for kh in range(k) for kw in range(k)]
    kk = k * k * C
    if k_out is not None and k_out > kk:
        patches.append(jnp.zeros((B, Ho, Wo, k_out - kk), x_nhwc.dtype))
    cols = jnp.concatenate(patches, axis=-1)            # (B, Ho, Wo, k_out)
    return cols.reshape(B * Ho * Wo, cols.shape[-1]), (B, Ho, Wo)


def maxpool2d(x_nhwc, k=3, s=2):
    """MaxPool2d(3, 2), floor mode — pairwise max tree, fused by XLA."""
    B, H, W, C = x_nhwc.shape
    Ho, Wo = (H - k) // s + 1, (W - k) // s + 1
    out = None
    for dh in range(k):
        for dw in range(k):
            win = x_nhwc[:, dh:dh + s * (Ho - 1) + 1:s,
                         dw:dw + s * (Wo - 1) + 1:s, :]
            out = win if out is None else jnp.maximum(out, win)
    return out                                          # (B, Ho, Wo, C)


def conv_relu_pool(x_nhwc, w2d, b2d, k, m_tile):
    """Valid conv (stride 1) + ReLU + MaxPool2d(3,2).

    w2d: (K, Cout) bf16 with K >= k*k*Cin (extra rows zero).  Cols rows are
    padded up to a multiple of m_tile so the matmul grid splits into parallel
    M-tiles; the pad rows are sliced off before the pool."""
    cols, (B, Ho, Wo) = _im2col(x_nhwc, k, k_out=w2d.shape[0])
    M = cols.shape[0]
    Mp = -(-M // m_tile) * m_tile
    if Mp > M:
        cols = jnp.pad(cols, ((0, Mp - M), (0, 0)))
    y = matmul_bias_relu(cols, w2d, b2d, m_tile=m_tile)   # (Mp, Cout) bf16
    y = y[:M].reshape(B, Ho, Wo, w2d.shape[1])
    return maxpool2d(y)


# ----------------------------------------------------------------------------
# Full forward pass (matches torch `net.forward`)
# ----------------------------------------------------------------------------
def net_forward(p, x_nchw):
    B = x_nchw.shape[0]
    x = jnp.transpose(x_nchw, (0, 2, 3, 1)).astype(jnp.bfloat16)   # (B,32,32,3)
    # conv1: M = B*28*28 -> 2 parallel M-tiles (megacore split / 2-step pipeline)
    x = conv_relu_pool(x, p["w1c"], p["b1"], k=5, m_tile=(B * 28 * 28) // 2)
    # conv2: M = B*9*9 (=162 at B=2) -> padded to 2 parallel M-tiles of 96
    x = conv_relu_pool(x, p["w2c"], p["b2"], k=5, m_tile=96)
    # torch flattens NCHW as (C, H, W): transpose back before reshape
    x = jnp.transpose(x, (0, 3, 1, 2)).reshape(B, -1)              # (B,1024) bf16
    return mlp3(x, p["w5t"], p["b5"], p["w6t"], p["b6"], p["w7t"], p["b7"])


def init_params(key):
    """Parameters in PyTorch layouts (OIHW convs, (out,in) linears), f32."""
    ks = jax.random.split(key, 10)
    n = lambda k, shp, s: s * jax.random.normal(k, shp, dtype=jnp.float32)
    return {
        "w1": n(ks[0], (64, 3, 5, 5), 0.05), "b1": n(ks[1], (64,), 0.05),
        "w2": n(ks[2], (64, 64, 5, 5), 0.02), "b2": n(ks[3], (64,), 0.02),
        "w5": n(ks[4], (384, 1024), 0.02), "b5": n(ks[5], (384,), 0.02),
        "w6": n(ks[6], (192, 384), 0.02), "b6": n(ks[7], (192,), 0.02),
        "w7": n(ks[8], (10, 192), 0.02), "b7": n(ks[9], (10,), 0.02),
    }


def prepare_params(p):
    """One-time layout prep: transpose + bf16-cast weights; biases stay f32."""
    # Conv1: OIHW (64,3,5,5) -> (kh,kw,cin,cout) -> (75,64); K zero-padded to
    # 128 to match the lane-dense im2col cols (zeros patch in the concat).
    w1 = jnp.transpose(p["w1"], (2, 3, 1, 0)).reshape(75, 64).astype(jnp.bfloat16)
    w1c = jnp.zeros((128, 64), jnp.bfloat16).at[:75, :].set(w1)
    # Conv2: OIHW (64,64,5,5) -> (1600, 64) — no Cin/Cout padding.
    w2c = jnp.transpose(p["w2"], (2, 3, 1, 0)).reshape(1600, 64).astype(jnp.bfloat16)
    return {
        "w1c": w1c, "b1": p["b1"].reshape(1, -1),
        "w2c": w2c, "b2": p["b2"].reshape(1, -1),
        "w5t": p["w5"].T.astype(jnp.bfloat16), "b5": p["b5"].reshape(1, -1),
        "w6t": p["w6"].T.astype(jnp.bfloat16), "b6": p["b6"].reshape(1, -1),
        "w7t": p["w7"].T.astype(jnp.bfloat16), "b7": p["b7"].reshape(1, -1),
    }


if __name__ == "__main__":
    key = jax.random.PRNGKey(0)
    pkey, xkey = jax.random.split(key)
    params = prepare_params(init_params(pkey))          # one-time layout prep
    # 1024 = 64*4*4 after two conv/pool stages => 32x32x3 input (CIFAR-10 style).
    x = jax.random.normal(xkey, (2, 3, 32, 32), dtype=jnp.float32)

    fwd = jax.jit(net_forward)
    out = jax.block_until_ready(fwd(params, x))

    assert out.shape == (2, 10), out.shape
    assert out.dtype == jnp.float32
    print("KERNEL_OK")
</pallas_src>

<mosaic_0001>
module attributes {stable_mosaic.version = 11 : i64} {
  func.func @_matmul_bias_relu_kernel(%arg0: i32, %arg1: memref<784x128xbf16, #tpu.memory_space<vmem>>, %arg2: memref<128x64xbf16, #tpu.memory_space<vmem>>, %arg3: memref<1x64xf32, #tpu.memory_space<vmem>>, %arg4: memref<784x64xbf16, #tpu.memory_space<vmem>>) attributes {dimension_semantics = [#tpu.dimension_semantics<parallel>], iteration_bounds = array<i64: 2>, scalar_prefetch = 0 : i64, scratch_operands = 0 : i64, tpu.core_type = #tpu.core_type<tc>, window_params = [{transform_indices = @transform_0, window_bounds = array<i64: 784, 128>}, {pipeline_mode = #tpu.pipeline_mode<synchronous>, transform_indices = @transform_1, window_bounds = array<i64: 128, 64>}, {pipeline_mode = #tpu.pipeline_mode<synchronous>, transform_indices = @transform_2, window_bounds = array<i64: 1, 64>}, {transform_indices = @transform_3, window_bounds = array<i64: 784, 64>}]} {
    %c0 = arith.constant 0 : index
    %c0_0 = arith.constant 0 : index
    %0 = vector.load %arg1[%c0, %c0_0] : memref<784x128xbf16, #tpu.memory_space<vmem>>, vector<784x128xbf16>
    %c0_1 = arith.constant 0 : index
    %c0_2 = arith.constant 0 : index
    %1 = vector.load %arg2[%c0_1, %c0_2] : memref<128x64xbf16, #tpu.memory_space<vmem>>, vector<128x64xbf16>
    %cst = arith.constant dense<0.000000e+00> : vector<784x64xf32>
    %2 = tpu.matmul %0, %1, %cst {dimension_numbers = #tpu.dot_dimension_numbers<[1], [0], [0], [1], [0, 0, 1, 1], [], []>} : vector<784x128xbf16>, vector<128x64xbf16>, vector<784x64xf32> -> vector<784x64xf32>
    %c0_3 = arith.constant 0 : index
    %c0_4 = arith.constant 0 : index
    %3 = vector.load %arg3[%c0_3, %c0_4] : memref<1x64xf32, #tpu.memory_space<vmem>>, vector<1x64xf32>
    %4 = vector.broadcast %3 : vector<1x64xf32> to vector<784x64xf32>
    %5 = arith.addf %2, %4 : vector<784x64xf32>
    %cst_5 = arith.constant 0.000000e+00 : f32
    %6 = vector.broadcast %cst_5 : f32 to vector<784x64xf32>
    %7 = arith.maximumf %5, %6 : vector<784x64xf32>
    %8 = arith.truncf %7 : vector<784x64xf32> to vector<784x64xbf16>
    %c0_6 = arith.constant 0 : index
    %c0_7 = arith.constant 0 : index
    %9 = vector.load %arg4[%c0_6, %c0_7] : memref<784x64xbf16, #tpu.memory_space<vmem>>, vector<784x64xbf16>
    tpu.vector_store %arg4[%c0_6, %c0_7], %8 {strides = array<i32>} : memref<784x64xbf16, #tpu.memory_space<vmem>>, vector<784x64xbf16>,
    return
  }
  func.func @transform_0(%arg0: i32) -> (i32, i32) {
    %c0_i32 = arith.constant 0 : i32
    %c0_i32_0 = arith.constant 0 : i32
    return %arg0, %c0_i32 : i32, i32
  }
  func.func @transform_1(%arg0: i32) -> (i32, i32) {
    %c0_i32 = arith.constant 0 : i32
    %c0_i32_0 = arith.constant 0 : i32
    %c0_i32_1 = arith.constant 0 : i32
    return %c0_i32, %c0_i32_0 : i32, i32
  }
  func.func @transform_2(%arg0: i32) -> (i32, i32) {
    %c0_i32 = arith.constant 0 : i32
    %c0_i32_0 = arith.constant 0 : i32
    %c0_i32_1 = arith.constant 0 : i32
    return %c0_i32, %c0_i32_0 : i32, i32
  }
  func.func @transform_3(%arg0: i32) -> (i32, i32) {
    %c0_i32 = arith.constant 0 : i32
    %c0_i32_0 = arith.constant 0 : i32
    return %arg0, %c0_i32 : i32, i32
  }
}

module attributes {stable_mosaic.version = 11 : i64} {
  func.func @_matmul_bias_relu_kernel(%arg0: i32, %arg1: memref<96x1600xbf16, #tpu.memory_space<vmem>>, %arg2: memref<1600x64xbf16, #tpu.memory_space<vmem>>, %arg3: memref<1x64xf32, #tpu.memory_space<vmem>>, %arg4: memref<96x64xbf16, #tpu.memory_space<vmem>>) attributes {dimension_semantics = [#tpu.dimension_semantics<parallel>], iteration_bounds = array<i64: 2>, scalar_prefetch = 0 : i64, scratch_operands = 0 : i64, tpu.core_type = #tpu.core_type<tc>, window_params = [{transform_indices = @transform_0, window_bounds = array<i64: 96, 1600>}, {pipeline_mode = #tpu.pipeline_mode<synchronous>, transform_indices = @transform_1, window_bounds = array<i64: 1600, 64>}, {pipeline_mode = #tpu.pipeline_mode<synchronous>, transform_indices = @transform_2, window_bounds = array<i64: 1, 64>}, {transform_indices = @transform_3, window_bounds = array<i64: 96, 64>}]} {
    %c0 = arith.constant 0 : index
    %c0_0 = arith.constant 0 : index
    %0 = vector.load %arg1[%c0, %c0_0] : memref<96x1600xbf16, #tpu.memory_space<vmem>>, vector<96x1600xbf16>
    %c0_1 = arith.constant 0 : index
    %c0_2 = arith.constant 0 : index
    %1 = vector.load %arg2[%c0_1, %c0_2] : memref<1600x64xbf16, #tpu.memory_space<vmem>>, vector<1600x64xbf16>
    %cst = arith.constant dense<0.000000e+00> : vector<96x64xf32>
    %2 = tpu.matmul %0, %1, %cst {dimension_numbers = #tpu.dot_dimension_numbers<[1], [0], [0], [1], [0, 0, 1, 1], [], []>} : vector<96x1600xbf16>, vector<1600x64xbf16>, vector<96x64xf32> -> vector<96x64xf32>
    %c0_3 = arith.constant 0 : index
    %c0_4 = arith.constant 0 : index
    %3 = vector.load %arg3[%c0_3, %c0_4] : memref<1x64xf32, #tpu.memory_space<vmem>>, vector<1x64xf32>
    %4 = vector.broadcast %3 : vector<1x64xf32> to vector<96x64xf32>
    %5 = arith.addf %2, %4 : vector<96x64xf32>
    %cst_5 = arith.constant 0.000000e+00 : f32
    %6 = vector.broadcast %cst_5 : f32 to vector<96x64xf32>
    %7 = arith.maximumf %5, %6 : vector<96x64xf32>
    %8 = arith.truncf %7 : vector<96x64xf32> to vector<96x64xbf16>
    %c0_6 = arith.constant 0 : index
    %c0_7 = arith.constant 0 : index
    %9 = vector.load %arg4[%c0_6, %c0_7] : memref<96x64xbf16, #tpu.memory_space<vmem>>, vector<96x64xbf16>
    tpu.vector_store %arg4[%c0_6, %c0_7], %8 {strides = array<i32>} : memref<96x64xbf16, #tpu.memory_space<vmem>>, vector<96x64xbf16>,
    return
  }
  func.func @transform_0(%arg0: i32) -> (i32, i32) {
    %c0_i32 = arith.constant 0 : i32
    %c0_i32_0 = arith.constant 0 : i32
    return %arg0, %c0_i32 : i32, i32
  }
  func.func @transform_1(%arg0: i32) -> (i32, i32) {
    %c0_i32 = arith.constant 0 : i32
    %c0_i32_0 = arith.constant 0 : i32
    %c0_i32_1 = arith.constant 0 : i32
    return %c0_i32, %c0_i32_0 : i32, i32
  }
  func.func @transform_2(%arg0: i32) -> (i32, i32) {
    %c0_i32 = arith.constant 0 : i32
    %c0_i32_0 = arith.constant 0 : i32
    %c0_i32_1 = arith.constant 0 : i32
    return %c0_i32, %c0_i32_0 : i32, i32
  }
  func.func @transform_3(%arg0: i32) -> (i32, i32) {
    %c0_i32 = arith.constant 0 : i32
    %c0_i32_0 = arith.constant 0 : i32
    return %arg0, %c0_i32 : i32, i32
  }
}

module attributes {stable_mosaic.version = 11 : i64} {
  func.func @_mlp3_kernel(%arg0: i32, %arg1: memref<2x1024xbf16, #tpu.memory_space<vmem>>, %arg2: memref<1024x384xbf16, #tpu.memory_space<vmem>>, %arg3: memref<1x384xf32, #tpu.memory_space<vmem>>, %arg4: memref<384x192xbf16, #tpu.memory_space<vmem>>, %arg5: memref<1x192xf32, #tpu.memory_space<vmem>>, %arg6: memref<192x10xbf16, #tpu.memory_space<vmem>>, %arg7: memref<1x10xf32, #tpu.memory_space<vmem>>, %arg8: memref<2x10xf32, #tpu.memory_space<vmem>>) attributes {dimension_semantics = [#tpu.dimension_semantics<arbitrary>], iteration_bounds = array<i64: 1>, scalar_prefetch = 0 : i64, scratch_operands = 0 : i64, tpu.core_type = #tpu.core_type<tc>, window_params = [{pipeline_mode = #tpu.pipeline_mode<synchronous>, transform_indices = @transform_0, window_bounds = array<i64: 2, 1024>}, {pipeline_mode = #tpu.pipeline_mode<synchronous>, transform_indices = @transform_1, window_bounds = array<i64: 1024, 384>}, {pipeline_mode = #tpu.pipeline_mode<synchronous>, transform_indices = @transform_2, window_bounds = array<i64: 1, 384>}, {pipeline_mode = #tpu.pipeline_mode<synchronous>, transform_indices = @transform_3, window_bounds = array<i64: 384, 192>}, {pipeline_mode = #tpu.pipeline_mode<synchronous>, transform_indices = @transform_4, window_bounds = array<i64: 1, 192>}, {pipeline_mode = #tpu.pipeline_mode<synchronous>, transform_indices = @transform_5, window_bounds = array<i64: 192, 10>}, {pipeline_mode = #tpu.pipeline_mode<synchronous>, transform_indices = @transform_6, window_bounds = array<i64: 1, 10>}, {pipeline_mode = #tpu.pipeline_mode<synchronous>, transform_indices = @transform_7, window_bounds = array<i64: 2, 10>}]} {
    %c0 = arith.constant 0 : index
    %c0_0 = arith.constant 0 : index
    %0 = vector.load %arg1[%c0, %c0_0] : memref<2x1024xbf16, #tpu.memory_space<vmem>>, vector<2x1024xbf16>
    %c0_1 = arith.constant 0 : index
    %c0_2 = arith.constant 0 : index
    %1 = vector.load %arg2[%c0_1, %c0_2] : memref<1024x384xbf16, #tpu.memory_space<vmem>>, vector<1024x384xbf16>
    %cst = arith.constant dense<0.000000e+00> : vector<2x384xf32>
    %2 = tpu.matmul %0, %1, %cst {dimension_numbers = #tpu.dot_dimension_numbers<[1], [0], [0], [1], [0, 0, 1, 1], [], []>} : vector<2x1024xbf16>, vector<1024x384xbf16>, vector<2x384xf32> -> vector<2x384xf32>
    %c0_3 = arith.constant 0 : index
    %c0_4 = arith.constant 0 : index
    %3 = vector.load %arg3[%c0_3, %c0_4] : memref<1x384xf32, #tpu.memory_space<vmem>>, vector<1x384xf32>
    %4 = vector.broadcast %3 : vector<1x384xf32> to vector<2x384xf32>
    %5 = arith.addf %2, %4 : vector<2x384xf32>
    %cst_5 = arith.constant 0.000000e+00 : f32
    %6 = vector.broadcast %cst_5 : f32 to vector<2x384xf32>
    %7 = arith.maximumf %5, %6 : vector<2x384xf32>
    %8 = arith.truncf %7 : vector<2x384xf32> to vector<2x384xbf16>
    %c0_6 = arith.constant 0 : index
    %c0_7 = arith.constant 0 : index
    %9 = vector.load %arg4[%c0_6, %c0_7] : memref<384x192xbf16, #tpu.memory_space<vmem>>, vector<384x192xbf16>
    %cst_8 = arith.constant dense<0.000000e+00> : vector<2x192xf32>
    %10 = tpu.matmul %8, %9, %cst_8 {dimension_numbers = #tpu.dot_dimension_numbers<[1], [0], [0], [1], [0, 0, 1, 1], [], []>} : vector<2x384xbf16>, vector<384x192xbf16>, vector<2x192xf32> -> vector<2x192xf32>
    %c0_9 = arith.constant 0 : index
    %c0_10 = arith.constant 0 : index
    %11 = vector.load %arg5[%c0_9, %c0_10] : memref<1x192xf32, #tpu.memory_space<vmem>>, vector<1x192xf32>
    %12 = vector.broadcast %11 : vector<1x192xf32> to vector<2x192xf32>
    %13 = arith.addf %10, %12 : vector<2x192xf32>
    %cst_11 = arith.constant 0.000000e+00 : f32
    %14 = vector.broadcast %cst_11 : f32 to vector<2x192xf32>
    %15 = arith.maximumf %13, %14 : vector<2x192xf32>
    %16 = arith.truncf %15 : vector<2x192xf32> to vector<2x192xbf16>
    %c0_12 = arith.constant 0 : index
    %c0_13 = arith.constant 0 : index
    %17 = vector.load %arg6[%c0_12, %c0_13] : memref<192x10xbf16, #tpu.memory_space<vmem>>, vector<192x10xbf16>
    %cst_14 = arith.constant dense<0.000000e+00> : vector<2x10xf32>
    %18 = tpu.matmul %16, %17, %cst_14 {dimension_numbers = #tpu.dot_dimension_numbers<[1], [0], [0], [1], [0, 0, 1, 1], [], []>} : vector<2x192xbf16>, vector<192x10xbf16>, vector<2x10xf32> -> vector<2x10xf32>
    %c0_15 = arith.constant 0 : index
    %c0_16 = arith.constant 0 : index
    %19 = vector.load %arg7[%c0_15, %c0_16] : memref<1x10xf32, #tpu.memory_space<vmem>>, vector<1x10xf32>
    %20 = vector.broadcast %19 : vector<1x10xf32> to vector<2x10xf32>
    %21 = arith.addf %18, %20 : vector<2x10xf32>
    %c0_17 = arith.constant 0 : index
    %c0_18 = arith.constant 0 : index
    %22 = vector.load %arg8[%c0_17, %c0_18] : memref<2x10xf32, #tpu.memory_space<vmem>>, vector<2x10xf32>
    tpu.vector_store %arg8[%c0_17, %c0_18], %21 {strides = array<i32>} : memref<2x10xf32, #tpu.memory_space<vmem>>, vector<2x10xf32>,
    return
  }
  func.func @transform_0(%arg0: i32) -> (i32, i32) {
    %c0_i32 = arith.constant 0 : i32
    %c0_i32_0 = arith.constant 0 : i32
    %c0_i32_1 = arith.constant 0 : i32
    return %c0_i32, %c0_i32_0 : i32, i32
  }
  func.func @transform_1(%arg0: i32) -> (i32, i32) {
    %c0_i32 = arith.constant 0 : i32
    %c0_i32_0 = arith.constant 0 : i32
    %c0_i32_1 = arith.constant 0 : i32
    return %c0_i32, %c0_i32_0 : i32, i32
  }
  func.func @transform_2(%arg0: i32) -> (i32, i32) {
    %c0_i32 = arith.constant 0 : i32
    %c0_i32_0 = arith.constant 0 : i32
    %c0_i32_1 = arith.constant 0 : i32
    return %c0_i32, %c0_i32_0 : i32, i32
  }
  func.func @transform_3(%arg0: i32) -> (i32, i32) {
    %c0_i32 = arith.constant 0 : i32
    %c0_i32_0 = arith.constant 0 : i32
    %c0_i32_1 = arith.constant 0 : i32
    return %c0_i32, %c0_i32_0 : i32, i32
  }
  func.func @transform_4(%arg0: i32) -> (i32, i32) {
    %c0_i32 = arith.constant 0 : i32
    %c0_i32_0 = arith.constant 0 : i32
    %c0_i32_1 = arith.constant 0 : i32
    return %c0_i32, %c0_i32_0 : i32, i32
  }
  func.func @transform_5(%arg0: i32) -> (i32, i32) {
    %c0_i32 = arith.constant 0 : i32
    %c0_i32_0 = arith.constant 0 : i32
    %c0_i32_1 = arith.constant 0 : i32
    return %c0_i32, %c0_i32_0 : i32, i32
  }
  func.func @transform_6(%arg0: i32) -> (i32, i32) {
    %c0_i32 = arith.constant 0 : i32
    %c0_i32_0 = arith.constant 0 : i32
    %c0_i32_1 = arith.constant 0 : i32
    return %c0_i32, %c0_i32_0 : i32, i32
  }
  func.func @transform_7(%arg0: i32) -> (i32, i32) {
    %c0_i32 = arith.constant 0 : i32
    %c0_i32_0 = arith.constant 0 : i32
    %c0_i32_1 = arith.constant 0 : i32
    return %c0_i32, %c0_i32_0 : i32, i32
  }
}

</mosaic_0001>

<bundles_post_ra>
// kernel: net_forward.3
= control target key start
LH: loop header
LB: loop body
LE: loop exit
PB: predicated region body
PF: predicated region fallthrough
CT: control target
= control target key end

     0   :  { %s1595_s12 = smov 0   ;;  %s1996_s0 = inlined_call_operand.vmem [shape: bf16[1568,128], index: 0, kind: input, shape index: {}]   ;;  %s1997_s1 = inlined_call_operand.vmem [shape: bf16[128,64], index: 1, kind: input, shape index: {}]   ;;  %s1998_s2 = inlined_call_operand.vmem [shape: f32[1,64], index: 2, kind: input, shape index: {}]   ;;  %s1999_s3 = inlined_call_operand.vmem [shape: bf16[1568,64], index: 3, kind: output, shape index: {}]  }
   0x1 LB: > { %s1239_s13 = sadd.s32 4294967295, %s1573_s12   ;;  %p1243_p0 = scmp.ge.s32.totalorder %s1573_s12, 1  ;;  %s1573_s12 = sphi %s1595_s12, %s13_s12  }
   0x2   : > { %p138_p1 = scmp.lt.s32.totalorder %s1573_s12, 3 }
   0x4   : > { %p139_p2 = pnand %p1243_p0, %p138_p1 }
   0x5   : > { %s162_s22 = smul.u32 (!%p139_p2), 98, %s1239_s13 }
   0x6   : > { %142 = sbr.rel (%p139_p2) target bundleno = 382 (0x17e), region = 32 }
   0x7   : > { %p163_p3 = scmp.lt.s32.totalorder (!%p139_p2), %s162_s22, 195 }
   0xb   : > { %v1532_v0 = vld [vmem:[%s1997_s1 + $0x38] sm:$0xff]  ;;  %v1531_v1 = vld [vmem:[%s1997_s1 + $0x30] sm:$0xff]  ;;  %v1530_v2 = vld [vmem:[%s1997_s1 + $0x28] sm:$0xff]  ;;  %s2001_s22 = smov (!%p163_p3, %s162_s22), 195  ;;  %vm1084_vm0 = vcmask 519168  }
   0xc   : > { %1534 = vmatpush.bf16.msra.mxu2 %v1532_v0  ;;  %1535 = vmatpush.bf16.msra.mxu3 %v1532_v0  ;;  %v1529_v3 = vld [vmem:[%s1997_s1 + $0x20] sm:$0xff]  ;;  %v1528_v4 = vld [vmem:[%s1997_s1 + $0x18] sm:$0xff]  ;;  %v1527_v5 = vld [vmem:[%s1997_s1 + $0x10] sm:$0xff]  ;;  %s1244_s29 = sshll.u32 %s2001_s22, 2 }
   0xd   : > { %634 = vmatpush.bf16.msra.mxu0 %v1532_v0  ;;  %1533 = vmatpush.bf16.msra.mxu1 %v1532_v0  ;;  %v1526_v6 = vld [vmem:[%s1997_s1 + $0x8] sm:$0xff]  ;;  %v1525_v7 = vld [vmem:[%s1997_s1] sm:$0xff]  ;;  %s1635_s7 = scalar_lea.vmem %s1996_s0, %s1244_s29  ;;  %s1685_s13 = scalar_lea.vmem %s1999_s3, %s1244_s29 }
   0xe   : > { %v1500_v8 = vld [vmem:[%s1635_s7 + $0xc0] sm:$0xff]  ;;  %v1513_v9 = vld [vmem:[%s1635_s7 + $0x128] sm:$0xff]  ;;  %v1514_v13 = vld [vmem:[%s1635_s7 + $0x130] sm:$0xff] }
   0xf   : > { %v1476_v10 = vld [vmem:[%s1635_s7] sm:$0xff]  ;;  %v1501_v12 = vld [vmem:[%s1635_s7 + $0xc8] sm:$0xff]  ;;  %v1502_v16 = vld [vmem:[%s1635_s7 + $0xd0] sm:$0xff] }
  0x10   : > { %1537 = vmatpush.bf16.msra.mxu2 %v1531_v1  ;;  %1538 = vmatpush.bf16.msra.mxu3 %v1531_v1  ;;  %v1488_v11 = vld [vmem:[%s1635_s7 + $0x60] sm:$0xff]  ;;  %v1477_v14 = vld [vmem:[%s1635_s7 + $0x8] sm:$0xff]  ;;  %v1515_v17 = vld [vmem:[%s1635_s7 + $0x138] sm:$0xff] }
  0x11   : > { %635 = vmatpush.bf16.msra.mxu0 %v1531_v1  ;;  %1536 = vmatpush.bf16.msra.mxu1 %v1531_v1  ;;  %v1489_v15 = vld [vmem:[%s1635_s7 + $0x68] sm:$0xff]  ;;  %v1478_v18 = vld [vmem:[%s1635_s7 + $0x10] sm:$0xff]  ;;  %v1503_v20 = vld [vmem:[%s1635_s7 + $0xd8] sm:$0xff] }
  0x12   : > { %v1490_v19 = vld [vmem:[%s1635_s7 + $0x70] sm:$0xff]  ;;  %v1516_v21 = vld [vmem:[%s1635_s7 + $0x140] sm:$0xff]  ;;  %v1479_v22 = vld [vmem:[%s1635_s7 + $0x18] sm:$0xff] }
  0x13   : > { %v1491_v23 = vld [vmem:[%s1635_s7 + $0x78] sm:$0xff]  ;;  %v1504_v24 = vld [vmem:[%s1635_s7 + $0xe0] sm:$0xff]  ;;  %v1517_v25 = vld [vmem:[%s1635_s7 + $0x148] sm:$0xff] }
  0x14   : > { %1540 = vmatpush.bf16.msra.mxu2 %v1530_v2  ;;  %1541 = vmatpush.bf16.msra.mxu3 %v1530_v2  ;;  %v1480_v26 = vld [vmem:[%s1635_s7 + $0x20] sm:$0xff]  ;;  %v1505_v28 = vld [vmem:[%s1635_s7 + $0xe8] sm:$0xff]  ;;  %v1518_v29 = vld [vmem:[%s1635_s7 + $0x150] sm:$0xff] }
  0x15   : > { %636 = vmatpush.bf16.msra.mxu0 %v1530_v2  ;;  %1539 = vmatpush.bf16.msra.mxu1 %v1530_v2  ;;  %v1492_v27 = vld [vmem:[%s1635_s7 + $0x80] sm:$0xff]  ;;  %v1481_v30 = vld [vmem:[%s1635_s7 + $0x28] sm:$0xff]  ;;  %v1506_v32 = vld [vmem:[%s1635_s7 + $0xf0] sm:$0xff] }
  0x16   : > { %v1493_v31 = vld [vmem:[%s1635_s7 + $0x88] sm:$0xff]  ;;  %v1519_v33 = vld [vmem:[%s1635_s7 + $0x158] sm:$0xff]  ;;  %v1482_v34 = vld [vmem:[%s1635_s7 + $0x30] sm:$0xff] }
  0x17   : > { %v1494_v35 = vld [vmem:[%s1635_s7 + $0x90] sm:$0xff]  ;;  %v1507_v36 = vld [vmem:[%s1635_s7 + $0xf8] sm:$0xff]  ;;  %v1520_v37 = vld [vmem:[%s1635_s7 + $0x160] sm:$0xff] }
  0x18   : > { %1543 = vmatpush.bf16.msra.mxu2 %v1529_v3  ;;  %1544 = vmatpush.bf16.msra.mxu3 %v1529_v3  ;;  %v1483_v38 = vld [vmem:[%s1635_s7 + $0x38] sm:$0xff]  ;;  %v1508_v40 = vld [vmem:[%s1635_s7 + $0x100] sm:$0xff]  ;;  %v1521_v41 = vld [vmem:[%s1635_s7 + $0x168] sm:$0xff] }
  0x19   : > { %637 = vmatpush.bf16.msra.mxu0 %v1529_v3  ;;  %1542 = vmatpush.bf16.msra.mxu1 %v1529_v3  ;;  %v1495_v39 = vld [vmem:[%s1635_s7 + $0x98] sm:$0xff]  ;;  %v1674_v42 = vld [vmem:[%s1998_s2] ss:$0 sm:$0xff] }
  0x1a   : > { %v1484_v43 = vld [vmem:[%s1635_s7 + $0x40] sm:$0xff] }
  0x1b   : > { %v1496_v44 = vld [vmem:[%s1635_s7 + $0xa0] sm:$0xff] }
  0x1c   : > { %1546 = vmatpush.bf16.msra.mxu2 %v1528_v4  ;;  %1547 = vmatpush.bf16.msra.mxu3 %v1528_v4 }
  0x1d   : > { %638 = vmatpush.bf16.msra.mxu0 %v1528_v4  ;;  %1545 = vmatpush.bf16.msra.mxu1 %v1528_v4 }
  0x20   : > { %1549 = vmatpush.bf16.msra.mxu2 %v1527_v5  ;;  %1550 = vmatpush.bf16.msra.mxu3 %v1527_v5 }
  0x21   : > { %639 = vmatpush.bf16.msra.mxu0 %v1527_v5  ;;  %1548 = vmatpush.bf16.msra.mxu1 %v1527_v5 }
  0x24   : > { %1552 = vmatpush.bf16.msra.mxu2 %v1526_v6  ;;  %1553 = vmatpush.bf16.msra.mxu3 %v1526_v6 }
  0x25   : > { %640 = vmatpush.bf16.msra.mxu0 %v1526_v6  ;;  %1551 = vmatpush.bf16.msra.mxu1 %v1526_v6 }
  0x28   : > { %1555 = vmatpush.bf16.msra.mxu2 %v1525_v7  ;;  %1556 = vmatpush.bf16.msra.mxu3 %v1525_v7 }
  0x29   : > { %641 = vmatpush.bf16.msra.mxu0 %v1525_v7  ;;  %1554 = vmatpush.bf16.msra.mxu1 %v1525_v7 }
  0x2b   : > { %762 = vmatmul.bf16.vlgmr.msra.gmra.mxu2 %v1500_v8  ;;  %827 = vmatmul.bf16.vlgmr.msra.gmra.mxu3 %v1513_v9  ;;  %v1509_v8 = vld [vmem:[%s1635_s7 + $0x108] sm:$0xff] }
  0x2c   : > { %642 = vmatmul.bf16.vlgmr.msra.gmra.mxu0 %v1476_v10  ;;  %702 = vmatmul.bf16.vlgmr.msra.gmra.mxu1 %v1488_v11  ;;  %v1522_v10 = vld [vmem:[%s1635_s7 + $0x170] sm:$0xff]  ;;  %v1485_v11 = vld [vmem:[%s1635_s7 + $0x48] sm:$0xff] }
  0x3b   : > { %767 = vmatmul.bf16.gmra.mxu2 %v1501_v12  ;;  %832 = vmatmul.bf16.gmra.mxu3 %v1514_v13  ;;  %v1497_v12 = vld [vmem:[%s1635_s7 + $0xa8] sm:$0xff] }
  0x3c   : > { %647 = vmatmul.bf16.gmra.mxu0 %v1477_v14  ;;  %707 = vmatmul.bf16.gmra.mxu1 %v1489_v15 }
  0x4b   : > { %772 = vmatmul.bf16.gmra.mxu2 %v1502_v16  ;;  %837 = vmatmul.bf16.gmra.mxu3 %v1515_v17 }
  0x4c   : > { %652 = vmatmul.bf16.gmra.mxu0 %v1478_v18  ;;  %712 = vmatmul.bf16.gmra.mxu1 %v1490_v19 }
  0x5b   : > { %777 = vmatmul.bf16.gmra.mxu2 %v1503_v20  ;;  %842 = vmatmul.bf16.gmra.mxu3 %v1516_v21 }
  0x5c   : > { %657 = vmatmul.bf16.gmra.mxu0 %v1479_v22  ;;  %717 = vmatmul.bf16.gmra.mxu1 %v1491_v23 }
  0x6b   : > { %782 = vmatmul.bf16.gmra.mxu2 %v1504_v24  ;;  %847 = vmatmul.bf16.gmra.mxu3 %v1517_v25 }
  0x6c   : > { %662 = vmatmul.bf16.gmra.mxu0 %v1480_v26  ;;  %722 = vmatmul.bf16.gmra.mxu1 %v1492_v27 }
  0x7b   : > { %787 = vmatmul.bf16.gmra.mxu2 %v1505_v28  ;;  %852 = vmatmul.bf16.gmra.mxu3 %v1518_v29 }
  0x7c   : > { %667 = vmatmul.bf16.gmra.mxu0 %v1481_v30  ;;  %727 = vmatmul.bf16.gmra.mxu1 %v1493_v31 }
  0x8b   : > { %792 = vmatmul.bf16.gmra.mxu2 %v1506_v32  ;;  %857 = vmatmul.bf16.gmra.mxu3 %v1519_v33 }
  0x8c   : > { %672 = vmatmul.bf16.gmra.mxu0 %v1482_v34  ;;  %732 = vmatmul.bf16.gmra.mxu1 %v1494_v35 }
  0x9b   : > { %797 = vmatmul.bf16.gmra.mxu2 %v1507_v36  ;;  %862 = vmatmul.bf16.gmra.mxu3 %v1520_v37 }
  0x9c   : > { %677 = vmatmul.bf16.gmra.mxu0 %v1483_v38  ;;  %737 = vmatmul.bf16.gmra.mxu1 %v1495_v39 }
  0xa9   : > { %v643_v45 = vpop.f32.mrf.mxu0  ;;  %v703_v46 = vpop.f32.mrf.mxu1 }
  0xaa   : > { %v644_v47 = vadd.f32 %v1674_v42, %v643_v45  ;;  %v704_v48 = vadd.f32 %v1674_v42, %v703_v46  ;;  %v1510_v45 = vld [vmem:[%s1635_s7 + $0x110] sm:$0xff] }
  0xab   : > { %802 = vmatmul.bf16.gmra.mxu2 %v1508_v40  ;;  %867 = vmatmul.bf16.gmra.mxu3 %v1521_v41 }
  0xac   : > { %v888_v49 = vmax.f32 %v644_v47, 0.0  ;;  %v912_v50 = vmax.f32 %v704_v48, 0.0  ;;  %682 = vmatmul.bf16.gmra.mxu0 %v1484_v43  ;;  %742 = vmatmul.bf16.gmra.mxu1 %v1496_v44  ;;  %v1523_v47 = vld [vmem:[%s1635_s7 + $0x178] sm:$0xff]  ;;  %v1486_v48 = vld [vmem:[%s1635_s7 + $0x50] sm:$0xff] }
  0xae   : > { %v763_v51 = vpop.f32.mrf.mxu2  ;;  %v986_v52 = vpack.c.bf16 %v888_v49, %v888_v49  ;;  %v1010_v53 = vpack.c.bf16 %v912_v50, %v912_v50  ;;  %v828_v54 = vpop.f32.mrf.mxu3  ;;  %v1498_v49 = vld [vmem:[%s1635_s7 + $0xb0] sm:$0xff] }
  0xaf   : > { %v764_v55 = vadd.f32 %v1674_v42, %v763_v51  ;;  %v829_v56 = vadd.f32 %v1674_v42, %v828_v54 }
  0xb0   : > { %1085 = vst.msk [vmem:[%s1685_s13] sm:$0xf] %vm1084_vm0, %v986_v52 }
  0xb1   : > { %v936_v57 = vmax.f32 %v764_v55, 0.0  ;;  %1109 = vst.msk [vmem:[%s1685_s13 + $0x60] sm:$0xf] %vm1084_vm0, %v1010_v53  ;;  %v962_v58 = vmax.f32 %v829_v56, 0.0  ;;  %v645_v59 = vpop.f32.mrf.mxu0  ;;  %v705_v60 = vpop.f32.mrf.mxu1 }
  0xb2   : > { %v646_v61 = vadd.f32 %v1674_v42, %v645_v59  ;;  %v706_v62 = vadd.f32 %v1674_v42, %v705_v60 }
  0xb3   : > { %v1034_v63 = vpack.c.bf16 %v936_v57, %v936_v57  ;;  %v1060_v0 = vpack.c.bf16 %v962_v58, %v962_v58 }
  0xb4   : > { %v889_v1 = vmax.f32 %v646_v61, 0.0  ;;  %v913_v2 = vmax.f32 %v706_v62, 0.0 }
  0xb5   : > { %1133 = vst.msk [vmem:[%s1685_s13 + $0xc0] sm:$0xf] %vm1084_vm0, %v1034_v63 }
  0xb6   : > { %v765_v3 = vpop.f32.mrf.mxu2  ;;  %1159 = vst.msk [vmem:[%s1685_s13 + $0x128] sm:$0xf] %vm1084_vm0, %v1060_v0  ;;  %v987_v4 = vpack.c.bf16 %v889_v1, %v889_v1  ;;  %v1011_v5 = vpack.c.bf16 %v913_v2, %v913_v2  ;;  %v830_v6 = vpop.f32.mrf.mxu3 }
  0xb7   : > { %v766_v7 = vadd.f32 %v1674_v42, %v765_v3  ;;  %v831_v9 = vadd.f32 %v1674_v42, %v830_v6 }
  0xb8   : > { %1086 = vst.msk [vmem:[%s1685_s13 + $0x4] sm:$0xf] %vm1084_vm0, %v987_v4 }
  0xb9   : > { %v937_v13 = vmax.f32 %v766_v7, 0.0  ;;  %1110 = vst.msk [vmem:[%s1685_s13 + $0x64] sm:$0xf] %vm1084_vm0, %v1011_v5  ;;  %v963_v14 = vmax.f32 %v831_v9, 0.0  ;;  %v648_v15 = vpop.f32.mrf.mxu0  ;;  %v708_v16 = vpop.f32.mrf.mxu1 }
  0xba   : > { %v649_v17 = vadd.f32 %v1674_v42, %v648_v15  ;;  %v709_v18 = vadd.f32 %v1674_v42, %v708_v16 }
  0xbb   : > { %v1035_v19 = vpack.c.bf16 %v937_v13, %v937_v13  ;;  %807 = vmatmul.bf16.gmra.mxu2 %v1509_v8  ;;  %v1061_v20 = vpack.c.bf16 %v963_v14, %v963_v14  ;;  %872 = vmatmul.bf16.gmra.mxu3 %v1522_v10 }
  0xbc   : > { %v890_v21 = vmax.f32 %v649_v17, 0.0  ;;  %v914_v22 = vmax.f32 %v709_v18, 0.0  ;;  %687 = vmatmul.bf16.gmra.mxu0 %v1485_v11  ;;  %747 = vmatmul.bf16.gmra.mxu1 %v1497_v12  ;;  %v1511_v17 = vld [vmem:[%s1635_s7 + $0x118] sm:$0xff] }
  0xbd   : > { %1134 = vst.msk [vmem:[%s1685_s13 + $0xc4] sm:$0xf] %vm1084_vm0, %v1035_v19  ;;  %v1524_v19 = vld [vmem:[%s1635_s7 + $0x180] sm:$0xff] }
  0xbe   : > { %v768_v23 = vpop.f32.mrf.mxu2  ;;  %1160 = vst.msk [vmem:[%s1685_s13 + $0x12c] sm:$0xf] %vm1084_vm0, %v1061_v20  ;;  %v988_v24 = vpack.c.bf16 %v890_v21, %v890_v21  ;;  %v1012_v25 = vpack.c.bf16 %v914_v22, %v914_v22  ;;  %v833_v26 = vpop.f32.mrf.mxu3  ;;  %v1487_v20 = vld [vmem:[%s1635_s7 + $0x58] sm:$0xff] }
  0xbf   : > { %v769_v27 = vadd.f32 %v1674_v42, %v768_v23  ;;  %v834_v28 = vadd.f32 %v1674_v42, %v833_v26  ;;  %v1499_v21 = vld [vmem:[%s1635_s7 + $0xb8] sm:$0xff] }
  0xc0   : > { %1087 = vst.msk [vmem:[%s1685_s13 + $0x8] sm:$0xf] %vm1084_vm0, %v988_v24 }
  0xc1   : > { %v938_v29 = vmax.f32 %v769_v27, 0.0  ;;  %1111 = vst.msk [vmem:[%s1685_s13 + $0x68] sm:$0xf] %vm1084_vm0, %v1012_v25  ;;  %v964_v30 = vmax.f32 %v834_v28, 0.0  ;;  %v650_v31 = vpop.f32.mrf.mxu0  ;;  %v710_v32 = vpop.f32.mrf.mxu1 }
  0xc2   : > { %v651_v33 = vadd.f32 %v1674_v42, %v650_v31  ;;  %v711_v34 = vadd.f32 %v1674_v42, %v710_v32 }
  0xc3   : > { %v1036_v35 = vpack.c.bf16 %v938_v29, %v938_v29  ;;  %v1062_v36 = vpack.c.bf16 %v964_v30, %v964_v30 }
  0xc4   : > { %v891_v37 = vmax.f32 %v651_v33, 0.0  ;;  %v915_v38 = vmax.f32 %v711_v34, 0.0 }
  0xc5   : > { %1135 = vst.msk [vmem:[%s1685_s13 + $0xc8] sm:$0xf] %vm1084_vm0, %v1036_v35 }
  0xc6   : > { %v770_v39 = vpop.f32.mrf.mxu2  ;;  %1161 = vst.msk [vmem:[%s1685_s13 + $0x130] sm:$0xf] %vm1084_vm0, %v1062_v36  ;;  %v989_v40 = vpack.c.bf16 %v891_v37, %v891_v37  ;;  %v1013_v41 = vpack.c.bf16 %v915_v38, %v915_v38  ;;  %v835_v43 = vpop.f32.mrf.mxu3 }
  0xc7   : > { %v771_v44 = vadd.f32 %v1674_v42, %v770_v39  ;;  %v836_v46 = vadd.f32 %v1674_v42, %v835_v43 }
  0xc8   : > { %1088 = vst.msk [vmem:[%s1685_s13 + $0xc] sm:$0xf] %vm1084_vm0, %v989_v40 }
  0xc9   : > { %v939_v50 = vmax.f32 %v771_v44, 0.0  ;;  %1112 = vst.msk [vmem:[%s1685_s13 + $0x6c] sm:$0xf] %vm1084_vm0, %v1013_v41  ;;  %v965_v51 = vmax.f32 %v836_v46, 0.0  ;;  %v653_v52 = vpop.f32.mrf.mxu0  ;;  %v713_v53 = vpop.f32.mrf.mxu1 }
  0xca   : > { %v654_v54 = vadd.f32 %v1674_v42, %v653_v52  ;;  %v714_v55 = vadd.f32 %v1674_v42, %v713_v53 }
  0xcb   : > { %v1037_v56 = vpack.c.bf16 %v939_v50, %v939_v50  ;;  %812 = vmatmul.bf16.gmra.mxu2 %v1510_v45  ;;  %v1063_v57 = vpack.c.bf16 %v965_v51, %v965_v51  ;;  %877 = vmatmul.bf16.gmra.mxu3 %v1523_v47 }
  0xcc   : > { %v892_v58 = vmax.f32 %v654_v54, 0.0  ;;  %v916_v59 = vmax.f32 %v714_v55, 0.0  ;;  %692 = vmatmul.bf16.gmra.mxu0 %v1486_v48  ;;  %752 = vmatmul.bf16.gmra.mxu1 %v1498_v49  ;;  %v1512_v54 = vld [vmem:[%s1635_s7 + $0x120] sm:$0xff] }
  0xcd   : > { %1136 = vst.msk [vmem:[%s1685_s13 + $0xcc] sm:$0xf] %vm1084_vm0, %v1037_v56 }
  0xce   : > { %v773_v60 = vpop.f32.mrf.mxu2  ;;  %1162 = vst.msk [vmem:[%s1685_s13 + $0x134] sm:$0xf] %vm1084_vm0, %v1063_v57  ;;  %v990_v61 = vpack.c.bf16 %v892_v58, %v892_v58  ;;  %v1014_v62 = vpack.c.bf16 %v916_v59, %v916_v59  ;;  %v838_v63 = vpop.f32.mrf.mxu3 }
  0xcf   : > { %v774_v0 = vadd.f32 %v1674_v42, %v773_v60  ;;  %v839_v1 = vadd.f32 %v1674_v42, %v838_v63 }
  0xd0   : > { %1089 = vst.msk [vmem:[%s1685_s13 + $0x10] sm:$0xf] %vm1084_vm0, %v990_v61 }
  0xd1   : > { %v940_v2 = vmax.f32 %v774_v0, 0.0  ;;  %1113 = vst.msk [vmem:[%s1685_s13 + $0x70] sm:$0xf] %vm1084_vm0, %v1014_v62  ;;  %v966_v3 = vmax.f32 %v839_v1, 0.0  ;;  %v655_v4 = vpop.f32.mrf.mxu0  ;;  %v715_v5 = vpop.f32.mrf.mxu1 }
  0xd2   : > { %v656_v6 = vadd.f32 %v1674_v42, %v655_v4  ;;  %v716_v7 = vadd.f32 %v1674_v42, %v715_v5 }
  0xd3   : > { %v1038_v8 = vpack.c.bf16 %v940_v2, %v940_v2  ;;  %v1064_v9 = vpack.c.bf16 %v966_v3, %v966_v3 }
  0xd4   : > { %v893_v10 = vmax.f32 %v656_v6, 0.0  ;;  %v917_v11 = vmax.f32 %v716_v7, 0.0 }
  0xd5   : > { %1137 = vst.msk [vmem:[%s1685_s13 + $0xd0] sm:$0xf] %vm1084_vm0, %v1038_v8 }
  0xd6   : > { %v775_v12 = vpop.f32.mrf.mxu2  ;;  %1163 = vst.msk [vmem:[%s1685_s13 + $0x138] sm:$0xf] %vm1084_vm0, %v1064_v9  ;;  %v991_v13 = vpack.c.bf16 %v893_v10, %v893_v10  ;;  %v1015_v14 = vpack.c.bf16 %v917_v11, %v917_v11  ;;  %v840_v15 = vpop.f32.mrf.mxu3 }
  0xd7   : > { %v776_v16 = vadd.f32 %v1674_v42, %v775_v12  ;;  %v841_v18 = vadd.f32 %v1674_v42, %v840_v15 }
  0xd8   : > { %1090 = vst.msk [vmem:[%s1685_s13 + $0x14] sm:$0xf] %vm1084_vm0, %v991_v13 }
  0xd9   : > { %v941_v22 = vmax.f32 %v776_v16, 0.0  ;;  %1114 = vst.msk [vmem:[%s1685_s13 + $0x74] sm:$0xf] %vm1084_vm0, %v1015_v14  ;;  %v967_v23 = vmax.f32 %v841_v18, 0.0  ;;  %v658_v24 = vpop.f32.mrf.mxu0  ;;  %v718_v25 = vpop.f32.mrf.mxu1 }
  0xda   : > { %v659_v26 = vadd.f32 %v1674_v42, %v658_v24  ;;  %v719_v27 = vadd.f32 %v1674_v42, %v718_v25 }
  0xdb   : > { %v1039_v28 = vpack.c.bf16 %v941_v22, %v941_v22  ;;  %817 = vmatmul.bf16.gmra.mxu2 %v1511_v17  ;;  %v1065_v29 = vpack.c.bf16 %v967_v23, %v967_v23  ;;  %882 = vmatmul.bf16.gmra.mxu3 %v1524_v19 }
  0xdc   : > { %v894_v30 = vmax.f32 %v659_v26, 0.0  ;;  %v918_v31 = vmax.f32 %v719_v27, 0.0  ;;  %697 = vmatmul.bf16.gmra.mxu0 %v1487_v20  ;;  %757 = vmatmul.bf16.gmra.mxu1 %v1499_v21 }
  0xdd   : > { %1138 = vst.msk [vmem:[%s1685_s13 + $0xd4] sm:$0xf] %vm1084_vm0, %v1039_v28 }
  0xde   : > { %v778_v32 = vpop.f32.mrf.mxu2  ;;  %1164 = vst.msk [vmem:[%s1685_s13 + $0x13c] sm:$0xf] %vm1084_vm0, %v1065_v29  ;;  %v992_v33 = vpack.c.bf16 %v894_v30, %v894_v30  ;;  %v1016_v34 = vpack.c.bf16 %v918_v31, %v918_v31  ;;  %v843_v35 = vpop.f32.mrf.mxu3 }
  0xdf   : > { %v779_v36 = vadd.f32 %v1674_v42, %v778_v32  ;;  %v844_v37 = vadd.f32 %v1674_v42, %v843_v35 }
  0xe0   : > { %1091 = vst.msk [vmem:[%s1685_s13 + $0x18] sm:$0xf] %vm1084_vm0, %v992_v33 }
  0xe1   : > { %v942_v38 = vmax.f32 %v779_v36, 0.0  ;;  %1115 = vst.msk [vmem:[%s1685_s13 + $0x78] sm:$0xf] %vm1084_vm0, %v1016_v34  ;;  %v968_v39 = vmax.f32 %v844_v37, 0.0  ;;  %v660_v40 = vpop.f32.mrf.mxu0  ;;  %v720_v41 = vpop.f32.mrf.mxu1 }
  0xe2   : > { %v661_v43 = vadd.f32 %v1674_v42, %v660_v40  ;;  %v721_v44 = vadd.f32 %v1674_v42, %v720_v41 }
  0xe3   : > { %v1040_v45 = vpack.c.bf16 %v942_v38, %v942_v38  ;;  %v1066_v46 = vpack.c.bf16 %v968_v39, %v968_v39 }
  0xe4   : > { %v895_v47 = vmax.f32 %v661_v43, 0.0  ;;  %v919_v48 = vmax.f32 %v721_v44, 0.0 }
  0xe5   : > { %1139 = vst.msk [vmem:[%s1685_s13 + $0xd8] sm:$0xf] %vm1084_vm0, %v1040_v45 }
  0xe6   : > { %v780_v49 = vpop.f32.mrf.mxu2  ;;  %1165 = vst.msk [vmem:[%s1685_s13 + $0x140] sm:$0xf] %vm1084_vm0, %v1066_v46  ;;  %v993_v50 = vpack.c.bf16 %v895_v47, %v895_v47  ;;  %v1017_v51 = vpack.c.bf16 %v919_v48, %v919_v48  ;;  %v845_v52 = vpop.f32.mrf.mxu3 }
  0xe7   : > { %v781_v53 = vadd.f32 %v1674_v42, %v780_v49  ;;  %v846_v55 = vadd.f32 %v1674_v42, %v845_v52 }
  0xe8   : > { %1092 = vst.msk [vmem:[%s1685_s13 + $0x1c] sm:$0xf] %vm1084_vm0, %v993_v50 }
  0xe9   : > { %v943_v56 = vmax.f32 %v781_v53, 0.0  ;;  %1116 = vst.msk [vmem:[%s1685_s13 + $0x7c] sm:$0xf] %vm1084_vm0, %v1017_v51  ;;  %v969_v57 = vmax.f32 %v846_v55, 0.0  ;;  %v663_v58 = vpop.f32.mrf.mxu0  ;;  %v723_v59 = vpop.f32.mrf.mxu1 }
  0xea   : > { %v664_v60 = vadd.f32 %v1674_v42, %v663_v58  ;;  %v724_v61 = vadd.f32 %v1674_v42, %v723_v59 }
  0xeb   : > { %v1041_v62 = vpack.c.bf16 %v943_v56, %v943_v56  ;;  %822 = vmatmul.bf16.gmra.mxu2 %v1512_v54  ;;  %v1067_v63 = vpack.c.bf16 %v969_v57, %v969_v57 }
  0xec   : > { %v896_v0 = vmax.f32 %v664_v60, 0.0  ;;  %v920_v1 = vmax.f32 %v724_v61, 0.0 }
  0xed   : > { %1140 = vst.msk [vmem:[%s1685_s13 + $0xdc] sm:$0xf] %vm1084_vm0, %v1041_v62 }
  0xee   : > { %v783_v2 = vpop.f32.mrf.mxu2  ;;  %1166 = vst.msk [vmem:[%s1685_s13 + $0x144] sm:$0xf] %vm1084_vm0, %v1067_v63  ;;  %v994_v3 = vpack.c.bf16 %v896_v0, %v896_v0  ;;  %v1018_v4 = vpack.c.bf16 %v920_v1, %v920_v1  ;;  %v848_v5 = vpop.f32.mrf.mxu3 }
  0xef   : > { %v784_v6 = vadd.f32 %v1674_v42, %v783_v2  ;;  %v849_v7 = vadd.f32 %v1674_v42, %v848_v5 }
  0xf0   : > { %1093 = vst.msk [vmem:[%s1685_s13 + $0x20] sm:$0xf] %vm1084_vm0, %v994_v3 }
  0xf1   : > { %v944_v8 = vmax.f32 %v784_v6, 0.0  ;;  %1117 = vst.msk [vmem:[%s1685_s13 + $0x80] sm:$0xf] %vm1084_vm0, %v1018_v4  ;;  %v970_v9 = vmax.f32 %v849_v7, 0.0  ;;  %v665_v10 = vpop.f32.mrf.mxu0  ;;  %v725_v11 = vpop.f32.mrf.mxu1 }
  0xf2   : > { %v666_v12 = vadd.f32 %v1674_v42, %v665_v10  ;;  %v726_v13 = vadd.f32 %v1674_v42, %v725_v11 }
  0xf3   : > { %v1042_v14 = vpack.c.bf16 %v944_v8, %v944_v8  ;;  %v1068_v15 = vpack.c.bf16 %v970_v9, %v970_v9 }
  0xf4   : > { %v897_v16 = vmax.f32 %v666_v12, 0.0  ;;  %v921_v17 = vmax.f32 %v726_v13, 0.0 }
  0xf5   : > { %1141 = vst.msk [vmem:[%s1685_s13 + $0xe0] sm:$0xf] %vm1084_vm0, %v1042_v14 }
  0xf6   : > { %v785_v18 = vpop.f32.mrf.mxu2  ;;  %1167 = vst.msk [vmem:[%s1685_s13 + $0x148] sm:$0xf] %vm1084_vm0, %v1068_v15  ;;  %v995_v19 = vpack.c.bf16 %v897_v16, %v897_v16  ;;  %v1019_v20 = vpack.c.bf16 %v921_v17, %v921_v17  ;;  %v850_v21 = vpop.f32.mrf.mxu3 }
  0xf7   : > { %v786_v22 = vadd.f32 %v1674_v42, %v785_v18  ;;  %v851_v23 = vadd.f32 %v1674_v42, %v850_v21 }
  0xf8   : > { %1094 = vst.msk [vmem:[%s1685_s13 + $0x24] sm:$0xf] %vm1084_vm0, %v995_v19 }
  0xf9   : > { %v945_v24 = vmax.f32 %v786_v22, 0.0  ;;  %1118 = vst.msk [vmem:[%s1685_s13 + $0x84] sm:$0xf] %vm1084_vm0, %v1019_v20  ;;  %v971_v25 = vmax.f32 %v851_v23, 0.0  ;;  %v668_v26 = vpop.f32.mrf.mxu0  ;;  %v728_v27 = vpop.f32.mrf.mxu1 }
  0xfa   : > { %v669_v28 = vadd.f32 %v1674_v42, %v668_v26  ;;  %v729_v29 = vadd.f32 %v1674_v42, %v728_v27 }
  0xfb   : > { %v1043_v30 = vpack.c.bf16 %v945_v24, %v945_v24  ;;  %v1069_v31 = vpack.c.bf16 %v971_v25, %v971_v25 }
  0xfc   : > { %v898_v32 = vmax.f32 %v669_v28, 0.0  ;;  %v922_v33 = vmax.f32 %v729_v29, 0.0 }
  0xfd   : > { %1142 = vst.msk [vmem:[%s1685_s13 + $0xe4] sm:$0xf] %vm1084_vm0, %v1043_v30 }
  0xfe   : > { %v788_v34 = vpop.f32.mrf.mxu2  ;;  %1168 = vst.msk [vmem:[%s1685_s13 + $0x14c] sm:$0xf] %vm1084_vm0, %v1069_v31  ;;  %v996_v35 = vpack.c.bf16 %v898_v32, %v898_v32  ;;  %v1020_v36 = vpack.c.bf16 %v922_v33, %v922_v33  ;;  %v853_v37 = vpop.f32.mrf.mxu3 }
  0xff   : > { %v789_v38 = vadd.f32 %v1674_v42, %v788_v34  ;;  %v854_v39 = vadd.f32 %v1674_v42, %v853_v37 }
 0x100   : > { %1095 = vst.msk [vmem:[%s1685_s13 + $0x28] sm:$0xf] %vm1084_vm0, %v996_v35 }
 0x101   : > { %v946_v40 = vmax.f32 %v789_v38, 0.0  ;;  %1119 = vst.msk [vmem:[%s1685_s13 + $0x88] sm:$0xf] %vm1084_vm0, %v1020_v36  ;;  %v972_v41 = vmax.f32 %v854_v39, 0.0  ;;  %v670_v43 = vpop.f32.mrf.mxu0  ;;  %v730_v44 = vpop.f32.mrf.mxu1 }
 0x102   : > { %v671_v45 = vadd.f32 %v1674_v42, %v670_v43  ;;  %v731_v46 = vadd.f32 %v1674_v42, %v730_v44 }
 0x103   : > { %v1044_v47 = vpack.c.bf16 %v946_v40, %v946_v40  ;;  %v1070_v48 = vpack.c.bf16 %v972_v41, %v972_v41 }
 0x104   : > { %v899_v49 = vmax.f32 %v671_v45, 0.0  ;;  %v923_v50 = vmax.f32 %v731_v46, 0.0 }
 0x105   : > { %1143 = vst.msk [vmem:[%s1685_s13 + $0xe8] sm:$0xf] %vm1084_vm0, %v1044_v47 }
 0x106   : > { %v790_v51 = vpop.f32.mrf.mxu2  ;;  %1169 = vst.msk [vmem:[%s1685_s13 + $0x150] sm:$0xf] %vm1084_vm0, %v1070_v48  ;;  %v997_v52 = vpack.c.bf16 %v899_v49, %v899_v49  ;;  %v1021_v53 = vpack.c.bf16 %v923_v50, %v923_v50  ;;  %v855_v54 = vpop.f32.mrf.mxu3 }
 0x107   : > { %v791_v55 = vadd.f32 %v1674_v42, %v790_v51  ;;  %v856_v56 = vadd.f32 %v1674_v42, %v855_v54 }
 0x108   : > { %1096 = vst.msk [vmem:[%s1685_s13 + $0x2c] sm:$0xf] %vm1084_vm0, %v997_v52 }
 0x109   : > { %v947_v57 = vmax.f32 %v791_v55, 0.0  ;;  %1120 = vst.msk [vmem:[%s1685_s13 + $0x8c] sm:$0xf] %vm1084_vm0, %v1021_v53  ;;  %v973_v58 = vmax.f32 %v856_v56, 0.0  ;;  %v673_v59 = vpop.f32.mrf.mxu0  ;;  %v733_v60 = vpop.f32.mrf.mxu1 }
 0x10a   : > { %v674_v61 = vadd.f32 %v1674_v42, %v673_v59  ;;  %v734_v62 = vadd.f32 %v1674_v42, %v733_v60 }
 0x10b   : > { %v1045_v63 = vpack.c.bf16 %v947_v57, %v947_v57  ;;  %v1071_v0 = vpack.c.bf16 %v973_v58, %v973_v58 }
 0x10c   : > { %v900_v1 = vmax.f32 %v674_v61, 0.0  ;;  %v924_v2 = vmax.f32 %v734_v62, 0.0 }
 0x10d   : > { %1144 = vst.msk [vmem:[%s1685_s13 + $0xec] sm:$0xf] %vm1084_vm0, %v1045_v63 }
 0x10e   : > { %v793_v3 = vpop.f32.mrf.mxu2  ;;  %1170 = vst.msk [vmem:[%s1685_s13 + $0x154] sm:$0xf] %vm1084_vm0, %v1071_v0  ;;  %v998_v4 = vpack.c.bf16 %v900_v1, %v900_v1  ;;  %v1022_v5 = vpack.c.bf16 %v924_v2, %v924_v2  ;;  %v858_v6 = vpop.f32.mrf.mxu3 }
 0x10f   : > { %v794_v7 = vadd.f32 %v1674_v42, %v793_v3  ;;  %v859_v8 = vadd.f32 %v1674_v42, %v858_v6 }
 0x110   : > { %1097 = vst.msk [vmem:[%s1685_s13 + $0x30] sm:$0xf] %vm1084_vm0, %v998_v4 }
 0x111   : > { %v948_v9 = vmax.f32 %v794_v7, 0.0  ;;  %1121 = vst.msk [vmem:[%s1685_s13 + $0x90] sm:$0xf] %vm1084_vm0, %v1022_v5  ;;  %v974_v10 = vmax.f32 %v859_v8, 0.0  ;;  %v675_v11 = vpop.f32.mrf.mxu0  ;;  %v735_v12 = vpop.f32.mrf.mxu1 }
 0x112   : > { %v676_v13 = vadd.f32 %v1674_v42, %v675_v11  ;;  %v736_v14 = vadd.f32 %v1674_v42, %v735_v12 }
 0x113   : > { %v1046_v15 = vpack.c.bf16 %v948_v9, %v948_v9  ;;  %v1072_v16 = vpack.c.bf16 %v974_v10, %v974_v10 }
 0x114   : > { %v901_v17 = vmax.f32 %v676_v13, 0.0  ;;  %v925_v18 = vmax.f32 %v736_v14, 0.0 }
 0x115   : > { %1145 = vst.msk [vmem:[%s1685_s13 + $0xf0] sm:$0xf] %vm1084_vm0, %v1046_v15 }
 0x116   : > { %v795_v19 = vpop.f32.mrf.mxu2  ;;  %1171 = vst.msk [vmem:[%s1685_s13 + $0x158] sm:$0xf] %vm1084_vm0, %v1072_v16  ;;  %v999_v20 = vpack.c.bf16 %v901_v17, %v901_v17  ;;  %v1023_v21 = vpack.c.bf16 %v925_v18, %v925_v18  ;;  %v860_v22 = vpop.f32.mrf.mxu3 }
 0x117   : > { %v796_v23 = vadd.f32 %v1674_v42, %v795_v19  ;;  %v861_v24 = vadd.f32 %v1674_v42, %v860_v22 }
 0x118   : > { %1098 = vst.msk [vmem:[%s1685_s13 + $0x34] sm:$0xf] %vm1084_vm0, %v999_v20 }
 0x119   : > { %v949_v25 = vmax.f32 %v796_v23, 0.0  ;;  %1122 = vst.msk [vmem:[%s1685_s13 + $0x94] sm:$0xf] %vm1084_vm0, %v1023_v21  ;;  %v975_v26 = vmax.f32 %v861_v24, 0.0  ;;  %v678_v27 = vpop.f32.mrf.mxu0  ;;  %v738_v28 = vpop.f32.mrf.mxu1 }
 0x11a   : > { %v679_v29 = vadd.f32 %v1674_v42, %v678_v27  ;;  %v739_v30 = vadd.f32 %v1674_v42, %v738_v28 }
 0x11b   : > { %v1047_v31 = vpack.c.bf16 %v949_v25, %v949_v25  ;;  %v1073_v32 = vpack.c.bf16 %v975_v26, %v975_v26 }
 0x11c   : > { %v902_v33 = vmax.f32 %v679_v29, 0.0  ;;  %v926_v34 = vmax.f32 %v739_v30, 0.0 }
 0x11d   : > { %1146 = vst.msk [vmem:[%s1685_s13 + $0xf4] sm:$0xf] %vm1084_vm0, %v1047_v31 }
 0x11e   : > { %v798_v35 = vpop.f32.mrf.mxu2  ;;  %1172 = vst.msk [vmem:[%s1685_s13 + $0x15c] sm:$0xf] %vm1084_vm0, %v1073_v32  ;;  %v1000_v36 = vpack.c.bf16 %v902_v33, %v902_v33  ;;  %v1024_v37 = vpack.c.bf16 %v926_v34, %v926_v34  ;;  %v863_v38 = vpop.f32.mrf.mxu3 }
 0x11f   : > { %v799_v39 = vadd.f32 %v1674_v42, %v798_v35  ;;  %v864_v40 = vadd.f32 %v1674_v42, %v863_v38 }
 0x120   : > { %1099 = vst.msk [vmem:[%s1685_s13 + $0x38] sm:$0xf] %vm1084_vm0, %v1000_v36 }
 0x121   : > { %v950_v41 = vmax.f32 %v799_v39, 0.0  ;;  %1123 = vst.msk [vmem:[%s1685_s13 + $0x98] sm:$0xf] %vm1084_vm0, %v1024_v37  ;;  %v976_v43 = vmax.f32 %v864_v40, 0.0  ;;  %v680_v44 = vpop.f32.mrf.mxu0  ;;  %v740_v45 = vpop.f32.mrf.mxu1 }
 0x122   : > { %v681_v46 = vadd.f32 %v1674_v42, %v680_v44  ;;  %v741_v47 = vadd.f32 %v1674_v42, %v740_v45 }
 0x123   : > { %v1048_v48 = vpack.c.bf16 %v950_v41, %v950_v41  ;;  %v1074_v49 = vpack.c.bf16 %v976_v43, %v976_v43 }
 0x124   : > { %v903_v50 = vmax.f32 %v681_v46, 0.0  ;;  %v927_v51 = vmax.f32 %v741_v47, 0.0 }
 0x125   : > { %1147 = vst.msk [vmem:[%s1685_s13 + $0xf8] sm:$0xf] %vm1084_vm0, %v1048_v48 }
 0x126   : > { %v800_v52 = vpop.f32.mrf.mxu2  ;;  %1173 = vst.msk [vmem:[%s1685_s13 + $0x160] sm:$0xf] %vm1084_vm0, %v1074_v49  ;;  %v1001_v53 = vpack.c.bf16 %v903_v50, %v903_v50  ;;  %v1025_v54 = vpack.c.bf16 %v927_v51, %v927_v51  ;;  %v865_v55 = vpop.f32.mrf.mxu3 }
 0x127   : > { %v801_v56 = vadd.f32 %v1674_v42, %v800_v52  ;;  %v866_v57 = vadd.f32 %v1674_v42, %v865_v55 }
 0x128   : > { %1100 = vst.msk [vmem:[%s1685_s13 + $0x3c] sm:$0xf] %vm1084_vm0, %v1001_v53 }
 0x129   : > { %v951_v58 = vmax.f32 %v801_v56, 0.0  ;;  %1124 = vst.msk [vmem:[%s1685_s13 + $0x9c] sm:$0xf] %vm1084_vm0, %v1025_v54  ;;  %v977_v59 = vmax.f32 %v866_v57, 0.0  ;;  %v683_v60 = vpop.f32.mrf.mxu0  ;;  %v743_v61 = vpop.f32.mrf.mxu1 }
 0x12a   : > { %v684_v62 = vadd.f32 %v1674_v42, %v683_v60  ;;  %v744_v63 = vadd.f32 %v1674_v42, %v743_v61 }
 0x12b   : > { %v1049_v0 = vpack.c.bf16 %v951_v58, %v951_v58  ;;  %v1075_v1 = vpack.c.bf16 %v977_v59, %v977_v59 }
 0x12c   : > { %v904_v2 = vmax.f32 %v684_v62, 0.0  ;;  %v928_v3 = vmax.f32 %v744_v63, 0.0 }
 0x12d   : > { %1148 = vst.msk [vmem:[%s1685_s13 + $0xfc] sm:$0xf] %vm1084_vm0, %v1049_v0 }
 0x12e   : > { %v803_v4 = vpop.f32.mrf.mxu2  ;;  %1174 = vst.msk [vmem:[%s1685_s13 + $0x164] sm:$0xf] %vm1084_vm0, %v1075_v1  ;;  %v1002_v5 = vpack.c.bf16 %v904_v2, %v904_v2  ;;  %v1026_v6 = vpack.c.bf16 %v928_v3, %v928_v3  ;;  %v868_v7 = vpop.f32.mrf.mxu3 }
 0x12f   : > { %v804_v8 = vadd.f32 %v1674_v42, %v803_v4  ;;  %v869_v9 = vadd.f32 %v1674_v42, %v868_v7 }
 0x130   : > { %1101 = vst.msk [vmem:[%s1685_s13 + $0x40] sm:$0xf] %vm1084_vm0, %v1002_v5 }
 0x131   : > { %v952_v10 = vmax.f32 %v804_v8, 0.0  ;;  %1125 = vst.msk [vmem:[%s1685_s13 + $0xa0] sm:$0xf] %vm1084_vm0, %v1026_v6  ;;  %v978_v11 = vmax.f32 %v869_v9, 0.0  ;;  %v685_v12 = vpop.f32.mrf.mxu0  ;;  %v745_v13 = vpop.f32.mrf.mxu1 }
 0x132   : > { %v686_v14 = vadd.f32 %v1674_v42, %v685_v12  ;;  %v746_v15 = vadd.f32 %v1674_v42, %v745_v13 }
 0x133   : > { %v1050_v16 = vpack.c.bf16 %v952_v10, %v952_v10  ;;  %v1076_v17 = vpack.c.bf16 %v978_v11, %v978_v11 }
 0x134   : > { %v905_v18 = vmax.f32 %v686_v14, 0.0  ;;  %v929_v19 = vmax.f32 %v746_v15, 0.0 }
 0x135   : > { %1149 = vst.msk [vmem:[%s1685_s13 + $0x100] sm:$0xf] %vm1084_vm0, %v1050_v16 }
 0x136   : > { %v805_v20 = vpop.f32.mrf.mxu2  ;;  %1175 = vst.msk [vmem:[%s1685_s13 + $0x168] sm:$0xf] %vm1084_vm0, %v1076_v17  ;;  %v1003_v21 = vpack.c.bf16 %v905_v18, %v905_v18  ;;  %v1027_v22 = vpack.c.bf16 %v929_v19, %v929_v19  ;;  %v870_v23 = vpop.f32.mrf.mxu3 }
 0x137   : > { %v806_v24 = vadd.f32 %v1674_v42, %v805_v20  ;;  %v871_v25 = vadd.f32 %v1674_v42, %v870_v23 }
 0x138   : > { %1102 = vst.msk [vmem:[%s1685_s13 + $0x44] sm:$0xf] %vm1084_vm0, %v1003_v21 }
 0x139   : > { %v953_v26 = vmax.f32 %v806_v24, 0.0  ;;  %1126 = vst.msk [vmem:[%s1685_s13 + $0xa4] sm:$0xf] %vm1084_vm0, %v1027_v22  ;;  %v979_v27 = vmax.f32 %v871_v25, 0.0  ;;  %v688_v28 = vpop.f32.mrf.mxu0  ;;  %v748_v29 = vpop.f32.mrf.mxu1 }
 0x13a   : > { %v689_v30 = vadd.f32 %v1674_v42, %v688_v28  ;;  %v749_v31 = vadd.f32 %v1674_v42, %v748_v29 }
 0x13b   : > { %v1051_v32 = vpack.c.bf16 %v953_v26, %v953_v26  ;;  %v1077_v33 = vpack.c.bf16 %v979_v27, %v979_v27 }
 0x13c   : > { %v906_v34 = vmax.f32 %v689_v30, 0.0  ;;  %v930_v35 = vmax.f32 %v749_v31, 0.0 }
 0x13d   : > { %1150 = vst.msk [vmem:[%s1685_s13 + $0x104] sm:$0xf] %vm1084_vm0, %v1051_v32 }
 0x13e   : > { %v808_v36 = vpop.f32.mrf.mxu2  ;;  %1176 = vst.msk [vmem:[%s1685_s13 + $0x16c] sm:$0xf] %vm1084_vm0, %v1077_v33  ;;  %v1004_v37 = vpack.c.bf16 %v906_v34, %v906_v34  ;;  %v1028_v38 = vpack.c.bf16 %v930_v35, %v930_v35  ;;  %v873_v39 = vpop.f32.mrf.mxu3 }
 0x13f   : > { %v809_v40 = vadd.f32 %v1674_v42, %v808_v36  ;;  %v874_v41 = vadd.f32 %v1674_v42, %v873_v39 }
 0x140   : > { %1103 = vst.msk [vmem:[%s1685_s13 + $0x48] sm:$0xf] %vm1084_vm0, %v1004_v37 }
 0x141   : > { %v954_v43 = vmax.f32 %v809_v40, 0.0  ;;  %1127 = vst.msk [vmem:[%s1685_s13 + $0xa8] sm:$0xf] %vm1084_vm0, %v1028_v38  ;;  %v980_v44 = vmax.f32 %v874_v41, 0.0  ;;  %v690_v45 = vpop.f32.mrf.mxu0  ;;  %v750_v46 = vpop.f32.mrf.mxu1 }
 0x142   : > { %v691_v47 = vadd.f32 %v1674_v42, %v690_v45  ;;  %v751_v48 = vadd.f32 %v1674_v42, %v750_v46 }
 0x143   : > { %v1052_v49 = vpack.c.bf16 %v954_v43, %v954_v43  ;;  %v1078_v50 = vpack.c.bf16 %v980_v44, %v980_v44 }
 0x144   : > { %v907_v51 = vmax.f32 %v691_v47, 0.0  ;;  %v931_v52 = vmax.f32 %v751_v48, 0.0 }
 0x145   : > { %1151 = vst.msk [vmem:[%s1685_s13 + $0x108] sm:$0xf] %vm1084_vm0, %v1052_v49 }
 0x146   : > { %v810_v53 = vpop.f32.mrf.mxu2  ;;  %1177 = vst.msk [vmem:[%s1685_s13 + $0x170] sm:$0xf] %vm1084_vm0, %v1078_v50  ;;  %v1005_v54 = vpack.c.bf16 %v907_v51, %v907_v51  ;;  %v1029_v55 = vpack.c.bf16 %v931_v52, %v931_v52  ;;  %v875_v56 = vpop.f32.mrf.mxu3 }
 0x147   : > { %v811_v57 = vadd.f32 %v1674_v42, %v810_v53  ;;  %v876_v58 = vadd.f32 %v1674_v42, %v875_v56 }
 0x148   : > { %1104 = vst.msk [vmem:[%s1685_s13 + $0x4c] sm:$0xf] %vm1084_vm0, %v1005_v54 }
 0x149   : > { %v955_v59 = vmax.f32 %v811_v57, 0.0  ;;  %1128 = vst.msk [vmem:[%s1685_s13 + $0xac] sm:$0xf] %vm1084_vm0, %v1029_v55  ;;  %v981_v60 = vmax.f32 %v876_v58, 0.0  ;;  %v693_v61 = vpop.f32.mrf.mxu0  ;;  %v753_v62 = vpop.f32.mrf.mxu1 }
 0x14a   : > { %v694_v63 = vadd.f32 %v1674_v42, %v693_v61  ;;  %v754_v0 = vadd.f32 %v1674_v42, %v753_v62 }
 0x14b   : > { %v1053_v1 = vpack.c.bf16 %v955_v59, %v955_v59  ;;  %v1079_v2 = vpack.c.bf16 %v981_v60, %v981_v60 }
 0x14c   : > { %v908_v3 = vmax.f32 %v694_v63, 0.0  ;;  %v932_v4 = vmax.f32 %v754_v0, 0.0 }
 0x14d   : > { %1152 = vst.msk [vmem:[%s1685_s13 + $0x10c] sm:$0xf] %vm1084_vm0, %v1053_v1  ;;  %v1566_v1 = vld [vmem:[%s1998_s2] ss:$0 sm:$0xff] }
 0x14e   : > { %v813_v5 = vpop.f32.mrf.mxu2  ;;  %1178 = vst.msk [vmem:[%s1685_s13 + $0x174] sm:$0xf] %vm1084_vm0, %v1079_v2  ;;  %v1006_v6 = vpack.c.bf16 %v908_v3, %v908_v3  ;;  %v1030_v7 = vpack.c.bf16 %v932_v4, %v932_v4  ;;  %v878_v8 = vpop.f32.mrf.mxu3 }
 0x14f   : > { %v814_v9 = vadd.f32 %v1674_v42, %v813_v5  ;;  %v879_v10 = vadd.f32 %v1674_v42, %v878_v8 }
 0x150   : > { %1105 = vst.msk [vmem:[%s1685_s13 + $0x50] sm:$0xf] %vm1084_vm0, %v1006_v6 }
 0x151   : > { %v956_v11 = vmax.f32 %v814_v9, 0.0  ;;  %1129 = vst.msk [vmem:[%s1685_s13 + $0xb0] sm:$0xf] %vm1084_vm0, %v1030_v7  ;;  %v982_v12 = vmax.f32 %v879_v10, 0.0  ;;  %v695_v13 = vpop.f32.mrf.mxu0  ;;  %v755_v14 = vpop.f32.mrf.mxu1 }
 0x152   : > { %v696_v15 = vadd.f32 %v1674_v42, %v695_v13  ;;  %v756_v16 = vadd.f32 %v1674_v42, %v755_v14 }
 0x153   : > { %v1054_v17 = vpack.c.bf16 %v956_v11, %v956_v11  ;;  %v1080_v18 = vpack.c.bf16 %v982_v12, %v982_v12 }
 0x154   : > { %v909_v19 = vmax.f32 %v696_v15, 0.0  ;;  %v933_v20 = vmax.f32 %v756_v16, 0.0 }
 0x155   : > { %1153 = vst.msk [vmem:[%s1685_s13 + $0x110] sm:$0xf] %vm1084_vm0, %v1054_v17 }
 0x156   : > { %v815_v21 = vpop.f32.mrf.mxu2  ;;  %1179 = vst.msk [vmem:[%s1685_s13 + $0x178] sm:$0xf] %vm1084_vm0, %v1080_v18  ;;  %v1007_v22 = vpack.c.bf16 %v909_v19, %v909_v19  ;;  %v1031_v23 = vpack.c.bf16 %v933_v20, %v933_v20  ;;  %v880_v24 = vpop.f32.mrf.mxu3 }
 0x157   : > { %v816_v25 = vadd.f32 %v1674_v42, %v815_v21  ;;  %v881_v26 = vadd.f32 %v1674_v42, %v880_v24 }
 0x158   : > { %1106 = vst.msk [vmem:[%s1685_s13 + $0x54] sm:$0xf] %vm1084_vm0, %v1007_v22 }
 0x159   : > { %v957_v27 = vmax.f32 %v816_v25, 0.0  ;;  %1130 = vst.msk [vmem:[%s1685_s13 + $0xb4] sm:$0xf] %vm1084_vm0, %v1031_v23  ;;  %v983_v28 = vmax.f32 %v881_v26, 0.0  ;;  %v698_v29 = vpop.f32.mrf.mxu0  ;;  %v758_v30 = vpop.f32.mrf.mxu1 }
 0x15a   : > { %v699_v31 = vadd.f32 %v1674_v42, %v698_v29  ;;  %v759_v32 = vadd.f32 %v1674_v42, %v758_v30 }
 0x15b   : > { %v1055_v33 = vpack.c.bf16 %v957_v27, %v957_v27  ;;  %v1081_v34 = vpack.c.bf16 %v983_v28, %v983_v28 }
 0x15c   : > { %v910_v35 = vmax.f32 %v699_v31, 0.0  ;;  %v934_v36 = vmax.f32 %v759_v32, 0.0 }
 0x15d   : > { %1154 = vst.msk [vmem:[%s1685_s13 + $0x114] sm:$0xf] %vm1084_vm0, %v1055_v33 }
 0x15e   : > { %v818_v37 = vpop.f32.mrf.mxu2  ;;  %1180 = vst.msk [vmem:[%s1685_s13 + $0x17c] sm:$0xf] %vm1084_vm0, %v1081_v34  ;;  %v1008_v38 = vpack.c.bf16 %v910_v35, %v910_v35  ;;  %v1032_v39 = vpack.c.bf16 %v934_v36, %v934_v36  ;;  %v883_v40 = vpop.f32.mrf.mxu3 }
 0x15f   : > { %v819_v41 = vadd.f32 %v1674_v42, %v818_v37  ;;  %v884_v43 = vadd.f32 %v1674_v42, %v883_v40 }
 0x160   : > { %1107 = vst.msk [vmem:[%s1685_s13 + $0x58] sm:$0xf] %vm1084_vm0, %v1008_v38 }
 0x161   : > { %v958_v44 = vmax.f32 %v819_v41, 0.0  ;;  %1131 = vst.msk [vmem:[%s1685_s13 + $0xb8] sm:$0xf] %vm1084_vm0, %v1032_v39  ;;  %v984_v45 = vmax.f32 %v884_v43, 0.0  ;;  %v700_v46 = vpop.f32.mrf.mxu0  ;;  %v760_v47 = vpop.f32.mrf.mxu1 }
 0x162   : > { %v701_v48 = vadd.f32 %v1674_v42, %v700_v46  ;;  %v761_v49 = vadd.f32 %v1674_v42, %v760_v47 }
 0x163   : > { %v1056_v50 = vpack.c.bf16 %v958_v44, %v958_v44  ;;  %v1082_v51 = vpack.c.bf16 %v984_v45, %v984_v45 }
 0x164   : > { %v911_v52 = vmax.f32 %v701_v48, 0.0  ;;  %v935_v53 = vmax.f32 %v761_v49, 0.0 }
 0x165   : > { %1155 = vst.msk [vmem:[%s1685_s13 + $0x118] sm:$0xf] %vm1084_vm0, %v1056_v50 }
 0x166   : > { %v820_v54 = vpop.f32.mrf.mxu2  ;;  %1181 = vst.msk [vmem:[%s1685_s13 + $0x180] sm:$0xf] %vm1084_vm0, %v1082_v51  ;;  %v1009_v55 = vpack.c.bf16 %v911_v52, %v911_v52  ;;  %v1033_v56 = vpack.c.bf16 %v935_v53, %v935_v53  ;;  %v885_v57 = vpop.f32.mrf.mxu3 }
 0x167   : > { %v821_v58 = vadd.f32 %v1674_v42, %v820_v54  ;;  %v886_v59 = vadd.f32 %v1674_v42, %v885_v57 }
 0x168   : > { %1108 = vst.msk [vmem:[%s1685_s13 + $0x5c] sm:$0xf] %vm1084_vm0, %v1009_v55 }
 0x169   : > { %v959_v60 = vmax.f32 %v821_v58, 0.0  ;;  %1132 = vst.msk [vmem:[%s1685_s13 + $0xbc] sm:$0xf] %vm1084_vm0, %v1033_v56  ;;  %v985_v61 = vmax.f32 %v886_v59, 0.0 }
 0x16b   : > { %v1057_v62 = vpack.c.bf16 %v959_v60, %v959_v60  ;;  %v1083_v63 = vpack.c.bf16 %v985_v61, %v985_v61 }
 0x16d   : > { %1156 = vst.msk [vmem:[%s1685_s13 + $0x11c] sm:$0xf] %vm1084_vm0, %v1057_v62 }
 0x16e   : > { %v823_v0 = vpop.f32.mrf.mxu2  ;;  %1182 = vst.msk [vmem:[%s1685_s13 + $0x184] sm:$0xf] %vm1084_vm0, %v1083_v63 }
 0x16f   : > { %v824_v2 = vadd.f32 %v1566_v1, %v823_v0 }
 0x171   : > { %v960_v42 = vmax.f32 %v824_v2, 0.0 }
 0x173   : > { %v1058_v3 = vpack.c.bf16 %v960_v42, %v960_v42 }
 0x175   : > { %1157 = vst.msk [vmem:[%s1685_s13 + $0x120] sm:$0xf] %vm1084_vm0, %v1058_v3 }
 0x176   : > { %v825_v4 = vpop.f32.mrf.mxu2 }
 0x177   : > { %v826_v5 = vadd.f32 %v1566_v1, %v825_v4 }
 0x179   : > { %v961_v6 = vmax.f32 %v826_v5, 0.0 }
 0x17b   : > { %v1059_v7 = vpack.c.bf16 %v961_v6, %v961_v6 }
 0x17d   : > { %1158 = vst.msk [vmem:[%s1685_s13 + $0x124] sm:$0xf] %vm1084_vm0, %v1059_v7 }
 0x17e PF: > { %s13_s12 = sadd.s32 1, %s1573_s12  }
 0x17f   : > { %p10_p4 = scmp.ge.s32.totalorder %s13_s12, 4  }
 0x181   :  { %12 = sbr.rel (!%p10_p4) target bundleno = 1 (0x1), region = 62 }

// kernel: net_forward.4
= control target key start
LH: loop header
LB: loop body
LE: loop exit
PB: predicated region body
PF: predicated region fallthrough
CT: control target
= control target key end

     0   :  { %s3034_s12 = smov 0   ;;  %s3697_s0 = inlined_call_operand.vmem [shape: bf16[192,1600], index: 0, kind: input, shape index: {}]   ;;  %s3698_s1 = inlined_call_operand.vmem [shape: bf16[1600,64], index: 1, kind: input, shape index: {}]   ;;  %s3699_s2 = inlined_call_operand.vmem [shape: f32[1,64], index: 2, kind: input, shape index: {}]   ;;  %s3700_s3 = inlined_call_operand.vmem [shape: bf16[192,64], index: 3, kind: output, shape index: {}]  }
   0x1 LB: > { %s2075_s13 = sadd.s32 4294967295, %s3012_s12   ;;  %p2079_p0 = scmp.ge.s32.totalorder %s3012_s12, 1  ;;  %s3012_s12 = sphi %s3034_s12, %s13_s12  }
   0x2   : > { %p139_p1 = scmp.lt.s32.totalorder %s3012_s12, 3 }
   0x4   : > { %p140_p2 = pnand %p2079_p0, %p139_p1 }
   0x5   : > { %s164_s24 = smul.u32 (!%p140_p2), 12, %s2075_s13 }
   0x6   : > { %143 = sbr.rel (%p140_p2) target bundleno = 498 (0x1f2), region = 32 }
   0x7   : > { %p165_p3 = scmp.lt.s32.totalorder (!%p140_p2), %s164_s24, 23 }
   0xb   : > { %v2887_v0 = vld [vmem:[%s3698_s1 + $0x38] sm:$0xff]  ;;  %v2886_v1 = vld [vmem:[%s3698_s1 + $0x30] sm:$0xff]  ;;  %v2885_v4 = vld [vmem:[%s3698_s1 + $0x28] sm:$0xff]  ;;  %s3702_s24 = smov (!%p165_p3, %s164_s24), 23  ;;  %vm1456_vm0 = vcmask 523264   ;;  %vm2006_vm1 = vcmask 519168  }
   0xc   : > { %2980 = vmatpush.bf16.msra.mxu1 %v2887_v0  ;;  %2981 = vmatpush.bf16.msra.mxu2 %v2887_v0  ;;  %v2911_v2 = vld [vmem:[%s3698_s1 + $0xf8] sm:$0xff]  ;;  %v2910_v3 = vld [vmem:[%s3698_s1 + $0xf0] sm:$0xff]  ;;  %v2909_v5 = vld [vmem:[%s3698_s1 + $0xe8] sm:$0xff]  ;;  %s2996_s10 = smul.u32 52, %s3702_s24 }
   0xd   : > { %1475 = vmatpush.bf16.msra.mxu0 %v2887_v0  ;;  %1592 = vmatpush.bf16.msra.mxu3 %v2911_v2  ;;  %v2884_v6 = vld [vmem:[%s3698_s1 + $0x20] sm:$0xff]  ;;  %v2883_v8 = vld [vmem:[%s3698_s1 + $0x18] sm:$0xff]  ;;  %v2882_v10 = vld [vmem:[%s3698_s1 + $0x10] sm:$0xff] }
   0xe   : > { %v2908_v7 = vld [vmem:[%s3698_s1 + $0xe0] sm:$0xff]  ;;  %v2907_v9 = vld [vmem:[%s3698_s1 + $0xd8] sm:$0xff]  ;;  %v2906_v11 = vld [vmem:[%s3698_s1 + $0xd0] sm:$0xff]  ;;  %s3087_s18 = scalar_lea.vmem %s3697_s0, %s2996_s10 }
   0xf   : > { %v2881_v12 = vld [vmem:[%s3698_s1 + $0x8] sm:$0xff]  ;;  %v2880_v14 = vld [vmem:[%s3698_s1] sm:$0xff]  ;;  %v2188_v15 = vld [vmem:[%s3087_s18 + $0xd0] sm:$0xf] }
  0x10   : > { %2982 = vmatpush.bf16.msra.mxu1 %v2886_v1  ;;  %2983 = vmatpush.bf16.msra.mxu2 %v2886_v1  ;;  %v2905_v13 = vld [vmem:[%s3698_s1 + $0xc8] sm:$0xff]  ;;  %v2834_v16 = vld [vmem:[%s3087_s18 + $0x100] sm:$0xf0]  ;;  %v2292_v17 = vld [vmem:[%s3087_s18 + $0x1a0] sm:$0xf] }
  0x11   : > { %1476 = vmatpush.bf16.msra.mxu0 %v2886_v1  ;;  %1593 = vmatpush.bf16.msra.mxu3 %v2910_v3  ;;  %v2860_v18 = vld [vmem:[%s3087_s18 + $0x1d0] sm:$0xf0]  ;;  %v2903_v19 = vld [vmem:[%s3698_s1 + $0xb8] sm:$0xff]  ;;  %v2084_v20 = vld [vmem:[%s3087_s18] sm:$0xf]  ;;  %v2189_v24 = vor.u32 %v2834_v16, %v2188_v15 }
  0x12   : > { %v2808_v21 = vld [vmem:[%s3087_s18 + $0x30] sm:$0xf0]  ;;  %v2895_v22 = vld [vmem:[%s3698_s1 + $0x78] sm:$0xff]  ;;  %v2293_v25 = vor.u32 %v2860_v18, %v2292_v17  ;;  %v2904_v27 = vld [vmem:[%s3698_s1 + $0xc0] sm:$0xff] }
  0x13   : > { %v2919_v23 = vld [vmem:[%s3698_s1 + $0x138] sm:$0xff]  ;;  %v2085_v26 = vor.u32 %v2808_v21, %v2084_v20  ;;  %v2803_v28 = vld [vmem:[%s3087_s18 + $0xc] sm:$0xf]  ;;  %v2094_v29 = vld [vmem:[%s3087_s18 + $0x3c] sm:$0xf0] }
  0x14   : > { %2984 = vmatpush.bf16.msra.mxu1 %v2885_v4  ;;  %2985 = vmatpush.bf16.msra.mxu2 %v2885_v4  ;;  %v2902_v30 = vld [vmem:[%s3698_s1 + $0xb0] sm:$0xff]  ;;  %v2097_v33 = vor.u32 %v2803_v28, %v2094_v29  ;;  %v2943_v34 = vld [vmem:[%s3698_s1 + $0x1f8] sm:$0xff]  ;;  %v2901_v35 = vld [vmem:[%s3698_s1 + $0xa8] sm:$0xff] }
  0x15   : > { %1477 = vmatpush.bf16.msra.mxu0 %v2885_v4  ;;  %1594 = vmatpush.bf16.msra.mxu3 %v2909_v5  ;;  %v2894_v31 = vld [vmem:[%s3698_s1 + $0x70] sm:$0xff]  ;;  %v2893_v36 = vld [vmem:[%s3698_s1 + $0x68] sm:$0xff]  ;;  %v2900_v39 = vld [vmem:[%s3698_s1 + $0xa0] sm:$0xff] }
  0x16   : > { %v2918_v32 = vld [vmem:[%s3698_s1 + $0x130] sm:$0xff]  ;;  %v2917_v37 = vld [vmem:[%s3698_s1 + $0x128] sm:$0xff]  ;;  %v2892_v40 = vld [vmem:[%s3698_s1 + $0x60] sm:$0xff] }
  0x17   : > { %v2942_v38 = vld [vmem:[%s3698_s1 + $0x1f0] sm:$0xff]  ;;  %v2916_v41 = vld [vmem:[%s3698_s1 + $0x120] sm:$0xff]  ;;  %v2240_v42 = vld [vmem:[%s3087_s18 + $0x138] sm:$0xf] }
  0x18   : > { %2986 = vmatpush.bf16.msra.mxu1 %v2884_v6  ;;  %2987 = vmatpush.bf16.msra.mxu2 %v2884_v6  ;;  %v2847_v43 = vld [vmem:[%s3087_s18 + $0x168] sm:$0xf0]  ;;  %v2344_v44 = vld [vmem:[%s3087_s18 + $0x208] sm:$0xf]  ;;  %v2873_v45 = vld [vmem:[%s3087_s18 + $0x238] sm:$0xf0] }
  0x19   : > { %1478 = vmatpush.bf16.msra.mxu0 %v2884_v6  ;;  %1595 = vmatpush.bf16.msra.mxu3 %v2908_v7  ;;  %v2899_v46 = vld [vmem:[%s3698_s1 + $0x98] sm:$0xff]  ;;  %v2136_v47 = vld [vmem:[%s3087_s18 + $0x68] sm:$0xf]  ;;  %v2241_v51 = vor.u32 %v2847_v43, %v2240_v42  ;;  %v2345_v52 = vor.u32 %v2873_v45, %v2344_v44  ;;  %v2816_v54 = vld [vmem:[%s3087_s18 + $0x74] sm:$0xf] }
  0x1a   : > { %v2821_v48 = vld [vmem:[%s3087_s18 + $0x98] sm:$0xf0]  ;;  %v2146_v55 = vld [vmem:[%s3087_s18 + $0xa4] sm:$0xf0]  ;;  %v2898_v56 = vld [vmem:[%s3698_s1 + $0x90] sm:$0xff] }
  0x1b   : > { %v2891_v49 = vld [vmem:[%s3698_s1 + $0x58] sm:$0xff]  ;;  %v2137_v53 = vor.u32 %v2821_v48, %v2136_v47  ;;  %v2890_v57 = vld [vmem:[%s3698_s1 + $0x50] sm:$0xff]  ;;  %v2149_v59 = vor.u32 %v2816_v54, %v2146_v55  ;;  %v2897_v60 = vld [vmem:[%s3698_s1 + $0x88] sm:$0xff] }
  0x1c   : > { %2988 = vmatpush.bf16.msra.mxu1 %v2883_v8  ;;  %2989 = vmatpush.bf16.msra.mxu2 %v2883_v8  ;;  %v2915_v50 = vld [vmem:[%s3698_s1 + $0x118] sm:$0xff]  ;;  %v2914_v58 = vld [vmem:[%s3698_s1 + $0x110] sm:$0xff]  ;;  %v2941_v61 = vld [vmem:[%s3698_s1 + $0x1e8] sm:$0xff] }
  0x1d   : > { %1479 = vmatpush.bf16.msra.mxu0 %v2883_v8  ;;  %1596 = vmatpush.bf16.msra.mxu3 %v2907_v9  ;;  %v2889_v62 = vld [vmem:[%s3698_s1 + $0x48] sm:$0xff]  ;;  %v2896_v0 = vld [vmem:[%s3698_s1 + $0x80] sm:$0xff]  ;;  %v2086_v4 = vld [vmem:[%s3087_s18 + $0x34] sm:$0xf0] }
  0x1e   : > { %v2913_v63 = vld [vmem:[%s3698_s1 + $0x108] sm:$0xff]  ;;  %v2888_v1 = vld [vmem:[%s3698_s1 + $0x40] sm:$0xff]  ;;  %v2935_v5 = vld [vmem:[%s3698_s1 + $0x1b8] sm:$0xff] }
  0x1f   : > { %v2912_v2 = vld [vmem:[%s3698_s1 + $0x100] sm:$0xff]  ;;  %v2927_v6 = vld [vmem:[%s3698_s1 + $0x178] sm:$0xff]  ;;  %v2092_v7 = vld [vmem:[%s3087_s18 + $0x8] sm:$0xf] }
  0x20   : > { %2990 = vmatpush.bf16.msra.mxu1 %v2882_v10  ;;  %2991 = vmatpush.bf16.msra.mxu2 %v2882_v10  ;;  %v2802_v3 = vld [vmem:[%s3087_s18 + $0x4] sm:$0xf]  ;;  %v2809_v8 = vld [vmem:[%s3087_s18 + $0x38] sm:$0xf0]  ;;  %v2934_v15 = vld [vmem:[%s3698_s1 + $0x1b0] sm:$0xff] }
  0x21   : > { %1480 = vmatpush.bf16.msra.mxu0 %v2882_v10  ;;  %1597 = vmatpush.bf16.msra.mxu3 %v2906_v11  ;;  %v2951_v9 = vld [vmem:[%s3698_s1 + $0x238] sm:$0xff]  ;;  %v2100_v10 = vld [vmem:[%s3087_s18 + $0x10] sm:$0xf]  ;;  %v2810_v11 = vld [vmem:[%s3087_s18 + $0x40] sm:$0xf0] }
  0x22   : > { %v2829_v16 = vld [vmem:[%s3087_s18 + $0xdc] sm:$0xf]  ;;  %v2198_v17 = vld [vmem:[%s3087_s18 + $0x10c] sm:$0xf0]  ;;  %v2933_v21 = vld [vmem:[%s3698_s1 + $0x1a8] sm:$0xff] }
  0x23   : > { %v2926_v18 = vld [vmem:[%s3698_s1 + $0x170] sm:$0xff]  ;;  %v2201_v20 = vor.u32 %v2829_v16, %v2198_v17  ;;  %v2815_v28 = vld [vmem:[%s3087_s18 + $0x6c] sm:$0xf]  ;;  %v2138_v29 = vld [vmem:[%s3087_s18 + $0x9c] sm:$0xf0] }
  0x24   : > { %2992 = vmatpush.bf16.msra.mxu1 %v2881_v12  ;;  %2993 = vmatpush.bf16.msra.mxu2 %v2881_v12  ;;  %v2923_v42 = vld [vmem:[%s3698_s1 + $0x158] sm:$0xff]  ;;  %v2930_v44 = vld [vmem:[%s3698_s1 + $0x190] sm:$0xff]  ;;  %v2190_v47 = vld [vmem:[%s3087_s18 + $0x104] sm:$0xf0] }
  0x25   : > { %1481 = vmatpush.bf16.msra.mxu0 %v2881_v12  ;;  %1598 = vmatpush.bf16.msra.mxu3 %v2905_v13  ;;  %v2089_v12 = vor.u32 %v2802_v3, %v2086_v4  ;;  %v2093_v13 = vor.u32 %v2809_v8, %v2092_v7  ;;  %v2947_v43 = vld [vmem:[%s3698_s1 + $0x218] sm:$0xff]  ;;  %v2938_v45 = vld [vmem:[%s3698_s1 + $0x1d0] sm:$0xff]  ;;  %v2855_v55 = vld [vmem:[%s3087_s18 + $0x1ac] sm:$0xf] }
  0x26   : > { %v2196_v48 = vld [vmem:[%s3087_s18 + $0xd8] sm:$0xf]  ;;  %v2256_v3 = vld [vmem:[%s3087_s18 + $0x148] sm:$0xf]  ;;  %v2849_v4 = vld [vmem:[%s3087_s18 + $0x178] sm:$0xf0] }
  0x27   : > { %v2257_v7 = vor.u32 %v2849_v4, %v2256_v3  ;;  %v2868_v8 = vld [vmem:[%s3087_s18 + $0x214] sm:$0xf]  ;;  %v2294_v16 = vld [vmem:[%s3087_s18 + $0x1d4] sm:$0xf0]  ;;  %v2300_v17 = vld [vmem:[%s3087_s18 + $0x1a8] sm:$0xf] }
  0x28   : > { %2994 = vmatpush.bf16.msra.mxu1 %v2880_v14  ;;  %2995 = vmatpush.bf16.msra.mxu2 %v2880_v14 }
  0x29   : > { %1482 = vmatpush.bf16.msra.mxu0 %v2880_v14  ;;  %1599 = vmatpush.bf16.msra.mxu3 %v2904_v27  ;;  %v2101_v14 = vor.u32 %v2810_v11, %v2100_v10  ;;  %v2948_v27 = vld [vmem:[%s3698_s1 + $0x220] sm:$0xff]  ;;  %v2945_v11 = vld [vmem:[%s3698_s1 + $0x208] sm:$0xff] }
  0x2b   : > { %1493 = vmatmul.bf16.vlgmr.msra.gmra.mxu1 %v2189_v24  ;;  %1503 = vmatmul.bf16.vlgmr.msra.gmra.mxu2 %v2293_v25  ;;  %v2949_v24 = vld [vmem:[%s3698_s1 + $0x228] sm:$0xff]  ;;  %v2932_v25 = vld [vmem:[%s3698_s1 + $0x1a0] sm:$0xff] }
  0x2c   : > { %1553 = vmatpush.bf16.msrb.mxu2 %v2903_v19  ;;  %1514 = vmatpush.bf16.msrb.mxu1 %v2895_v22  ;;  %v2950_v19 = vld [vmem:[%s3698_s1 + $0x230] sm:$0xff]  ;;  %v2940_v22 = vld [vmem:[%s3698_s1 + $0x1e0] sm:$0xff] }
  0x2d   : > { %1631 = vmatpush.bf16.msrb.mxu0 %v2919_v23  ;;  %1600 = vmatmul.bf16.vlgmr.msra.gmra.mxu3 %v2097_v33  ;;  %v2925_v23 = vld [vmem:[%s3698_s1 + $0x168] sm:$0xff] }
  0x2e   : > { %1483 = vmatmul.bf16.vlgmr.msra.gmra.mxu0 %v2085_v26  ;;  %1748 = vmatpush.bf16.msrb.mxu3 %v2943_v34  ;;  %v2924_v26 = vld [vmem:[%s3698_s1 + $0x160] sm:$0xff]  ;;  %v2823_v33 = vld [vmem:[%s3087_s18 + $0xa8] sm:$0xf0]  ;;  %v2141_v34 = vor.u32 %v2815_v28, %v2138_v29  ;;  %v2967_v28 = vld [vmem:[%s3698_s1 + $0x2b8] sm:$0xff] }
  0x2f   : > { %v2975_v29 = vld [vmem:[%s3698_s1 + $0x2f8] sm:$0xff] }
  0x30   : > { %1554 = vmatpush.bf16.msrb.mxu2 %v2902_v30  ;;  %1515 = vmatpush.bf16.msrb.mxu1 %v2894_v31  ;;  %v2144_v30 = vld [vmem:[%s3087_s18 + $0x70] sm:$0xf]  ;;  %v2822_v31 = vld [vmem:[%s3087_s18 + $0xa0] sm:$0xf0] }
  0x31   : > { %1632 = vmatpush.bf16.msrb.mxu0 %v2918_v32  ;;  %v2152_v32 = vld [vmem:[%s3087_s18 + $0x78] sm:$0xf] }
  0x32   : > { %1749 = vmatpush.bf16.msrb.mxu3 %v2942_v38  ;;  %v2250_v38 = vld [vmem:[%s3087_s18 + $0x174] sm:$0xf0] }
  0x34   : > { %1555 = vmatpush.bf16.msrb.mxu2 %v2901_v35  ;;  %1516 = vmatpush.bf16.msrb.mxu1 %v2893_v36  ;;  %v2145_v35 = vor.u32 %v2822_v31, %v2144_v30  ;;  %v2153_v36 = vor.u32 %v2823_v33, %v2152_v32  ;;  %v2959_v30 = vld [vmem:[%s3698_s1 + $0x278] sm:$0xff]  ;;  %v2867_v32 = vld [vmem:[%s3087_s18 + $0x20c] sm:$0xf]  ;;  %v2346_v33 = vld [vmem:[%s3087_s18 + $0x23c] sm:$0xf0] }
  0x35   : > { %1633 = vmatpush.bf16.msrb.mxu0 %v2917_v37  ;;  %v2842_v37 = vld [vmem:[%s3087_s18 + $0x144] sm:$0xf]  ;;  %v2979_v31 = vld [vmem:[%s3698_s1 + $0x318] sm:$0xff] }
  0x36   : > { %1750 = vmatpush.bf16.msrb.mxu3 %v2941_v61  ;;  %v2937_v61 = vld [vmem:[%s3698_s1 + $0x1c8] sm:$0xff] }
  0x38   : > { %1556 = vmatpush.bf16.msrb.mxu2 %v2900_v39  ;;  %1517 = vmatpush.bf16.msrb.mxu1 %v2892_v40  ;;  %v2253_v39 = vor.u32 %v2842_v37, %v2250_v38  ;;  %v2931_v40 = vld [vmem:[%s3698_s1 + $0x198] sm:$0xff]  ;;  %v2875_v37 = vld [vmem:[%s3087_s18 + $0x248] sm:$0xf0]  ;;  %v2349_v38 = vor.u32 %v2867_v32, %v2346_v33 }
  0x39   : > { %1634 = vmatpush.bf16.msrb.mxu0 %v2916_v41  ;;  %v2939_v41 = vld [vmem:[%s3698_s1 + $0x1d8] sm:$0xff] }
  0x3a   : > { %1751 = vmatpush.bf16.msrb.mxu3 %v2940_v22  ;;  %v2955_v33 = vld [vmem:[%s3698_s1 + $0x258] sm:$0xff] }
  0x3b   : > { %1498 = vmatmul.bf16.gmra.mxu1 %v2241_v51  ;;  %1508 = vmatmul.bf16.gmra.mxu2 %v2345_v52  ;;  %v2836_v51 = vld [vmem:[%s3087_s18 + $0x110] sm:$0xf0] }
  0x3c   : > { %1557 = vmatpush.bf16.msrb.mxu2 %v2899_v46  ;;  %1518 = vmatpush.bf16.msrb.mxu1 %v2891_v49  ;;  %v2828_v46 = vld [vmem:[%s3087_s18 + $0xd4] sm:$0xf]  ;;  %v2835_v49 = vld [vmem:[%s3087_s18 + $0x108] sm:$0xf0] }
  0x3d   : > { %1635 = vmatpush.bf16.msrb.mxu0 %v2915_v50  ;;  %1605 = vmatmul.bf16.gmra.mxu3 %v2149_v59  ;;  %v2204_v50 = vld [vmem:[%s3087_s18 + $0xe0] sm:$0xf]  ;;  %v2193_v52 = vor.u32 %v2828_v46, %v2190_v47  ;;  %v2946_v59 = vld [vmem:[%s3698_s1 + $0x210] sm:$0xff]  ;;  %v2965_v47 = vld [vmem:[%s3698_s1 + $0x2a8] sm:$0xff] }
  0x3e   : > { %1488 = vmatmul.bf16.gmra.mxu0 %v2137_v53  ;;  %1752 = vmatpush.bf16.msrb.mxu3 %v2939_v41  ;;  %v2197_v53 = vor.u32 %v2835_v49, %v2196_v48  ;;  %v2205_v54 = vor.u32 %v2836_v51, %v2204_v50  ;;  %v2958_v46 = vld [vmem:[%s3698_s1 + $0x270] sm:$0xff]  ;;  %v2973_v49 = vld [vmem:[%s3698_s1 + $0x2e8] sm:$0xff]  ;;  %v2108_v51 = vld [vmem:[%s3087_s18 + $0x18] sm:$0xf] }
  0x3f   : > { %v2804_v48 = vld [vmem:[%s3087_s18 + $0x14] sm:$0xf]  ;;  %v2102_v50 = vld [vmem:[%s3087_s18 + $0x44] sm:$0xf0] }
  0x40   : > { %1558 = vmatpush.bf16.msrb.mxu2 %v2898_v56  ;;  %1519 = vmatpush.bf16.msrb.mxu1 %v2890_v57  ;;  %v2302_v56 = vld [vmem:[%s3087_s18 + $0x1dc] sm:$0xf0] }
  0x41   : > { %1636 = vmatpush.bf16.msrb.mxu0 %v2914_v58  ;;  %v2305_v57 = vor.u32 %v2855_v55, %v2302_v56  ;;  %v2922_v58 = vld [vmem:[%s3698_s1 + $0x150] sm:$0xff]  ;;  %v2105_v55 = vor.u32 %v2804_v48, %v2102_v50 }
  0x42   : > { %1753 = vmatpush.bf16.msrb.mxu3 %v2938_v45  ;;  %v2318_v50 = vld [vmem:[%s3087_s18 + $0x1ec] sm:$0xf0] }
  0x44   : > { %1559 = vmatpush.bf16.msrb.mxu2 %v2897_v60  ;;  %1520 = vmatpush.bf16.msrb.mxu1 %v2889_v62  ;;  %v2929_v60 = vld [vmem:[%s3698_s1 + $0x188] sm:$0xff] }
  0x45   : > { %1637 = vmatpush.bf16.msrb.mxu0 %v2913_v63  ;;  %v2921_v62 = vld [vmem:[%s3698_s1 + $0x148] sm:$0xff]  ;;  %v2841_v63 = vld [vmem:[%s3087_s18 + $0x13c] sm:$0xf] }
  0x46   : > { %1754 = vmatpush.bf16.msrb.mxu3 %v2937_v61  ;;  %v2214_v61 = vld [vmem:[%s3087_s18 + $0x11c] sm:$0xf0] }
  0x48   : > { %1560 = vmatpush.bf16.msrb.mxu2 %v2896_v0  ;;  %1521 = vmatpush.bf16.msrb.mxu1 %v2888_v1  ;;  %v2242_v0 = vld [vmem:[%s3087_s18 + $0x16c] sm:$0xf0]  ;;  %v2248_v1 = vld [vmem:[%s3087_s18 + $0x140] sm:$0xf] }
  0x49   : > { %1638 = vmatpush.bf16.msrb.mxu0 %v2912_v2  ;;  %v2848_v2 = vld [vmem:[%s3087_s18 + $0x170] sm:$0xf0] }
  0x4b   : > { %1522 = vmatmul.bf16.vlgmr.msrb.gmra.mxu1 %v2089_v12  ;;  %1561 = vmatmul.bf16.vlgmr.msrb.gmra.mxu2 %v2093_v13  ;;  %v2928_v12 = vld [vmem:[%s3698_s1 + $0x180] sm:$0xff] }
  0x4c   : > { %1709 = vmatpush.bf16.msra.mxu2 %v2935_v5  ;;  %1670 = vmatpush.bf16.msra.mxu1 %v2927_v6  ;;  %v2245_v5 = vor.u32 %v2841_v63, %v2242_v0  ;;  %v2249_v6 = vor.u32 %v2848_v2, %v2248_v1  ;;  %v2936_v13 = vld [vmem:[%s3698_s1 + $0x1c0] sm:$0xff]  ;;  %v2978_v0 = vld [vmem:[%s3698_s1 + $0x310] sm:$0xff] }
  0x4d   : > { %1787 = vmatpush.bf16.msra.mxu0 %v2951_v9  ;;  %1610 = vmatmul.bf16.gmra.mxu3 %v2201_v20  ;;  %v2354_v9 = vld [vmem:[%s3087_s18 + $0x244] sm:$0xf0]  ;;  %v2862_v20 = vld [vmem:[%s3087_s18 + $0x1e0] sm:$0xf0]  ;;  %v3376_v1 = vld [vmem:[%s3699_s2] ss:$0 sm:$0xff] }
  0x4e   : > { %1639 = vmatmul.bf16.vlgmr.msrb.gmra.mxu0 %v2101_v14  ;;  %v2357_v10 = vor.u32 %v2868_v8, %v2354_v9  ;;  %v2920_v14 = vld [vmem:[%s3698_s1 + $0x140] sm:$0xff]  ;;  %1755 = vmatpush.bf16.msrb.mxu3 %v2936_v13  ;;  %v2824_v13 = vld [vmem:[%s3087_s18 + $0xb0] sm:$0xf0] }
  0x4f   : > { %v2956_v8 = vld [vmem:[%s3698_s1 + $0x260] sm:$0xff] }
  0x50   : > { %1710 = vmatpush.bf16.msra.mxu2 %v2934_v15  ;;  %1671 = vmatpush.bf16.msra.mxu1 %v2926_v18  ;;  %v2854_v15 = vld [vmem:[%s3087_s18 + $0x1a4] sm:$0xf]  ;;  %v2861_v18 = vld [vmem:[%s3087_s18 + $0x1d8] sm:$0xf0] }
  0x51   : > { %1788 = vmatpush.bf16.msra.mxu0 %v2950_v19  ;;  %v2308_v19 = vld [vmem:[%s3087_s18 + $0x1b0] sm:$0xf]  ;;  %v2301_v22 = vor.u32 %v2861_v18, %v2300_v17 }
  0x52   : > { %1904 = vmatpush.bf16.msra.mxu3 %v2975_v29 }
  0x54   : > { %1711 = vmatpush.bf16.msra.mxu2 %v2933_v21  ;;  %1672 = vmatpush.bf16.msra.mxu1 %v2925_v23  ;;  %v2297_v21 = vor.u32 %v2854_v15, %v2294_v16  ;;  %v2309_v23 = vor.u32 %v2862_v20, %v2308_v19  ;;  %v2825_v15 = vld [vmem:[%s3087_s18 + $0xb8] sm:$0xf0] }
  0x55   : > { %1789 = vmatpush.bf16.msra.mxu0 %v2949_v24  ;;  %v2805_v24 = vld [vmem:[%s3087_s18 + $0x1c] sm:$0xf] }
  0x58   : > { %1712 = vmatpush.bf16.msra.mxu2 %v2932_v25  ;;  %1673 = vmatpush.bf16.msra.mxu1 %v2924_v26  ;;  %v2110_v25 = vld [vmem:[%s3087_s18 + $0x4c] sm:$0xf0]  ;;  %v2944_v26 = vld [vmem:[%s3698_s1 + $0x200] sm:$0xff] }
  0x59   : > { %1790 = vmatpush.bf16.msra.mxu0 %v2948_v27  ;;  %v2113_v27 = vor.u32 %v2805_v24, %v2110_v25 }
  0x5b   : > { %1527 = vmatmul.bf16.gmra.mxu1 %v2141_v34  ;;  %1566 = vmatmul.bf16.gmra.mxu2 %v2145_v35  ;;  %v2352_v34 = vld [vmem:[%s3087_s18 + $0x210] sm:$0xf]  ;;  %v2874_v35 = vld [vmem:[%s3087_s18 + $0x240] sm:$0xf0] }
  0x5c   : > { %1713 = vmatpush.bf16.msra.mxu2 %v2931_v40  ;;  %1674 = vmatpush.bf16.msra.mxu1 %v2923_v42  ;;  %v2966_v40 = vld [vmem:[%s3698_s1 + $0x2b0] sm:$0xff]  ;;  %v2818_v42 = vld [vmem:[%s3087_s18 + $0x84] sm:$0xf] }
  0x5d   : > { %1615 = vmatmul.bf16.gmra.mxu3 %v2253_v39  ;;  %1791 = vmatpush.bf16.msra.mxu0 %v2947_v43  ;;  %v2353_v39 = vor.u32 %v2874_v35, %v2352_v34  ;;  %v2162_v43 = vld [vmem:[%s3087_s18 + $0xb4] sm:$0xf0]  ;;  %v2977_v35 = vld [vmem:[%s3698_s1 + $0x308] sm:$0xff] }
  0x5e   : > { %1644 = vmatmul.bf16.gmra.mxu0 %v2153_v36  ;;  %v2360_v36 = vld [vmem:[%s3087_s18 + $0x218] sm:$0xf]  ;;  %v2165_v45 = vor.u32 %v2818_v42, %v2162_v43 }
  0x5f   : > { %v2361_v41 = vor.u32 %v2875_v37, %v2360_v36  ;;  %v2830_v36 = vld [vmem:[%s3087_s18 + $0xe4] sm:$0xf]  ;;  %v2206_v37 = vld [vmem:[%s3087_s18 + $0x114] sm:$0xf0] }
  0x60   : > { %1714 = vmatpush.bf16.msra.mxu2 %v2930_v44  ;;  %1675 = vmatpush.bf16.msra.mxu1 %v2922_v58  ;;  %v2974_v44 = vld [vmem:[%s3698_s1 + $0x2f0] sm:$0xff] }
  0x61   : > { %1792 = vmatpush.bf16.msra.mxu0 %v2946_v59  ;;  %1905 = vmatpush.bf16.msra.mxu3 %v2974_v44 }
  0x64   : > { %1715 = vmatpush.bf16.msra.mxu2 %v2929_v60  ;;  %1676 = vmatpush.bf16.msra.mxu1 %v2921_v62  ;;  %v2831_v60 = vld [vmem:[%s3087_s18 + $0xec] sm:$0xf] }
  0x65   : > { %1793 = vmatpush.bf16.msra.mxu0 %v2945_v11  ;;  %1906 = vmatpush.bf16.msra.mxu3 %v2973_v49  ;;  %v2217_v63 = vor.u32 %v2831_v60, %v2214_v61  ;;  %v2154_v11 = vld [vmem:[%s3087_s18 + $0xac] sm:$0xf0]  ;;  %v2857_v49 = vld [vmem:[%s3087_s18 + $0x1bc] sm:$0xf] }
  0x68   : > { %1716 = vmatpush.bf16.msra.mxu2 %v2928_v12  ;;  %1677 = vmatpush.bf16.msra.mxu1 %v2920_v14  ;;  %v2160_v12 = vld [vmem:[%s3087_s18 + $0x80] sm:$0xf]  ;;  %v2168_v14 = vld [vmem:[%s3087_s18 + $0x88] sm:$0xf] }
  0x69   : > { %1794 = vmatpush.bf16.msra.mxu0 %v2944_v26  ;;  %v2161_v19 = vor.u32 %v2824_v13, %v2160_v12  ;;  %v2850_v12 = vld [vmem:[%s3087_s18 + $0x180] sm:$0xf0]  ;;  %v2272_v13 = vld [vmem:[%s3087_s18 + $0x158] sm:$0xf] }
  0x6b   : > { %1532 = vmatmul.bf16.gmra.mxu1 %v2193_v52  ;;  %1571 = vmatmul.bf16.gmra.mxu2 %v2197_v53  ;;  %v2811_v52 = vld [vmem:[%s3087_s18 + $0x48] sm:$0xf0]  ;;  %v2116_v53 = vld [vmem:[%s3087_s18 + $0x20] sm:$0xf] }
  0x6c   : > { %1865 = vmatpush.bf16.msrb.mxu2 %v2967_v28  ;;  %1826 = vmatpush.bf16.msrb.mxu1 %v2959_v30  ;;  %v2109_v56 = vor.u32 %v2811_v52, %v2108_v51  ;;  %v2971_v28 = vld [vmem:[%s3698_s1 + $0x2d8] sm:$0xff] }
  0x6d   : > { %1620 = vmatmul.bf16.gmra.mxu3 %v2305_v57  ;;  %1947 = vmatpush.bf16.msrb.mxu0 %v2979_v31  ;;  %v2957_v57 = vld [vmem:[%s3698_s1 + $0x268] sm:$0xff] }
  0x6e   : > { %1649 = vmatmul.bf16.gmra.mxu0 %v2205_v54  ;;  %v2812_v54 = vld [vmem:[%s3087_s18 + $0x50] sm:$0xf0] }
  0x6f   : > { %v2117_v59 = vor.u32 %v2812_v54, %v2116_v53  ;;  %v2962_v53 = vld [vmem:[%s3698_s1 + $0x290] sm:$0xff] }
  0x70   : > { %1866 = vmatpush.bf16.msrb.mxu2 %v2966_v40  ;;  %1827 = vmatpush.bf16.msrb.mxu1 %v2958_v46  ;;  %v2220_v40 = vld [vmem:[%s3087_s18 + $0xf0] sm:$0xf] }
  0x71   : > { %1948 = vmatpush.bf16.msrb.mxu0 %v2978_v0  ;;  %v2970_v54 = vld [vmem:[%s3698_s1 + $0x2d0] sm:$0xff] }
  0x74   : > { %1867 = vmatpush.bf16.msrb.mxu2 %v2965_v47  ;;  %1828 = vmatpush.bf16.msrb.mxu1 %v2957_v57  ;;  %v2954_v57 = vld [vmem:[%s3698_s1 + $0x250] sm:$0xff] }
  0x75   : > { %1949 = vmatpush.bf16.msrb.mxu0 %v2977_v35  ;;  %v2953_v35 = vld [vmem:[%s3698_s1 + $0x248] sm:$0xff] }
  0x78   : > { %1829 = vmatpush.bf16.msrb.mxu1 %v2956_v8  ;;  %v2969_v8 = vld [vmem:[%s3698_s1 + $0x2c8] sm:$0xff] }
  0x7b   : > { %1537 = vmatmul.bf16.gmra.mxu1 %v2245_v5  ;;  %1576 = vmatmul.bf16.gmra.mxu2 %v2249_v6  ;;  %v2964_v6 = vld [vmem:[%s3698_s1 + $0x2a0] sm:$0xff] }
  0x7c   : > { %1868 = vmatpush.bf16.msrb.mxu2 %v2964_v6  ;;  %1830 = vmatpush.bf16.msrb.mxu1 %v2955_v33  ;;  %v2961_v6 = vld [vmem:[%s3698_s1 + $0x288] sm:$0xff] }
  0x7d   : > { %1625 = vmatmul.bf16.gmra.mxu3 %v2357_v10  ;;  %v2817_v10 = vld [vmem:[%s3087_s18 + $0x7c] sm:$0xf] }
  0x7e   : > { %1654 = vmatmul.bf16.gmra.mxu0 %v2257_v7  ;;  %v2972_v7 = vld [vmem:[%s3698_s1 + $0x2e0] sm:$0xff]  ;;  %v2157_v18 = vor.u32 %v2817_v10, %v2154_v11 }
  0x7f   : > { %1907 = vmatpush.bf16.msra.mxu3 %v2972_v7  ;;  %v2258_v11 = vld [vmem:[%s3087_s18 + $0x17c] sm:$0xf0] }
  0x80   : > { %1831 = vmatpush.bf16.msrb.mxu1 %v2954_v57 }
  0x83   : > { %1908 = vmatpush.bf16.msra.mxu3 %v2971_v28 }
  0x84   : > { %1832 = vmatpush.bf16.msrb.mxu1 %v2953_v35 }
  0x87   : > { %1909 = vmatpush.bf16.msra.mxu3 %v2970_v54  ;;  %v2864_v54 = vld [vmem:[%s3087_s18 + $0x1f0] sm:$0xf0] }
  0x8b   : > { %1542 = vmatmul.bf16.gmra.mxu1 %v2297_v21  ;;  %1581 = vmatmul.bf16.gmra.mxu2 %v2301_v22  ;;  %v2169_v21 = vor.u32 %v2825_v15, %v2168_v14  ;;  %v2844_v22 = vld [vmem:[%s3087_s18 + $0x154] sm:$0xf]  ;;  %v2851_v14 = vld [vmem:[%s3087_s18 + $0x188] sm:$0xf0] }
  0x8c   : > { %1910 = vmatpush.bf16.msra.mxu3 %v2969_v8 }
  0x8d   : > { %1756 = vmatmul.bf16.vlgmr.msrb.gmra.mxu3 %v2113_v27  ;;  %v2963_v27 = vld [vmem:[%s3698_s1 + $0x298] sm:$0xff] }
  0x8e   : > { %1659 = vmatmul.bf16.gmra.mxu0 %v2309_v23  ;;  %v2266_v23 = vld [vmem:[%s3087_s18 + $0x184] sm:$0xf0]  ;;  %1869 = vmatpush.bf16.msrb.mxu2 %v2963_v27  ;;  %v2370_v27 = vld [vmem:[%s3087_s18 + $0x254] sm:$0xf0] }
  0x8f   : > { %v2269_v26 = vor.u32 %v2844_v22, %v2266_v23  ;;  %v2273_v23 = vor.u32 %v2851_v14, %v2272_v13 }
  0x92   : > { %1870 = vmatpush.bf16.msrb.mxu2 %v2962_v53  ;;  %v2324_v53 = vld [vmem:[%s3087_s18 + $0x1c0] sm:$0xf] }
  0x96   : > { %1871 = vmatpush.bf16.msrb.mxu2 %v2961_v6 }
  0x9b   : > { %1547 = vmatmul.bf16.gmra.mxu1 %v2349_v38  ;;  %1586 = vmatmul.bf16.gmra.mxu2 %v2353_v39  ;;  %v2212_v38 = vld [vmem:[%s3087_s18 + $0xe8] sm:$0xf]  ;;  %v2837_v39 = vld [vmem:[%s3087_s18 + $0x118] sm:$0xf0] }
  0x9c   : > { %v2213_v46 = vor.u32 %v2837_v39, %v2212_v38 }
  0x9d   : > { %1761 = vmatmul.bf16.gmra.mxu3 %v2165_v45  ;;  %v2209_v45 = vor.u32 %v2830_v36, %v2206_v37 }
  0x9e   : > { %1664 = vmatmul.bf16.gmra.mxu0 %v2361_v41  ;;  %v2838_v41 = vld [vmem:[%s3087_s18 + $0x120] sm:$0xf0] }
  0x9f   : > { %v2221_v48 = vor.u32 %v2838_v41, %v2220_v40 }
  0xa8   : > { %v3366_v58 = vpop.f32.mrf.mxu1 }
  0xa9   : > { %v1495_v57 = vadd.f32 %v3376_v1, %v3366_v58 }
  0xab   : > { %v1484_v62 = vpop.f32.mrf.mxu0  ;;  %1678 = vmatmul.bf16.vlgmr.msra.gmra.mxu1 %v2105_v55  ;;  %1717 = vmatmul.bf16.vlgmr.msra.gmra.mxu2 %v2109_v56  ;;  %v2321_v56 = vor.u32 %v2857_v49, %v2318_v50  ;;  %v2856_v49 = vld [vmem:[%s3087_s18 + $0x1b4] sm:$0xf] }
  0xac   : > { %v1485_v43 = vadd.f32 %v3376_v1, %v1484_v62 }
  0xad   : > { %1766 = vmatmul.bf16.gmra.mxu3 %v2217_v63 }
  0xae   : > { %1795 = vmatmul.bf16.vlgmr.msra.gmra.mxu0 %v2117_v59  ;;  %v1504_v2 = vpop.f32.mrf.mxu2 }
  0xaf   : > { %v3379_v3 = vadd.f32 %v3376_v1, %v1504_v2 }
  0xb0   : > { %v3381_v4 = vpop.f32.mrf.mxu1  ;;  %v3394_v9 = vpop.f32.mrf.mxu3 }
  0xb3   : > { %v3383_v5 = vpop.f32.mrf.mxu0 }
  0xb4   : > { %v1487_v60 = vadd.f32 %v3376_v1, %v3383_v5  ;;  %v2843_v5 = vld [vmem:[%s3087_s18 + $0x14c] sm:$0xf] }
  0xb6   : > { %v1506_v16 = vpop.f32.mrf.mxu2 }
  0xb7   : > { %v3403_v17 = vadd.f32 %v3376_v1, %v1506_v16 }
  0xb8   : > { %v3405_v20 = vpop.f32.mrf.mxu1  ;;  %v3411_v25 = vpop.f32.mrf.mxu3 }
  0xbb   : > { %v3409_v24 = vpop.f32.mrf.mxu0  ;;  %1683 = vmatmul.bf16.gmra.mxu1 %v2157_v18  ;;  %1722 = vmatmul.bf16.gmra.mxu2 %v2161_v19  ;;  %v2261_v19 = vor.u32 %v2843_v5, %v2258_v11 }
  0xbc   : > { %v1490_v16 = vadd.f32 %v3376_v1, %v3409_v24 }
  0xbd   : > { %1771 = vmatmul.bf16.gmra.mxu3 %v2269_v26  ;;  %v2870_v26 = vld [vmem:[%s3087_s18 + $0x224] sm:$0xf] }
  0xbe   : > { %1800 = vmatmul.bf16.gmra.mxu0 %v2169_v21  ;;  %v1509_v29 = vpop.f32.mrf.mxu2  ;;  %v2373_v24 = vor.u32 %v2870_v26, %v2370_v27  ;;  %v2368_v26 = vld [vmem:[%s3087_s18 + $0x220] sm:$0xf]  ;;  %v2876_v27 = vld [vmem:[%s3087_s18 + $0x250] sm:$0xf0] }
  0xbf   : > { %v3420_v30 = vadd.f32 %v3376_v1, %v1509_v29 }
  0xc0   : > { %v3422_v31 = vpop.f32.mrf.mxu1  ;;  %v3429_v34 = vpop.f32.mrf.mxu3 }
  0xc3   : > { %v3424_v32 = vpop.f32.mrf.mxu0 }
  0xc4   : > { %v1492_v39 = vadd.f32 %v3376_v1, %v3424_v32  ;;  %v2960_v32 = vld [vmem:[%s3698_s1 + $0x280] sm:$0xff] }
  0xc5   : > { %1872 = vmatpush.bf16.msrb.mxu2 %v2960_v32 }
  0xc6   : > { %v1511_v42 = vpop.f32.mrf.mxu2 }
  0xc7   : > { %v3442_v44 = vadd.f32 %v3376_v1, %v1511_v42  ;;  %v2968_v42 = vld [vmem:[%s3698_s1 + $0x2c0] sm:$0xff] }
  0xc8   : > { %v1523_v47 = vpop.f32.mrf.mxu1  ;;  %v3452_v55 = vpop.f32.mrf.mxu3  ;;  %1911 = vmatpush.bf16.msra.mxu3 %v2968_v42 }
  0xc9   : > { %v1524_v51 = vadd.f32 %v1523_v47, %v1485_v43  ;;  %v2952_v47 = vld [vmem:[%s3698_s1 + $0x240] sm:$0xff] }
  0xca   : > { %1833 = vmatpush.bf16.msrb.mxu1 %v2952_v47 }
  0xcb   : > { %v1640_v52 = vpop.f32.mrf.mxu0  ;;  %1688 = vmatmul.bf16.gmra.mxu1 %v2209_v45  ;;  %1727 = vmatmul.bf16.gmra.mxu2 %v2213_v46 }
  0xcd   : > { %1776 = vmatmul.bf16.gmra.mxu3 %v2321_v56 }
  0xce   : > { %1805 = vmatmul.bf16.gmra.mxu0 %v2221_v48  ;;  %v1562_v59 = vpop.f32.mrf.mxu2 }
  0xcf   : > { %v1563_v61 = vadd.f32 %v1562_v59, %v1524_v51  ;;  %v2316_v51 = vld [vmem:[%s3087_s18 + $0x1b8] sm:$0xf] }
  0xd0   : > { %v1525_v62 = vpop.f32.mrf.mxu1  ;;  %v3463_v7 = vpop.f32.mrf.mxu3 }
  0xd1   : > { %v1602_v63 = vadd.f32 %v3394_v9, %v1563_v61  ;;  %v1526_v0 = vadd.f32 %v1525_v62, %v1487_v60  ;;  %v2264_v9 = vld [vmem:[%s3087_s18 + $0x150] sm:$0xf] }
  0xd2   : > { %v2265_v21 = vor.u32 %v2850_v12, %v2264_v9 }
  0xd3   : > { %v1642_v2 = vpop.f32.mrf.mxu0  ;;  %v3469_v10 = vadd.f32 %v1640_v52, %v1602_v63  ;;  %v2863_v52 = vld [vmem:[%s3087_s18 + $0x1e8] sm:$0xf0]  ;;  %v2325_v63 = vor.u32 %v2864_v54, %v2324_v53  ;;  %v2806_v54 = vld [vmem:[%s3087_s18 + $0x24] sm:$0xf] }
  0xd4   : > { %v2317_v61 = vor.u32 %v2863_v52, %v2316_v51 }
  0xd6   : > { %v1564_v15 = vpop.f32.mrf.mxu2 }
  0xd7   : > { %v1565_v18 = vadd.f32 %v1564_v15, %v1526_v0  ;;  %v2807_v0 = vld [vmem:[%s3087_s18 + $0x2c] sm:$0xf] }
  0xd8   : > { %v1528_v22 = vpop.f32.mrf.mxu1  ;;  %v3484_v36 = vpop.f32.mrf.mxu3 }
  0xd9   : > { %v1604_v28 = vadd.f32 %v3411_v25, %v1565_v18  ;;  %v1529_v29 = vadd.f32 %v1528_v22, %v1490_v16  ;;  %v2976_v25 = vld [vmem:[%s3698_s1 + $0x300] sm:$0xff] }
  0xda   : > { %1950 = vmatpush.bf16.msrb.mxu0 %v2976_v25 }
  0xdb   : > { %v1645_v33 = vpop.f32.mrf.mxu0  ;;  %1693 = vmatmul.bf16.gmra.mxu1 %v2261_v19  ;;  %1732 = vmatmul.bf16.gmra.mxu2 %v2265_v21  ;;  %v3486_v37 = vadd.f32 %v1642_v2, %v1604_v28  ;;  %v2126_v2 = vld [vmem:[%s3087_s18 + $0x5c] sm:$0xf0]  ;;  %v2869_v21 = vld [vmem:[%s3087_s18 + $0x21c] sm:$0xf]  ;;  %v2376_v28 = vld [vmem:[%s3087_s18 + $0x228] sm:$0xf] }
  0xdc   : > { %v2129_v9 = vor.u32 %v2807_v0, %v2126_v2 }
  0xdd   : > { %1781 = vmatmul.bf16.gmra.mxu3 %v2373_v24  ;;  %v2369_v24 = vor.u32 %v2876_v27, %v2368_v26  ;;  %v2819_v26 = vld [vmem:[%s3087_s18 + $0x8c] sm:$0xf] }
  0xde   : > { %1810 = vmatmul.bf16.gmra.mxu0 %v2273_v23  ;;  %v1567_v38 = vpop.f32.mrf.mxu2  ;;  %v2362_v23 = vld [vmem:[%s3087_s18 + $0x24c] sm:$0xf0] }
  0xdf   : > { %v1568_v40 = vadd.f32 %v1567_v38, %v1529_v29  ;;  %v2877_v29 = vld [vmem:[%s3087_s18 + $0x258] sm:$0xf0] }
  0xe0   : > { %v1530_v41 = vpop.f32.mrf.mxu1  ;;  %v3503_v48 = vpop.f32.mrf.mxu3  ;;  %v2377_v38 = vor.u32 %v2877_v29, %v2376_v28  ;;  %v2170_v28 = vld [vmem:[%s3087_s18 + $0xbc] sm:$0xf0]  ;;  %v2176_v29 = vld [vmem:[%s3087_s18 + $0x90] sm:$0xf] }
  0xe1   : > { %v1607_v43 = vadd.f32 %v3429_v34, %v1568_v40  ;;  %v1531_v45 = vadd.f32 %v1530_v41, %v1492_v39  ;;  %v2310_v34 = vld [vmem:[%s3087_s18 + $0x1e4] sm:$0xf0]  ;;  %v2820_v39 = vld [vmem:[%s3087_s18 + $0x94] sm:$0xf] }
  0xe2   : > { %v2313_v60 = vor.u32 %v2856_v49, %v2310_v34  ;;  %v2178_v40 = vld [vmem:[%s3087_s18 + $0xc4] sm:$0xf0] }
  0xe3   : > { %v1647_v46 = vpop.f32.mrf.mxu0  ;;  %v3506_v50 = vadd.f32 %v1645_v33, %v1607_v43  ;;  %v1500_v33 = vadd.f32 %v3376_v1, %v3405_v20 }
  0xe6   : > { %v1569_v56 = vpop.f32.mrf.mxu2 }
  0xe7   : > { %v1570_v59 = vadd.f32 %v1569_v56, %v1531_v45 }
  0xe8   : > { %v1533_v62 = vpop.f32.mrf.mxu1  ;;  %v3518_v11 = vpop.f32.mrf.mxu3 }
  0xe9   : > { %v1609_v6 = vadd.f32 %v3452_v55, %v1570_v59  ;;  %v1534_v8 = vadd.f32 %v1533_v62, %v1495_v57  ;;  %v1497_v55 = vadd.f32 %v3376_v1, %v3381_v4  ;;  %v2118_v57 = vld [vmem:[%s3087_s18 + $0x54] sm:$0xf0]  ;;  %v2124_v59 = vld [vmem:[%s3087_s18 + $0x28] sm:$0xf]  ;;  %v2814_v62 = vld [vmem:[%s3087_s18 + $0x60] sm:$0xf0] }
  0xeb   : > { %v1650_v5 = vpop.f32.mrf.mxu0  ;;  %1698 = vmatmul.bf16.gmra.mxu1 %v2313_v60  ;;  %1737 = vmatmul.bf16.gmra.mxu2 %v2317_v61  ;;  %v3520_v58 = vadd.f32 %v1647_v46, %v1609_v6  ;;  %v2181_v46 = vor.u32 %v2820_v39, %v2178_v40  ;;  %v2813_v60 = vld [vmem:[%s3087_s18 + $0x58] sm:$0xf0]  ;;  %v2132_v61 = vld [vmem:[%s3087_s18 + $0x30] sm:$0xf]  ;;  %v2846_v40 = vld [vmem:[%s3087_s18 + $0x164] sm:$0xf] }
  0xec   : > { %v2125_v0 = vor.u32 %v2813_v60, %v2124_v59  ;;  %v2133_v6 = vor.u32 %v2814_v62, %v2132_v61  ;;  %v2222_v59 = vld [vmem:[%s3087_s18 + $0x124] sm:$0xf0]  ;;  %v2228_v60 = vld [vmem:[%s3087_s18 + $0xf8] sm:$0xf]  ;;  %v2839_v61 = vld [vmem:[%s3087_s18 + $0x128] sm:$0xf0] }
  0xed   : > { %1912 = vmatmul.bf16.vlgmr.msra.gmra.mxu3 %v2129_v9  ;;  %v2236_v62 = vld [vmem:[%s3087_s18 + $0x100] sm:$0xf] }
  0xee   : > { %1815 = vmatmul.bf16.gmra.mxu0 %v2325_v63  ;;  %v1572_v12 = vpop.f32.mrf.mxu2 }
  0xef   : > { %v1573_v13 = vadd.f32 %v1572_v12, %v1534_v8  ;;  %v2230_v8 = vld [vmem:[%s3087_s18 + $0x12c] sm:$0xf0] }
  0xf0   : > { %v1535_v14 = vpop.f32.mrf.mxu1  ;;  %v3525_v19 = vpop.f32.mrf.mxu3 }
  0xf1   : > { %v1612_v15 = vadd.f32 %v3463_v7, %v1573_v13  ;;  %v1536_v16 = vadd.f32 %v1535_v14, %v1497_v55  ;;  %v2365_v7 = vor.u32 %v2869_v21, %v2362_v23 }
  0xf3   : > { %v1652_v18 = vpop.f32.mrf.mxu0  ;;  %v3528_v22 = vadd.f32 %v1650_v5, %v1612_v15 }
  0xf6   : > { %v1574_v4 = vpop.f32.mrf.mxu2 }
  0xf7   : > { %v1575_v35 = vadd.f32 %v1574_v4, %v1536_v16  ;;  %v2826_v4 = vld [vmem:[%s3087_s18 + $0xc0] sm:$0xf0] }
  0xf8   : > { %v1538_v25 = vpop.f32.mrf.mxu1  ;;  %v3540_v45 = vpop.f32.mrf.mxu3 }
  0xf9   : > { %v1614_v41 = vadd.f32 %v3484_v36, %v1575_v35  ;;  %v1539_v42 = vadd.f32 %v1538_v25, %v1500_v33  ;;  %v1502_v36 = vadd.f32 %v3376_v1, %v3422_v31  ;;  %v2121_v31 = vor.u32 %v2806_v54, %v2118_v57  ;;  %v2184_v33 = vld [vmem:[%s3087_s18 + $0x98] sm:$0xf]  ;;  %v2827_v35 = vld [vmem:[%s3087_s18 + $0xc8] sm:$0xf0]  ;;  %v2832_v54 = vld [vmem:[%s3087_s18 + $0xf4] sm:$0xf] }
  0xfa   : > { %v2173_v25 = vor.u32 %v2819_v26, %v2170_v28  ;;  %v2845_v26 = vld [vmem:[%s3087_s18 + $0x15c] sm:$0xf] }
  0xfb   : > { %v1655_v43 = vpop.f32.mrf.mxu0  ;;  %1703 = vmatmul.bf16.gmra.mxu1 %v2365_v7  ;;  %1742 = vmatmul.bf16.gmra.mxu2 %v2369_v24  ;;  %v3542_v20 = vadd.f32 %v1652_v18, %v1614_v41 }
  0xfd   : > { %1917 = vmatmul.bf16.gmra.mxu3 %v2181_v46 }
  0xfe   : > { %1820 = vmatmul.bf16.gmra.mxu0 %v2377_v38  ;;  %v1577_v32 = vpop.f32.mrf.mxu2  ;;  %v2177_v38 = vor.u32 %v2826_v4, %v2176_v29  ;;  %v2274_v29 = vld [vmem:[%s3087_s18 + $0x18c] sm:$0xf0]  ;;  %v2280_v4 = vld [vmem:[%s3087_s18 + $0x160] sm:$0xf] }
  0xff   : > { %v1578_v47 = vadd.f32 %v1577_v32, %v1539_v42 }
 0x100   : > { %v1540_v49 = vpop.f32.mrf.mxu1  ;;  %v1626_v53 = vpop.f32.mrf.mxu3 }
 0x101   : > { %v1617_v34 = vadd.f32 %v3503_v48, %v1578_v47  ;;  %v1541_v51 = vadd.f32 %v1540_v49, %v1502_v36  ;;  %v2833_v48 = vld [vmem:[%s3087_s18 + $0xfc] sm:$0xf] }
 0x102   : > { %v2233_v13 = vor.u32 %v2833_v48, %v2230_v8  ;;  %v2859_v48 = vld [vmem:[%s3087_s18 + $0x1cc] sm:$0xf] }
 0x103   : > { %v1657_v52 = vpop.f32.mrf.mxu0  ;;  %v3548_v56 = vadd.f32 %v1655_v43, %v1617_v34 }
 0x106   : > { %v1579_v63 = vpop.f32.mrf.mxu2 }
 0x107   : > { %v1580_v1 = vadd.f32 %v1579_v63, %v1541_v51  ;;  %v2840_v63 = vld [vmem:[%s3087_s18 + $0x130] sm:$0xf0] }
 0x108   : > { %v1543_v2 = vpop.f32.mrf.mxu1  ;;  %v1628_v55 = vpop.f32.mrf.mxu3 }
 0x109   : > { %v1619_v5 = vadd.f32 %v3518_v11, %v1580_v1  ;;  %v1544_v9 = vadd.f32 %v1543_v2, %v3379_v3  ;;  %v2229_v2 = vor.u32 %v2839_v61, %v2228_v60  ;;  %v2326_v60 = vld [vmem:[%s3087_s18 + $0x1f4] sm:$0xf0]  ;;  %v2332_v61 = vld [vmem:[%s3087_s18 + $0x1c8] sm:$0xf] }
 0x10b   : > { %v1660_v12 = vpop.f32.mrf.mxu0  ;;  %1834 = vmatmul.bf16.vlgmr.msrb.gmra.mxu1 %v2121_v31  ;;  %1873 = vmatmul.bf16.vlgmr.msrb.gmra.mxu2 %v2125_v0  ;;  %v3559_v14 = vadd.f32 %v1657_v52, %v1619_v5  ;;  %v2225_v0 = vor.u32 %v2832_v54, %v2222_v59  ;;  %v2858_v54 = vld [vmem:[%s3087_s18 + $0x1c4] sm:$0xf] }
 0x10d   : > { %1922 = vmatmul.bf16.gmra.mxu3 %v2233_v13 }
 0x10e   : > { %2794 = vmatmul.msk.bf16.vlgmr.msrb.gmra.mxu0 %vm1456_vm0, %v2133_v6  ;;  %v1582_v15 = vpop.f32.mrf.mxu2 }
 0x10f   : > { %v1583_v11 = vadd.f32 %v1582_v15, %v1544_v9 }
 0x110   : > { %v1545_v3 = vpop.f32.mrf.mxu1  ;;  %v1757_v23 = vpop.f32.mrf.mxu3 }
 0x111   : > { %v1622_v16 = vadd.f32 %v3525_v19, %v1583_v11  ;;  %v1546_v18 = vadd.f32 %v1545_v3, %v3403_v17  ;;  %v2185_v19 = vor.u32 %v2827_v35, %v2184_v33  ;;  %v2282_v17 = vld [vmem:[%s3087_s18 + $0x194] sm:$0xf0]  ;;  %v2852_v33 = vld [vmem:[%s3087_s18 + $0x190] sm:$0xf0]  ;;  %v2288_v35 = vld [vmem:[%s3087_s18 + $0x168] sm:$0xf] }
 0x112   : > { %v2285_v32 = vor.u32 %v2846_v40, %v2282_v17  ;;  %v2872_v40 = vld [vmem:[%s3087_s18 + $0x234] sm:$0xf] }
 0x113   : > { %v1662_v21 = vpop.f32.mrf.mxu0  ;;  %v3565_v27 = vadd.f32 %v1660_v12, %v1622_v16 }
 0x116   : > { %v1584_v7 = vpop.f32.mrf.mxu2 }
 0x117   : > { %v1585_v24 = vadd.f32 %v1584_v7, %v1546_v18  ;;  %v2853_v7 = vld [vmem:[%s3087_s18 + $0x198] sm:$0xf0] }
 0x118   : > { %v1548_v39 = vpop.f32.mrf.mxu1  ;;  %v1759_v46 = vpop.f32.mrf.mxu3 }
 0x119   : > { %v1624_v41 = vadd.f32 %v3540_v45, %v1585_v24  ;;  %v1549_v42 = vadd.f32 %v1548_v39, %v3420_v30  ;;  %v2281_v39 = vor.u32 %v2852_v33, %v2280_v4  ;;  %v2392_v4 = vld [vmem:[%s3087_s18 + $0x238] sm:$0xf]  ;;  %v2879_v33 = vld [vmem:[%s3087_s18 + $0x268] sm:$0xf0] }
 0x11b   : > { %v1665_v43 = vpop.f32.mrf.mxu0  ;;  %1839 = vmatmul.bf16.gmra.mxu1 %v2173_v25  ;;  %1878 = vmatmul.bf16.gmra.mxu2 %v2177_v38  ;;  %v3576_v36 = vadd.f32 %v1662_v21, %v1624_v41  ;;  %v2277_v38 = vor.u32 %v2845_v26, %v2274_v29  ;;  %v2384_v26 = vld [vmem:[%s3087_s18 + $0x230] sm:$0xf]  ;;  %v2878_v29 = vld [vmem:[%s3087_s18 + $0x260] sm:$0xf0] }
 0x11d   : > { %1927 = vmatmul.bf16.gmra.mxu3 %v2285_v32 }
 0x11e   : > { %2795 = vmatmul.msk.bf16.gmra.mxu0 %vm1456_vm0, %v2185_v19  ;;  %v1587_v47 = vpop.f32.mrf.mxu2 }
 0x11f   : > { %v1588_v49 = vadd.f32 %v1587_v47, %v1549_v42 }
 0x120   : > { %v1550_v45 = vpop.f32.mrf.mxu1  ;;  %v1762_v52 = vpop.f32.mrf.mxu3 }
 0x121   : > { %v1627_v30 = vadd.f32 %v1626_v53, %v1588_v49  ;;  %v1551_v34 = vadd.f32 %v1550_v45, %v3442_v44  ;;  %v2237_v53 = vor.u32 %v2840_v63, %v2236_v62  ;;  %v2334_v44 = vld [vmem:[%s3087_s18 + $0x1fc] sm:$0xf0]  ;;  %v2865_v62 = vld [vmem:[%s3087_s18 + $0x1f8] sm:$0xf0]  ;;  %v2340_v63 = vld [vmem:[%s3087_s18 + $0x1d0] sm:$0xf] }
 0x122   : > { %v2337_v13 = vor.u32 %v2859_v48, %v2334_v44 }
 0x123   : > { %v1667_v51 = vpop.f32.mrf.mxu0  ;;  %v3581_v57 = vadd.f32 %v1665_v43, %v1627_v30 }
 0x126   : > { %v1589_v1 = vpop.f32.mrf.mxu2 }
 0x127   : > { %v1590_v31 = vadd.f32 %v1589_v1, %v1551_v34  ;;  %v2866_v1 = vld [vmem:[%s3087_s18 + $0x200] sm:$0xf0] }
 0x128   : > { %v1679_v6 = vpop.f32.mrf.mxu1  ;;  %v1764_v12 = vpop.f32.mrf.mxu3  ;;  %v2341_v48 = vor.u32 %v2866_v1, %v2340_v63 }
 0x129   : > { %v1629_v8 = vadd.f32 %v1628_v55, %v1590_v31  ;;  %v1680_v5 = vadd.f32 %v1679_v6, %v3469_v10  ;;  %v2333_v6 = vor.u32 %v2865_v62, %v2332_v61 }
 0x12b   : > { %v1796_v9 = vpop.f32.mrf.mxu0  ;;  %1844 = vmatmul.bf16.gmra.mxu1 %v2225_v0  ;;  %1883 = vmatmul.bf16.gmra.mxu2 %v2229_v2  ;;  %v3591_v15 = vadd.f32 %v1667_v51, %v1629_v8  ;;  %v2329_v2 = vor.u32 %v2858_v54, %v2326_v60 }
 0x12d   : > { %1932 = vmatmul.bf16.gmra.mxu3 %v2337_v13 }
 0x12e   : > { %2796 = vmatmul.msk.bf16.gmra.mxu0 %vm1456_vm0, %v2237_v53  ;;  %v1718_v11 = vpop.f32.mrf.mxu2 }
 0x12f   : > { %v1719_v3 = vadd.f32 %v1718_v11, %v1680_v5 }
 0x130   : > { %v1681_v55 = vpop.f32.mrf.mxu1  ;;  %v1767_v21 = vpop.f32.mrf.mxu3 }
 0x131   : > { %v1758_v10 = vadd.f32 %v1757_v23, %v1719_v3  ;;  %v1682_v16 = vadd.f32 %v1681_v55, %v3486_v37  ;;  %v2289_v23 = vor.u32 %v2853_v7, %v2288_v35  ;;  %v2386_v37 = vld [vmem:[%s3087_s18 + $0x264] sm:$0xf0] }
 0x132   : > { %v2389_v32 = vor.u32 %v2872_v40, %v2386_v37 }
 0x133   : > { %v1798_v18 = vpop.f32.mrf.mxu0  ;;  %v3596_v28 = vadd.f32 %v1796_v9, %v1758_v10  ;;  %v2871_v10 = vld [vmem:[%s3087_s18 + $0x22c] sm:$0xf] }
 0x136   : > { %v1720_v24 = vpop.f32.mrf.mxu2 }
 0x137   : > { %v1721_v25 = vadd.f32 %v1720_v24, %v1682_v16 }
 0x138   : > { %v1684_v19 = vpop.f32.mrf.mxu1  ;;  %v1769_v43 = vpop.f32.mrf.mxu3 }
 0x139   : > { %v1760_v17 = vadd.f32 %v1759_v46, %v1721_v25  ;;  %v1685_v41 = vadd.f32 %v1684_v19, %v3506_v50  ;;  %v2385_v25 = vor.u32 %v2878_v29, %v2384_v26 }
 0x13b   : > { %v1801_v42 = vpop.f32.mrf.mxu0  ;;  %1849 = vmatmul.bf16.gmra.mxu1 %v2277_v38  ;;  %1888 = vmatmul.bf16.gmra.mxu2 %v2281_v39  ;;  %v3606_v47 = vadd.f32 %v1798_v18, %v1760_v17  ;;  %v2378_v18 = vld [vmem:[%s3087_s18 + $0x25c] sm:$0xf0]  ;;  %v2393_v39 = vor.u32 %v2879_v33, %v2392_v4  ;;  %s2081_s18 = sshll.u32 %s3702_s24, 2 }
 0x13c   : > { %v2381_v24 = vor.u32 %v2871_v10, %v2378_v18  ;;  %s3658_s30 = scalar_lea.vmem %s3700_s3, %s2081_s18 }
 0x13d   : > { %1937 = vmatmul.bf16.gmra.mxu3 %v2389_v32 }
 0x13e   : > { %2797 = vmatmul.msk.bf16.gmra.mxu0 %vm1456_vm0, %v2289_v23  ;;  %v1723_v49 = vpop.f32.mrf.mxu2 }
 0x13f   : > { %v1724_v45 = vadd.f32 %v1723_v49, %v1685_v41 }
 0x140   : > { %v1686_v46 = vpop.f32.mrf.mxu1  ;;  %v1772_v51 = vpop.f32.mrf.mxu3 }
 0x141   : > { %v1763_v50 = vadd.f32 %v1762_v52, %v1724_v45  ;;  %v1687_v30 = vadd.f32 %v1686_v46, %v3520_v58 }
 0x143   : > { %v1803_v34 = vpop.f32.mrf.mxu0  ;;  %v3611_v59 = vadd.f32 %v1801_v42, %v1763_v50 }
 0x146   : > { %v1725_v31 = vpop.f32.mrf.mxu2 }
 0x147   : > { %v1726_v0 = vadd.f32 %v1725_v31, %v1687_v30 }
 0x148   : > { %v1689_v53 = vpop.f32.mrf.mxu1  ;;  %v1774_v8 = vpop.f32.mrf.mxu3 }
 0x149   : > { %v1765_v52 = vadd.f32 %v1764_v12, %v1726_v0  ;;  %v1690_v58 = vadd.f32 %v1689_v53, %v3528_v22 }
 0x14b   : > { %v1806_v44 = vpop.f32.mrf.mxu0  ;;  %1854 = vmatmul.bf16.gmra.mxu1 %v2329_v2  ;;  %1893 = vmatmul.bf16.gmra.mxu2 %v2333_v6  ;;  %v3619_v5 = vadd.f32 %v1803_v34, %v1765_v52 }
 0x14e   : > { %2798 = vmatmul.msk.bf16.gmra.mxu0 %vm1456_vm0, %v2341_v48  ;;  %v1728_v9 = vpop.f32.mrf.mxu2 }
 0x14f   : > { %v1729_v13 = vadd.f32 %v1728_v9, %v1690_v58 }
 0x150   : > { %v1691_v11 = vpop.f32.mrf.mxu1  ;;  %v1777_v55 = vpop.f32.mrf.mxu3 }
 0x151   : > { %v1768_v3 = vadd.f32 %v1767_v21, %v1729_v13  ;;  %v1692_v12 = vadd.f32 %v1691_v11, %v3542_v20 }
 0x153   : > { %v1808_v22 = vpop.f32.mrf.mxu0  ;;  %v3624_v16 = vadd.f32 %v1806_v44, %v1768_v3 }
 0x156   : > { %v1730_v35 = vpop.f32.mrf.mxu2 }
 0x157   : > { %v1731_v7 = vadd.f32 %v1730_v35, %v1692_v12 }
 0x158   : > { %v1694_v38 = vpop.f32.mrf.mxu1  ;;  %v1779_v40 = vpop.f32.mrf.mxu3 }
 0x159   : > { %v1770_v19 = vadd.f32 %v1769_v43, %v1731_v7  ;;  %v1695_v21 = vadd.f32 %v1694_v38, %v3548_v56 }
 0x15b   : > { %v1811_v20 = vpop.f32.mrf.mxu0  ;;  %1859 = vmatmul.bf16.gmra.mxu1 %v2381_v24  ;;  %1898 = vmatmul.bf16.gmra.mxu2 %v2385_v25  ;;  %v3632_v23 = vadd.f32 %v1808_v22, %v1770_v19 }
 0x15e   : > { %2799 = vmatmul.msk.bf16.gmra.mxu0 %vm1456_vm0, %v2393_v39  ;;  %v1733_v37 = vpop.f32.mrf.mxu2 }
 0x15f   : > { %v1734_v17 = vadd.f32 %v1733_v37, %v1695_v21 }
 0x160   : > { %v1696_v41 = vpop.f32.mrf.mxu1  ;;  %v1782_v46 = vpop.f32.mrf.mxu3 }
 0x161   : > { %v1773_v42 = vadd.f32 %v1772_v51, %v1734_v17  ;;  %v1697_v32 = vadd.f32 %v1696_v41, %v3559_v14 }
 0x163   : > { %v1813_v49 = vpop.f32.mrf.mxu0  ;;  %v3636_v45 = vadd.f32 %v1811_v20, %v1773_v42 }
 0x166   : > { %v1735_v43 = vpop.f32.mrf.mxu2 }
 0x167   : > { %v1736_v56 = vadd.f32 %v1735_v43, %v1697_v32 }
 0x168   : > { %v1699_v50 = vpop.f32.mrf.mxu1  ;;  %v1784_v1 = vpop.f32.mrf.mxu3 }
 0x169   : > { %v1775_v30 = vadd.f32 %v1774_v8, %v1736_v56  ;;  %v1700_v34 = vadd.f32 %v1699_v50, %v3565_v27 }
 0x16b   : > { %v1816_v54 = vpop.f32.mrf.mxu0  ;;  %v3639_v60 = vadd.f32 %v1813_v49, %v1775_v30 }
 0x16e   : > { %v1738_v61 = vpop.f32.mrf.mxu2 }
 0x16f   : > { %v1739_v62 = vadd.f32 %v1738_v61, %v1700_v34 }
 0x170   : > { %v1701_v63 = vpop.f32.mrf.mxu1  ;;  %v1913_v58 = vpop.f32.mrf.mxu3 }
 0x171   : > { %v1778_v51 = vadd.f32 %v1777_v55, %v1739_v62  ;;  %v1702_v14 = vadd.f32 %v1701_v63, %v3576_v36 }
 0x173   : > { %v1818_v31 = vpop.f32.mrf.mxu0  ;;  %v3642_v0 = vadd.f32 %v1816_v54, %v1778_v51 }
 0x176   : > { %v1740_v2 = vpop.f32.mrf.mxu2 }
 0x177   : > { %v1741_v6 = vadd.f32 %v1740_v2, %v1702_v14 }
 0x178   : > { %v1704_v53 = vpop.f32.mrf.mxu1  ;;  %v1915_v22 = vpop.f32.mrf.mxu3 }
 0x179   : > { %v1780_v48 = vadd.f32 %v1779_v40, %v1741_v6  ;;  %v1705_v52 = vadd.f32 %v1704_v53, %v3581_v57 }
 0x17b   : > { %v1821_v27 = vpop.f32.mrf.mxu0  ;;  %v3645_v44 = vadd.f32 %v1818_v31, %v1780_v48 }
 0x17e   : > { %v1743_v8 = vpop.f32.mrf.mxu2 }
 0x17f   : > { %v1744_v9 = vadd.f32 %v1743_v8, %v1705_v52 }
 0x180   : > { %v1706_v13 = vpop.f32.mrf.mxu1  ;;  %v1918_v35 = vpop.f32.mrf.mxu3 }
 0x181   : > { %v1783_v11 = vadd.f32 %v1782_v46, %v1744_v9  ;;  %v1707_v3 = vadd.f32 %v1706_v13, %v3591_v15 }
 0x183   : > { %v1823_v36 = vpop.f32.mrf.mxu0  ;;  %v3648_v12 = vadd.f32 %v1821_v27, %v1783_v11 }
 0x186   : > { %v1745_v55 = vpop.f32.mrf.mxu2 }
 0x187   : > { %v1746_v10 = vadd.f32 %v1745_v55, %v1707_v3 }
 0x188   : > { %v1835_v18 = vpop.f32.mrf.mxu1  ;;  %v1920_v37 = vpop.f32.mrf.mxu3 }
 0x189   : > { %v1785_v26 = vadd.f32 %v1784_v1, %v1746_v10  ;;  %v1836_v4 = vadd.f32 %v1835_v18, %v3596_v28 }
 0x18b   : > { %v1952_v57 = vpop.f32.mrf.mxu0  ;;  %v3650_v29 = vadd.f32 %v1823_v36, %v1785_v26 }
 0x18e   : > { %v1874_v33 = vpop.f32.mrf.mxu2 }
 0x18f   : > { %v1875_v7 = vadd.f32 %v1874_v33, %v1836_v4 }
 0x190   : > { %v1837_v24 = vpop.f32.mrf.mxu1  ;;  %v1923_v34 = vpop.f32.mrf.mxu3 }
 0x191   : > { %v1914_v25 = vadd.f32 %v1913_v58, %v1875_v7  ;;  %v1838_v19 = vadd.f32 %v1837_v24, %v3606_v47 }
 0x193   : > { %v1954_v15 = vpop.f32.mrf.mxu0  ;;  %v1953_v38 = vadd.f32 %v1952_v57, %v1914_v25 }
 0x195   : > { %v1982_v39 = vmax.f32 %v1953_v38, 0.0 }
 0x196   : > { %v1876_v28 = vpop.f32.mrf.mxu2 }
 0x197   : > { %v1994_v21 = vpack.c.bf16 %v1982_v39, %v1982_v39  ;;  %v1877_v20 = vadd.f32 %v1876_v28, %v1838_v19 }
 0x198   : > { %v1840_v40 = vpop.f32.mrf.mxu1  ;;  %v1925_v6 = vpop.f32.mrf.mxu3 }
 0x199   : > { %2007 = vst.msk [vmem:[%s3658_s30] sm:$0xf] %vm2006_vm1, %v1994_v21  ;;  %v1916_v17 = vadd.f32 %v1915_v22, %v1877_v20  ;;  %v1841_v47 = vadd.f32 %v1840_v40, %v3611_v59 }
 0x19b   : > { %v1957_v41 = vpop.f32.mrf.mxu0  ;;  %v1955_v42 = vadd.f32 %v1954_v15, %v1916_v17 }
 0x19d   : > { %v1983_v32 = vmax.f32 %v1955_v42, 0.0 }
 0x19e   : > { %v1879_v49 = vpop.f32.mrf.mxu2 }
 0x19f   : > { %v1995_v43 = vpack.c.bf16 %v1983_v32, %v1983_v32  ;;  %v1880_v46 = vadd.f32 %v1879_v49, %v1841_v47 }
 0x1a0   : > { %v1842_v56 = vpop.f32.mrf.mxu1  ;;  %v1928_v22 = vpop.f32.mrf.mxu3 }
 0x1a1   : > { %2008 = vst.msk [vmem:[%s3658_s30 + $0x4] sm:$0xf] %vm2006_vm1, %v1995_v43  ;;  %v1919_v50 = vadd.f32 %v1918_v35, %v1880_v46  ;;  %v1843_v62 = vadd.f32 %v1842_v56, %v3619_v5 }
 0x1a3   : > { %v1959_v30 = vpop.f32.mrf.mxu0  ;;  %v1958_v54 = vadd.f32 %v1957_v41, %v1919_v50 }
 0x1a5   : > { %v1984_v61 = vmax.f32 %v1958_v54, 0.0 }
 0x1a6   : > { %v1881_v63 = vpop.f32.mrf.mxu2 }
 0x1a7   : > { %v1996_v1 = vpack.c.bf16 %v1984_v61, %v1984_v61  ;;  %v1882_v51 = vadd.f32 %v1881_v63, %v1843_v62 }
 0x1a8   : > { %v1845_v14 = vpop.f32.mrf.mxu1 }
 0x1a9   : > { %2009 = vst.msk [vmem:[%s3658_s30 + $0x8] sm:$0xf] %vm2006_vm1, %v1996_v1  ;;  %v1921_v59 = vadd.f32 %v1920_v37, %v1882_v51  ;;  %v1846_v48 = vadd.f32 %v1845_v14, %v3624_v16 }
 0x1ab   : > { %v1962_v31 = vpop.f32.mrf.mxu0  ;;  %v1960_v2 = vadd.f32 %v1959_v30, %v1921_v59 }
 0x1ad   : > { %v1985_v53 = vmax.f32 %v1960_v2, 0.0 }
 0x1ae   : > { %v1884_v52 = vpop.f32.mrf.mxu2 }
 0x1af   : > { %v1997_v27 = vpack.c.bf16 %v1985_v53, %v1985_v53  ;;  %v1885_v58 = vadd.f32 %v1884_v52, %v1846_v48 }
 0x1b0   : > { %v1847_v8 = vpop.f32.mrf.mxu1 }
 0x1b1   : > { %2010 = vst.msk [vmem:[%s3658_s30 + $0xc] sm:$0xf] %vm2006_vm1, %v1997_v27  ;;  %v1924_v5 = vadd.f32 %v1923_v34, %v1885_v58  ;;  %v1848_v3 = vadd.f32 %v1847_v8, %v3632_v23  ;;  %v1930_v23 = vpop.f32.mrf.mxu3 }
 0x1b3   : > { %v1964_v9 = vpop.f32.mrf.mxu0  ;;  %v1963_v13 = vadd.f32 %v1962_v31, %v1924_v5 }
 0x1b5   : > { %v1986_v11 = vmax.f32 %v1963_v13, 0.0 }
 0x1b6   : > { %v1886_v36 = vpop.f32.mrf.mxu2 }
 0x1b7   : > { %v1998_v55 = vpack.c.bf16 %v1986_v11, %v1986_v11  ;;  %v1887_v10 = vadd.f32 %v1886_v36, %v1848_v3 }
 0x1b8   : > { %v1850_v18 = vpop.f32.mrf.mxu1 }
 0x1b9   : > { %2011 = vst.msk [vmem:[%s3658_s30 + $0x10] sm:$0xf] %vm2006_vm1, %v1998_v55  ;;  %v1926_v16 = vadd.f32 %v1925_v6, %v1887_v10  ;;  %v1851_v33 = vadd.f32 %v1850_v18, %v3636_v45  ;;  %v1933_v17 = vpop.f32.mrf.mxu3 }
 0x1bb   : > { %v1967_v26 = vpop.f32.mrf.mxu0  ;;  %v1965_v57 = vadd.f32 %v1964_v9, %v1926_v16 }
 0x1bd   : > { %v1987_v4 = vmax.f32 %v1965_v57, 0.0 }
 0x1be   : > { %v1889_v35 = vpop.f32.mrf.mxu2 }
 0x1bf   : > { %v1999_v7 = vpack.c.bf16 %v1987_v4, %v1987_v4  ;;  %v1890_v24 = vadd.f32 %v1889_v35, %v1851_v33 }
 0x1c0   : > { %v1852_v25 = vpop.f32.mrf.mxu1 }
 0x1c1   : > { %2012 = vst.msk [vmem:[%s3658_s30 + $0x14] sm:$0xf] %vm2006_vm1, %v1999_v7  ;;  %v1929_v15 = vadd.f32 %v1928_v22, %v1890_v24  ;;  %v1853_v28 = vadd.f32 %v1852_v25, %v3639_v60  ;;  %v1935_v30 = vpop.f32.mrf.mxu3 }
 0x1c3   : > { %v1969_v38 = vpop.f32.mrf.mxu0  ;;  %v1968_v39 = vadd.f32 %v1967_v26, %v1929_v15 }
 0x1c5   : > { %v1988_v19 = vmax.f32 %v1968_v39, 0.0 }
 0x1c6   : > { %v1891_v21 = vpop.f32.mrf.mxu2 }
 0x1c7   : > { %v2000_v20 = vpack.c.bf16 %v1988_v19, %v1988_v19  ;;  %v1892_v40 = vadd.f32 %v1891_v21, %v1853_v28 }
 0x1c8   : > { %v1855_v37 = vpop.f32.mrf.mxu1 }
 0x1c9   : > { %2013 = vst.msk [vmem:[%s3658_s30 + $0x18] sm:$0xf] %vm2006_vm1, %v2000_v20  ;;  %v1931_v45 = vadd.f32 %v1930_v23, %v1892_v40  ;;  %v1856_v47 = vadd.f32 %v1855_v37, %v3642_v0  ;;  %v1938_v2 = vpop.f32.mrf.mxu3 }
 0x1cb   : > { %v1970_v41 = vadd.f32 %v1969_v38, %v1931_v45  ;;  %v1972_v42 = vpop.f32.mrf.mxu0 }
 0x1cd   : > { %v1989_v32 = vmax.f32 %v1970_v41, 0.0 }
 0x1ce   : > { %v1894_v49 = vpop.f32.mrf.mxu2 }
 0x1cf   : > { %v2001_v43 = vpack.c.bf16 %v1989_v32, %v1989_v32  ;;  %v1895_v46 = vadd.f32 %v1894_v49, %v1856_v47 }
 0x1d0   : > { %v1857_v56 = vpop.f32.mrf.mxu1 }
 0x1d1   : > { %2014 = vst.msk [vmem:[%s3658_s30 + $0x1c] sm:$0xf] %vm2006_vm1, %v2001_v43  ;;  %v1934_v60 = vadd.f32 %v1933_v17, %v1895_v46  ;;  %v1858_v54 = vadd.f32 %v1857_v56, %v3645_v44  ;;  %v1940_v3 = vpop.f32.mrf.mxu3 }
 0x1d3   : > { %v1973_v50 = vadd.f32 %v1972_v42, %v1934_v60  ;;  %v1974_v61 = vpop.f32.mrf.mxu0 }
 0x1d5   : > { %v1990_v34 = vmax.f32 %v1973_v50, 0.0 }
 0x1d6   : > { %v1896_v62 = vpop.f32.mrf.mxu2 }
 0x1d7   : > { %v2002_v63 = vpack.c.bf16 %v1990_v34, %v1990_v34  ;;  %v1897_v1 = vadd.f32 %v1896_v62, %v1858_v54 }
 0x1d8   : > { %v1860_v51 = vpop.f32.mrf.mxu1 }
 0x1d9   : > { %2015 = vst.msk [vmem:[%s3658_s30 + $0x20] sm:$0xf] %vm2006_vm1, %v2002_v63  ;;  %v1936_v0 = vadd.f32 %v1935_v30, %v1897_v1  ;;  %v1861_v31 = vadd.f32 %v1860_v51, %v3648_v12 }
 0x1db   : > { %v1975_v14 = vadd.f32 %v1974_v61, %v1936_v0  ;;  %v1977_v52 = vpop.f32.mrf.mxu0 }
 0x1dd   : > { %v1991_v59 = vmax.f32 %v1975_v14, 0.0 }
 0x1de   : > { %v1899_v6 = vpop.f32.mrf.mxu2 }
 0x1df   : > { %v2003_v53 = vpack.c.bf16 %v1991_v59, %v1991_v59  ;;  %v1900_v48 = vadd.f32 %v1899_v6, %v1861_v31 }
 0x1e0   : > { %v1862_v27 = vpop.f32.mrf.mxu1 }
 0x1e1   : > { %2016 = vst.msk [vmem:[%s3658_s30 + $0x24] sm:$0xf] %vm2006_vm1, %v2003_v53  ;;  %v1939_v44 = vadd.f32 %v1938_v2, %v1900_v48  ;;  %v1863_v5 = vadd.f32 %v1862_v27, %v3650_v29 }
 0x1e3   : > { %v1978_v58 = vadd.f32 %v1977_v52, %v1939_v44  ;;  %v1979_v36 = vpop.f32.mrf.mxu0 }
 0x1e5   : > { %v1992_v8 = vmax.f32 %v1978_v58, 0.0 }
 0x1e6   : > { %v1901_v9 = vpop.f32.mrf.mxu2 }
 0x1e7   : > { %v2004_v13 = vpack.c.bf16 %v1992_v8, %v1992_v8  ;;  %v1902_v11 = vadd.f32 %v1901_v9, %v1863_v5 }
 0x1e9   : > { %2017 = vst.msk [vmem:[%s3658_s30 + $0x28] sm:$0xf] %vm2006_vm1, %v2004_v13  ;;  %v1941_v12 = vadd.f32 %v1940_v3, %v1902_v11 }
 0x1eb   : > { %v1980_v22 = vadd.f32 %v1979_v36, %v1941_v12 }
 0x1ed   : > { %v1993_v55 = vmax.f32 %v1980_v22, 0.0 }
 0x1ef   : > { %v2005_v10 = vpack.c.bf16 %v1993_v55, %v1993_v55 }
 0x1f1   : > { %2018 = vst.msk [vmem:[%s3658_s30 + $0x2c] sm:$0xf] %vm2006_vm1, %v2005_v10 }
 0x1f2 PF: > { %s13_s12 = sadd.s32 1, %s3012_s12  }
 0x1f3   : > { %p10_p4 = scmp.ge.s32.totalorder %s13_s12, 4  }
 0x1f5   :  { %12 = sbr.rel (!%p10_p4) target bundleno = 1 (0x1), region = 62 }

// kernel: net_forward.5
= control target key start
LH: loop header
LB: loop body
LE: loop exit
PB: predicated region body
PF: predicated region fallthrough
CT: control target
= control target key end

     0   :  { %s5043_s0 = inlined_call_operand.vmem [shape: bf16[2,1024], index: 0, kind: input, shape index: {}]   ;;  %s5044_s1 = inlined_call_operand.vmem [shape: bf16[1024,384], index: 1, kind: input, shape index: {}]   ;;  %s5045_s2 = inlined_call_operand.vmem [shape: f32[1,384], index: 2, kind: input, shape index: {}]   ;;  %s5046_s3 = inlined_call_operand.vmem [shape: bf16[384,192], index: 3, kind: input, shape index: {}]   ;;  %s5047_s4 = inlined_call_operand.vmem [shape: f32[1,192], index: 4, kind: input, shape index: {}]   ;;  %s5048_s5 = inlined_call_operand.vmem [shape: bf16[192,10], index: 5, kind: input, shape index: {}]   ;;  %s5049_s6 = inlined_call_operand.vmem [shape: f32[1,10], index: 6, kind: input, shape index: {}]   ;;  %s5050_s7 = inlined_call_operand.hbm [shape: f32[2,10], index: 7, kind: output, shape index: {}]  }
   0x1   :  { %v2263_v0 = vld [vmem:[%s5044_s1 + $0xa8] sm:$0xf]  ;;  %v3208_v1 = vld [vmem:[%s5044_s1 + $0xb0] sm:$0xf0]  ;;  %v2251_v11 = vld [vmem:[%s5044_s1 + $0x90] sm:$0xf] }
   0x2   :  { %v2359_v2 = vld [vmem:[%s5044_s1 + $0x168] sm:$0xf]  ;;  %v2264_v3 = vor.u32 %v3208_v1, %v2263_v0  ;;  %v3232_v4 = vld [vmem:[%s5044_s1 + $0x170] sm:$0xf0]  ;;  %v3205_v13 = vld [vmem:[%s5044_s1 + $0x98] sm:$0xf0] }
   0x3   :  { %v2455_v5 = vld [vmem:[%s5044_s1 + $0x228] sm:$0xf]  ;;  %v3256_v6 = vld [vmem:[%s5044_s1 + $0x230] sm:$0xf0]  ;;  %v2360_v7 = vor.u32 %v3232_v4, %v2359_v2  ;;  %v2347_v14 = vld [vmem:[%s5044_s1 + $0x150] sm:$0xf]  ;;  %v2252_v16 = vor.u32 %v3205_v13, %v2251_v11 }
   0x4   :  { %v2456_v8 = vor.u32 %v3256_v6, %v2455_v5  ;;  %v2551_v9 = vld [vmem:[%s5044_s1 + $0x2e8] sm:$0xf]  ;;  %v3280_v10 = vld [vmem:[%s5044_s1 + $0x2f0] sm:$0xf0]  ;;  %1335 = vmatpush.bf16.msra.mxu0 %v2264_v3  ;;  %v3229_v15 = vld [vmem:[%s5044_s1 + $0x158] sm:$0xf0] }
   0x5   :  { %v2552_v12 = vor.u32 %v3280_v10, %v2551_v9  ;;  %1348 = vmatpush.bf16.msra.mxu1 %v2360_v7  ;;  %v2348_v17 = vor.u32 %v3229_v15, %v2347_v14  ;;  %v2443_v18 = vld [vmem:[%s5044_s1 + $0x210] sm:$0xf]  ;;  %v3253_v19 = vld [vmem:[%s5044_s1 + $0x218] sm:$0xf0]  ;;  %v2239_v23 = vld [vmem:[%s5044_s1 + $0x78] sm:$0xf] }
   0x6   :  { %1361 = vmatpush.bf16.msra.mxu2 %v2456_v8  ;;  %v2539_v20 = vld [vmem:[%s5044_s1 + $0x2d0] sm:$0xf]  ;;  %v2444_v21 = vor.u32 %v3253_v19, %v2443_v18  ;;  %v3277_v22 = vld [vmem:[%s5044_s1 + $0x2d8] sm:$0xf0]  ;;  %v3202_v24 = vld [vmem:[%s5044_s1 + $0x80] sm:$0xf0] }
   0x7   :  { %1374 = vmatpush.bf16.msra.mxu3 %v2552_v12  ;;  %v2540_v25 = vor.u32 %v3277_v22, %v2539_v20  ;;  %v2335_v26 = vld [vmem:[%s5044_s1 + $0x138] sm:$0xf]  ;;  %v3226_v27 = vld [vmem:[%s5044_s1 + $0x140] sm:$0xf0]  ;;  %v2240_v29 = vor.u32 %v3202_v24, %v2239_v23  ;;  %v2227_v35 = vld [vmem:[%s5044_s1 + $0x60] sm:$0xf] }
   0x8   :  { %v2431_v28 = vld [vmem:[%s5044_s1 + $0x1f8] sm:$0xf]  ;;  %1336 = vmatpush.bf16.msra.mxu0 %v2252_v16  ;;  %v3250_v30 = vld [vmem:[%s5044_s1 + $0x200] sm:$0xf0]  ;;  %v2336_v33 = vor.u32 %v3226_v27, %v2335_v26  ;;  %v3199_v36 = vld [vmem:[%s5044_s1 + $0x68] sm:$0xf0] }
   0x9   :  { %v2527_v31 = vld [vmem:[%s5044_s1 + $0x2b8] sm:$0xf]  ;;  %v3274_v32 = vld [vmem:[%s5044_s1 + $0x2c0] sm:$0xf0]  ;;  %1349 = vmatpush.bf16.msra.mxu1 %v2348_v17  ;;  %v2432_v34 = vor.u32 %v3250_v30, %v2431_v28  ;;  %v2323_v37 = vld [vmem:[%s5044_s1 + $0x120] sm:$0xf]  ;;  %v2228_v44 = vor.u32 %v3199_v36, %v2227_v35 }
   0xa   :  { %1362 = vmatpush.bf16.msra.mxu2 %v2444_v21  ;;  %v2528_v38 = vor.u32 %v3274_v32, %v2527_v31  ;;  %v3223_v39 = vld [vmem:[%s5044_s1 + $0x128] sm:$0xf0]  ;;  %v2419_v40 = vld [vmem:[%s5044_s1 + $0x1e0] sm:$0xf]  ;;  %v2215_v47 = vld [vmem:[%s5044_s1 + $0x48] sm:$0xf] }
   0xb   :  { %1375 = vmatpush.bf16.msra.mxu3 %v2540_v25  ;;  %v3247_v41 = vld [vmem:[%s5044_s1 + $0x1e8] sm:$0xf0]  ;;  %v2515_v42 = vld [vmem:[%s5044_s1 + $0x2a0] sm:$0xf]  ;;  %v2324_v45 = vor.u32 %v3223_v39, %v2323_v37  ;;  %v3196_v48 = vld [vmem:[%s5044_s1 + $0x50] sm:$0xf0] }
   0xc   :  { %v3271_v43 = vld [vmem:[%s5044_s1 + $0x2a8] sm:$0xf0]  ;;  %1337 = vmatpush.bf16.msra.mxu0 %v2240_v29  ;;  %v2420_v46 = vor.u32 %v3247_v41, %v2419_v40  ;;  %v2311_v49 = vld [vmem:[%s5044_s1 + $0x108] sm:$0xf]  ;;  %v3220_v51 = vld [vmem:[%s5044_s1 + $0x110] sm:$0xf0]  ;;  %v2216_v56 = vor.u32 %v3196_v48, %v2215_v47 }
   0xd   :  { %1350 = vmatpush.bf16.msra.mxu1 %v2336_v33  ;;  %v2516_v50 = vor.u32 %v3271_v43, %v2515_v42  ;;  %v2407_v52 = vld [vmem:[%s5044_s1 + $0x1c8] sm:$0xf]  ;;  %v3244_v53 = vld [vmem:[%s5044_s1 + $0x1d0] sm:$0xf0]  ;;  %v2312_v57 = vor.u32 %v3220_v51, %v2311_v49  ;;  %v2203_v59 = vld [vmem:[%s5044_s1 + $0x30] sm:$0xf] }
   0xe   :  { %1363 = vmatpush.bf16.msra.mxu2 %v2432_v34  ;;  %v2503_v54 = vld [vmem:[%s5044_s1 + $0x288] sm:$0xf]  ;;  %v3268_v55 = vld [vmem:[%s5044_s1 + $0x290] sm:$0xf0]  ;;  %v2408_v58 = vor.u32 %v3244_v53, %v2407_v52  ;;  %v3193_v60 = vld [vmem:[%s5044_s1 + $0x38] sm:$0xf0] }
   0xf   :  { %1376 = vmatpush.bf16.msra.mxu3 %v2528_v38  ;;  %v2299_v61 = vld [vmem:[%s5044_s1 + $0xf0] sm:$0xf]  ;;  %v2504_v62 = vor.u32 %v3268_v55, %v2503_v54  ;;  %v3217_v63 = vld [vmem:[%s5044_s1 + $0xf8] sm:$0xf0]  ;;  %v2204_v4 = vor.u32 %v3193_v60, %v2203_v59  ;;  %v2191_v7 = vld [vmem:[%s5044_s1 + $0x18] sm:$0xf] }
  0x10   :  { %1338 = vmatpush.bf16.msra.mxu0 %v2228_v44  ;;  %v2395_v0 = vld [vmem:[%s5044_s1 + $0x1b0] sm:$0xf]  ;;  %v3241_v1 = vld [vmem:[%s5044_s1 + $0x1b8] sm:$0xf0]  ;;  %v2300_v5 = vor.u32 %v3217_v63, %v2299_v61  ;;  %v3190_v8 = vld [vmem:[%s5044_s1 + $0x20] sm:$0xf0] }
  0x11   :  { %1351 = vmatpush.bf16.msra.mxu1 %v2324_v45  ;;  %v2491_v2 = vld [vmem:[%s5044_s1 + $0x270] sm:$0xf]  ;;  %v3265_v3 = vld [vmem:[%s5044_s1 + $0x278] sm:$0xf0]  ;;  %v2396_v6 = vor.u32 %v3241_v1, %v2395_v0  ;;  %v2287_v9 = vld [vmem:[%s5044_s1 + $0xd8] sm:$0xf]  ;;  %v2192_v16 = vor.u32 %v3190_v8, %v2191_v7 }
  0x12   :  { %1364 = vmatpush.bf16.msra.mxu2 %v2420_v46  ;;  %v2492_v10 = vor.u32 %v3265_v3, %v2491_v2  ;;  %v3214_v11 = vld [vmem:[%s5044_s1 + $0xe0] sm:$0xf0]  ;;  %v2383_v12 = vld [vmem:[%s5044_s1 + $0x198] sm:$0xf]  ;;  %v2179_v17 = vld [vmem:[%s5044_s1] sm:$0xf] }
  0x13   :  { %1377 = vmatpush.bf16.msra.mxu3 %v2516_v50  ;;  %v3238_v13 = vld [vmem:[%s5044_s1 + $0x1a0] sm:$0xf0]  ;;  %v2479_v14 = vld [vmem:[%s5044_s1 + $0x258] sm:$0xf]  ;;  %v3187_v18 = vld [vmem:[%s5044_s1 + $0x8] sm:$0xf0]  ;;  %v2288_v19 = vor.u32 %v3214_v11, %v2287_v9 }
  0x14   :  { %1339 = vmatpush.bf16.msra.mxu0 %v2216_v56  ;;  %v3262_v15 = vld [vmem:[%s5044_s1 + $0x260] sm:$0xf0]  ;;  %v2384_v20 = vor.u32 %v3238_v13, %v2383_v12  ;;  %v2275_v21 = vld [vmem:[%s5044_s1 + $0xc0] sm:$0xf]  ;;  %v3211_v22 = vld [vmem:[%s5044_s1 + $0xc8] sm:$0xf0]  ;;  %v2180_v31 = vor.u32 %v3187_v18, %v2179_v17 }
  0x15   :  { %1352 = vmatpush.bf16.msra.mxu1 %v2312_v57  ;;  %v2371_v23 = vld [vmem:[%s5044_s1 + $0x180] sm:$0xf]  ;;  %v2480_v24 = vor.u32 %v3262_v15, %v2479_v14  ;;  %v3235_v25 = vld [vmem:[%s5044_s1 + $0x188] sm:$0xf0]  ;;  %v2647_v28 = vld [vmem:[%s5044_s1 + $0x3a8] sm:$0xf]  ;;  %v2276_v35 = vor.u32 %v3211_v22, %v2275_v21 }
  0x16   :  { %1365 = vmatpush.bf16.msra.mxu2 %v2408_v58  ;;  %v2467_v26 = vld [vmem:[%s5044_s1 + $0x240] sm:$0xf]  ;;  %v3259_v27 = vld [vmem:[%s5044_s1 + $0x248] sm:$0xf0]  ;;  %v3304_v29 = vld [vmem:[%s5044_s1 + $0x3b0] sm:$0xf0]  ;;  %v2372_v36 = vor.u32 %v3235_v25, %v2371_v23 }
  0x17   :  { %1378 = vmatpush.bf16.msra.mxu3 %v2504_v62  ;;  %v2743_v30 = vld [vmem:[%s5044_s1 + $0x468] sm:$0xf]  ;;  %v3328_v32 = vld [vmem:[%s5044_s1 + $0x470] sm:$0xf0]  ;;  %v2468_v39 = vor.u32 %v3259_v27, %v2467_v26  ;;  %v2648_v40 = vor.u32 %v3304_v29, %v2647_v28  ;;  %v2635_v43 = vld [vmem:[%s5044_s1 + $0x390] sm:$0xf] }
  0x18   :  { %1340 = vmatpush.bf16.msra.mxu0 %v2204_v4  ;;  %v2839_v33 = vld [vmem:[%s5044_s1 + $0x528] sm:$0xf]  ;;  %v3352_v34 = vld [vmem:[%s5044_s1 + $0x530] sm:$0xf0]  ;;  %v2744_v41 = vor.u32 %v3328_v32, %v2743_v30  ;;  %v3301_v44 = vld [vmem:[%s5044_s1 + $0x398] sm:$0xf0] }
  0x19   :  { %1353 = vmatpush.bf16.msra.mxu1 %v2300_v5  ;;  %v2935_v37 = vld [vmem:[%s5044_s1 + $0x5e8] sm:$0xf]  ;;  %v3376_v38 = vld [vmem:[%s5044_s1 + $0x5f0] sm:$0xf0]  ;;  %v2840_v42 = vor.u32 %v3352_v34, %v2839_v33  ;;  %v2731_v45 = vld [vmem:[%s5044_s1 + $0x450] sm:$0xf]  ;;  %v2636_v52 = vor.u32 %v3301_v44, %v2635_v43 }
  0x1a   :  { %1366 = vmatpush.bf16.msra.mxu2 %v2396_v6  ;;  %v2936_v46 = vor.u32 %v3376_v38, %v2935_v37  ;;  %v3325_v47 = vld [vmem:[%s5044_s1 + $0x458] sm:$0xf0]  ;;  %v2827_v48 = vld [vmem:[%s5044_s1 + $0x510] sm:$0xf]  ;;  %v2623_v53 = vld [vmem:[%s5044_s1 + $0x378] sm:$0xf] }
  0x1b   :  { %1379 = vmatpush.bf16.msra.mxu3 %v2492_v10  ;;  %v3349_v49 = vld [vmem:[%s5044_s1 + $0x518] sm:$0xf0]  ;;  %v2923_v50 = vld [vmem:[%s5044_s1 + $0x5d0] sm:$0xf]  ;;  %v3298_v54 = vld [vmem:[%s5044_s1 + $0x380] sm:$0xf0]  ;;  %v2732_v55 = vor.u32 %v3325_v47, %v2731_v45 }
  0x1c   :  { %1341 = vmatpush.bf16.msra.mxu0 %v2192_v16  ;;  %v3373_v51 = vld [vmem:[%s5044_s1 + $0x5d8] sm:$0xf0]  ;;  %v2828_v56 = vor.u32 %v3349_v49, %v2827_v48  ;;  %v2719_v57 = vld [vmem:[%s5044_s1 + $0x438] sm:$0xf]  ;;  %v3322_v58 = vld [vmem:[%s5044_s1 + $0x440] sm:$0xf0]  ;;  %v2624_v1 = vor.u32 %v3298_v54, %v2623_v53 }
  0x1d   :  { %1354 = vmatpush.bf16.msra.mxu1 %v2288_v19  ;;  %v28_v59 = vld [vmem:[%s5043_s0] sm:$0xff]  ;;  %v2924_v60 = vor.u32 %v3373_v51, %v2923_v50  ;;  %v2815_v61 = vld [vmem:[%s5044_s1 + $0x4f8] sm:$0xf]  ;;  %v2720_v2 = vor.u32 %v3322_v58, %v2719_v57  ;;  %v3295_v5 = vld [vmem:[%s5044_s1 + $0x368] sm:$0xf0] }
  0x1e   :  { %1367 = vmatpush.bf16.msra.mxu2 %v2384_v20  ;;  %v3346_v62 = vld [vmem:[%s5044_s1 + $0x500] sm:$0xf0]  ;;  %294 = vst [vmem:[#allocation1] ss:$9 sm:$0xff] %v28_v59  ;;  %v2911_v63 = vld [vmem:[%s5044_s1 + $0x5b8] sm:$0xf] }
  0x1f   :  { %1380 = vmatpush.bf16.msra.mxu3 %v2480_v24  ;;  %v3370_v0 = vld [vmem:[%s5044_s1 + $0x5c0] sm:$0xf0]  ;;  %v2816_v3 = vor.u32 %v3346_v62, %v2815_v61  ;;  %v2611_v4 = vld [vmem:[%s5044_s1 + $0x360] sm:$0xf]  ;;  %v3319_v8 = vld [vmem:[%s5044_s1 + $0x428] sm:$0xf0] }
  0x20   :  { %1342 = vmatpush.bf16.msra.mxu0 %v2180_v31  ;;  %v2707_v6 = vld [vmem:[%s5044_s1 + $0x420] sm:$0xf]  ;;  %v2912_v7 = vor.u32 %v3370_v0, %v2911_v63  ;;  %v3343_v10 = vld [vmem:[%s5044_s1 + $0x4e8] sm:$0xf0]  ;;  %v2599_v13 = vld [vmem:[%s5044_s1 + $0x348] sm:$0xf]  ;;  %v2612_v14 = vor.u32 %v3295_v5, %v2611_v4 }
  0x21   :  { %1355 = vmatpush.bf16.msra.mxu1 %v2276_v35  ;;  %v2803_v9 = vld [vmem:[%s5044_s1 + $0x4e0] sm:$0xf]  ;;  %v3367_v12 = vld [vmem:[%s5044_s1 + $0x5a8] sm:$0xf0]  ;;  %v3292_v15 = vld [vmem:[%s5044_s1 + $0x350] sm:$0xf0]  ;;  %v2708_v18 = vor.u32 %v3319_v8, %v2707_v6 }
  0x22   :  { %1368 = vmatpush.bf16.msra.mxu2 %v2372_v36  ;;  %v2899_v11 = vld [vmem:[%s5044_s1 + $0x5a0] sm:$0xf]  ;;  %v2695_v16 = vld [vmem:[%s5044_s1 + $0x408] sm:$0xf]  ;;  %v3316_v17 = vld [vmem:[%s5044_s1 + $0x410] sm:$0xf0]  ;;  %v2804_v19 = vor.u32 %v3343_v10, %v2803_v9  ;;  %v2600_v29 = vor.u32 %v3292_v15, %v2599_v13 }
  0x23   :  { %1381 = vmatpush.bf16.msra.mxu3 %v2468_v39  ;;  %v2900_v23 = vor.u32 %v3367_v12, %v2899_v11  ;;  %v2791_v24 = vld [vmem:[%s5044_s1 + $0x4c8] sm:$0xf]  ;;  %v3340_v25 = vld [vmem:[%s5044_s1 + $0x4d0] sm:$0xf0]  ;;  %v2696_v30 = vor.u32 %v3316_v17, %v2695_v16  ;;  %v2587_v32 = vld [vmem:[%s5044_s1 + $0x330] sm:$0xf] }
  0x24   :  { %1387 = vmatpush.bf16.msrb.mxu0 %v2648_v40  ;;  %v2887_v27 = vld [vmem:[%s5044_s1 + $0x588] sm:$0xf]  ;;  %v3364_v28 = vld [vmem:[%s5044_s1 + $0x590] sm:$0xf0]  ;;  %v2792_v31 = vor.u32 %v3340_v25, %v2791_v24  ;;  %v3289_v33 = vld [vmem:[%s5044_s1 + $0x338] sm:$0xf0] }
  0x25   :  { %1400 = vmatpush.bf16.msrb.mxu1 %v2744_v41  ;;  %v3816_v20 = vld [vmem:[#allocation1 + $0x12] sm:$0xff]  ;;  %v3818_v21 = vld [vmem:[#allocation1] sm:$0xff]  ;;  %v3829_v26 = vld [vmem:[#allocation1 + $0x9] sm:$0xff]  ;;  %v2888_v35 = vor.u32 %v3364_v28, %v2887_v27  ;;  %v2588_v41 = vor.u32 %v3289_v33, %v2587_v32 }
  0x26   :  { %1413 = vmatpush.bf16.msrb.mxu2 %v2840_v42  ;;  %v3820_v22 = vld [vmem:[#allocation1 + $0x1b] sm:$0xff]  ;;  %1343 = vmatmul.bf16.vlgmr.msra.gmra.mxu0 %v3818_v21  ;;  %v2683_v34 = vld [vmem:[%s5044_s1 + $0x3f0] sm:$0xf]  ;;  %v3286_v45 = vld [vmem:[%s5044_s1 + $0x320] sm:$0xf0] }
  0x27   :  { %1426 = vmatpush.bf16.msrb.mxu3 %v2936_v46  ;;  %1369 = vmatmul.bf16.vlgmr.msra.gmra.mxu2 %v3816_v20  ;;  %v3313_v36 = vld [vmem:[%s5044_s1 + $0x3f8] sm:$0xf0]  ;;  %v2779_v37 = vld [vmem:[%s5044_s1 + $0x4b0] sm:$0xf]  ;;  %v2575_v44 = vld [vmem:[%s5044_s1 + $0x318] sm:$0xf] }
  0x28   :  { %1388 = vmatpush.bf16.msrb.mxu0 %v2636_v52  ;;  %1382 = vmatmul.bf16.vlgmr.msra.gmra.mxu3 %v3820_v22  ;;  %v3337_v38 = vld [vmem:[%s5044_s1 + $0x4b8] sm:$0xf0]  ;;  %v2875_v39 = vld [vmem:[%s5044_s1 + $0x570] sm:$0xf]  ;;  %v2684_v42 = vor.u32 %v3313_v36, %v2683_v34  ;;  %v2671_v46 = vld [vmem:[%s5044_s1 + $0x3d8] sm:$0xf]  ;;  %v2576_v53 = vor.u32 %v3286_v45, %v2575_v44 }
  0x29   :  { %1401 = vmatpush.bf16.msrb.mxu1 %v2732_v55  ;;  %v3361_v40 = vld [vmem:[%s5044_s1 + $0x578] sm:$0xf0]  ;;  %v2780_v43 = vor.u32 %v3337_v38, %v2779_v37  ;;  %v3310_v48 = vld [vmem:[%s5044_s1 + $0x3e0] sm:$0xf0]  ;;  %v2767_v49 = vld [vmem:[%s5044_s1 + $0x498] sm:$0xf] }
  0x2a   :  { %1414 = vmatpush.bf16.msrb.mxu2 %v2828_v56  ;;  %1356 = vmatmul.bf16.vlgmr.msra.gmra.mxu1 %v3829_v26  ;;  %v2876_v47 = vor.u32 %v3361_v40, %v2875_v39  ;;  %v3334_v50 = vld [vmem:[%s5044_s1 + $0x4a0] sm:$0xf0]  ;;  %v2863_v51 = vld [vmem:[%s5044_s1 + $0x558] sm:$0xf]  ;;  %v2563_v54 = vld [vmem:[%s5044_s1 + $0x300] sm:$0xf]  ;;  %v2672_v56 = vor.u32 %v3310_v48, %v2671_v46 }
  0x2b   :  { %1427 = vmatpush.bf16.msrb.mxu3 %v2924_v60  ;;  %v3358_v52 = vld [vmem:[%s5044_s1 + $0x560] sm:$0xf0]  ;;  %v3283_v55 = vld [vmem:[%s5044_s1 + $0x308] sm:$0xf0]  ;;  %v2768_v57 = vor.u32 %v3334_v50, %v2767_v49  ;;  %v2659_v58 = vld [vmem:[%s5044_s1 + $0x3c0] sm:$0xf] }
  0x2c   :  { %1389 = vmatpush.bf16.msrb.mxu0 %v2624_v1  ;;  %v3307_v59 = vld [vmem:[%s5044_s1 + $0x3c8] sm:$0xf0]  ;;  %v2755_v60 = vld [vmem:[%s5044_s1 + $0x480] sm:$0xf]  ;;  %v2864_v61 = vor.u32 %v3358_v52, %v2863_v51  ;;  %v2564_v4 = vor.u32 %v3283_v55, %v2563_v54  ;;  %v2361_v5 = vld [vmem:[%s5044_s1 + $0x174] sm:$0xf0] }
  0x2d   :  { %1402 = vmatpush.bf16.msrb.mxu1 %v2720_v2  ;;  %v3331_v62 = vld [vmem:[%s5044_s1 + $0x488] sm:$0xf0]  ;;  %v2851_v63 = vld [vmem:[%s5044_s1 + $0x540] sm:$0xf]  ;;  %v2265_v2 = vld [vmem:[%s5044_s1 + $0xb4] sm:$0xf0]  ;;  %v2660_v8 = vor.u32 %v3307_v59, %v2659_v58 }
  0x2e   :  { %1415 = vmatpush.bf16.msrb.mxu2 %v2816_v3  ;;  %v3355_v0 = vld [vmem:[%s5044_s1 + $0x548] sm:$0xf0]  ;;  %v2756_v9 = vor.u32 %v3331_v62, %v2755_v60  ;;  %v2553_v11 = vld [vmem:[%s5044_s1 + $0x2f4] sm:$0xf0]  ;;  %v3204_v16 = vld [vmem:[%s5044_s1 + $0x94] sm:$0xf] }
  0x2f   :  { %1428 = vmatpush.bf16.msrb.mxu3 %v2912_v7  ;;  %v3207_v1 = vld [vmem:[%s5044_s1 + $0xac] sm:$0xf]  ;;  %v2457_v7 = vld [vmem:[%s5044_s1 + $0x234] sm:$0xf0]  ;;  %v2852_v12 = vor.u32 %v3355_v0, %v2851_v63  ;;  %v2253_v17 = vld [vmem:[%s5044_s1 + $0x9c] sm:$0xf0] }
  0x30   :  { %1390 = vmatpush.bf16.msrb.mxu0 %v2612_v14  ;;  %v3231_v3 = vld [vmem:[%s5044_s1 + $0x16c] sm:$0xf]  ;;  %v2268_v13 = vor.u32 %v3207_v1, %v2265_v2  ;;  %v3252_v24 = vld [vmem:[%s5044_s1 + $0x214] sm:$0xf]  ;;  %v2445_v25 = vld [vmem:[%s5044_s1 + $0x21c] sm:$0xf0] }
  0x31   :  { %1403 = vmatpush.bf16.msrb.mxu1 %v2708_v18  ;;  %v3255_v6 = vld [vmem:[%s5044_s1 + $0x22c] sm:$0xf]  ;;  %v2364_v14 = vor.u32 %v3231_v3, %v2361_v5  ;;  %v3228_v18 = vld [vmem:[%s5044_s1 + $0x154] sm:$0xf]  ;;  %v2541_v28 = vld [vmem:[%s5044_s1 + $0x2dc] sm:$0xf0] }
  0x32   :  { %1416 = vmatpush.bf16.msrb.mxu2 %v2804_v19  ;;  %v3279_v10 = vld [vmem:[%s5044_s1 + $0x2ec] sm:$0xf]  ;;  %v2460_v15 = vor.u32 %v3255_v6, %v2457_v7  ;;  %v3276_v27 = vld [vmem:[%s5044_s1 + $0x2d4] sm:$0xf]  ;;  %v3965_v32 = vld [vmem:[#allocation1 + $0x24] sm:$0xff] }
  0x33   :  { %1429 = vmatpush.bf16.msrb.mxu3 %v2900_v23  ;;  %v2556_v19 = vor.u32 %v3279_v10, %v2553_v11  ;;  %v2349_v23 = vld [vmem:[%s5044_s1 + $0x15c] sm:$0xf0]  ;;  %v2241_v36 = vld [vmem:[%s5044_s1 + $0x84] sm:$0xf0]  ;;  %v3225_v37 = vld [vmem:[%s5044_s1 + $0x13c] sm:$0xf]  ;;  %v2544_v39 = vor.u32 %v3276_v27, %v2541_v28 }
  0x34   :  { %1391 = vmatpush.bf16.msrb.mxu0 %v2600_v29  ;;  %v3960_v29 = vld [vmem:[#allocation1 + $0x36] sm:$0xff]  ;;  %v3967_v33 = vld [vmem:[#allocation1 + $0x3f] sm:$0xff]  ;;  %v2352_v34 = vor.u32 %v3228_v18, %v2349_v23  ;;  %v3975_v38 = vld [vmem:[#allocation1 + $0x2d] sm:$0xff] }
  0x35   :  { %1404 = vmatpush.bf16.msrb.mxu1 %v2696_v30  ;;  %v2256_v30 = vor.u32 %v3204_v16, %v2253_v17  ;;  %v2337_v40 = vld [vmem:[%s5044_s1 + $0x144] sm:$0xf0]  ;;  %v3198_v48 = vld [vmem:[%s5044_s1 + $0x64] sm:$0xf]  ;;  %v2229_v49 = vld [vmem:[%s5044_s1 + $0x6c] sm:$0xf0] }
  0x36   :  { %1417 = vmatpush.bf16.msrb.mxu2 %v2792_v31  ;;  %v3201_v31 = vld [vmem:[%s5044_s1 + $0x7c] sm:$0xf]  ;;  %v2529_v44 = vld [vmem:[%s5044_s1 + $0x2c4] sm:$0xf0]  ;;  %v2340_v46 = vor.u32 %v3225_v37, %v2337_v40  ;;  %v3222_v50 = vld [vmem:[%s5044_s1 + $0x124] sm:$0xf] }
  0x37   :  { %1430 = vmatpush.bf16.msrb.mxu3 %v2888_v35  ;;  %v2448_v35 = vor.u32 %v3252_v24, %v2445_v25  ;;  %v2244_v45 = vor.u32 %v3201_v31, %v2241_v36  ;;  %v2325_v52 = vld [vmem:[%s5044_s1 + $0x12c] sm:$0xf0]  ;;  %v3270_v55 = vld [vmem:[%s5044_s1 + $0x2a4] sm:$0xf]  ;;  %v3195_v60 = vld [vmem:[%s5044_s1 + $0x4c] sm:$0xf] }
  0x38   :  { %1392 = vmatpush.bf16.msrb.mxu0 %v2588_v41  ;;  %v3249_v41 = vld [vmem:[%s5044_s1 + $0x1fc] sm:$0xf]  ;;  %v2421_v54 = vld [vmem:[%s5044_s1 + $0x1ec] sm:$0xf0]  ;;  %v2328_v58 = vor.u32 %v3222_v50, %v2325_v52  ;;  %v3219_v62 = vld [vmem:[%s5044_s1 + $0x10c] sm:$0xf] }
  0x39   :  { %1405 = vmatpush.bf16.msrb.mxu1 %v2684_v42  ;;  %v2433_v42 = vld [vmem:[%s5044_s1 + $0x204] sm:$0xf0]  ;;  %v2313_v0 = vld [vmem:[%s5044_s1 + $0x114] sm:$0xf0]  ;;  %v3243_v1 = vld [vmem:[%s5044_s1 + $0x1cc] sm:$0xf] }
  0x3a   :  { %1418 = vmatpush.bf16.msrb.mxu2 %v2780_v43  ;;  %v3273_v43 = vld [vmem:[%s5044_s1 + $0x2bc] sm:$0xf]  ;;  %v2409_v2 = vld [vmem:[%s5044_s1 + $0x1d4] sm:$0xf0]  ;;  %v3267_v3 = vld [vmem:[%s5044_s1 + $0x28c] sm:$0xf]  ;;  %v2316_v6 = vor.u32 %v3219_v62, %v2313_v0 }
  0x3b   :  { %1431 = vmatpush.bf16.msrb.mxu3 %v2876_v47  ;;  %v2436_v47 = vor.u32 %v3249_v41, %v2433_v42  ;;  %v2532_v51 = vor.u32 %v3273_v43, %v2529_v44  ;;  %v2412_v7 = vor.u32 %v3243_v1, %v2409_v2  ;;  %v3216_v10 = vld [vmem:[%s5044_s1 + $0xf4] sm:$0xf]  ;;  %v2493_v16 = vld [vmem:[%s5044_s1 + $0x27c] sm:$0xf0]  ;;  %v3189_v23 = vld [vmem:[%s5044_s1 + $0x1c] sm:$0xf] }
  0x3c   :  { %1393 = vmatpush.bf16.msrb.mxu0 %v2576_v53  ;;  %v3246_v53 = vld [vmem:[%s5044_s1 + $0x1e4] sm:$0xf]  ;;  %v2193_v24 = vld [vmem:[%s5044_s1 + $0x24] sm:$0xf0]  ;;  %v3213_v25 = vld [vmem:[%s5044_s1 + $0xdc] sm:$0xf] }
  0x3d   :  { %1406 = vmatpush.bf16.msrb.mxu1 %v2672_v56  ;;  %v2517_v56 = vld [vmem:[%s5044_s1 + $0x2ac] sm:$0xf0]  ;;  %v2424_v59 = vor.u32 %v3246_v53, %v2421_v54  ;;  %v2289_v28 = vld [vmem:[%s5044_s1 + $0xe4] sm:$0xf0]  ;;  %v3186_v36 = vld [vmem:[%s5044_s1 + $0x4] sm:$0xf]  ;;  %v2196_v37 = vor.u32 %v3189_v23, %v2193_v24 }
  0x3e   :  { %1419 = vmatpush.bf16.msrb.mxu2 %v2768_v57  ;;  %v2232_v57 = vor.u32 %v3198_v48, %v2229_v49  ;;  %v2520_v63 = vor.u32 %v3270_v55, %v2517_v56  ;;  %v2385_v31 = vld [vmem:[%s5044_s1 + $0x1a4] sm:$0xf0]  ;;  %v3210_v40 = vld [vmem:[%s5044_s1 + $0xc4] sm:$0xf]  ;;  %v2277_v41 = vld [vmem:[%s5044_s1 + $0xcc] sm:$0xf0]  ;;  %v2292_v42 = vor.u32 %v3213_v25, %v2289_v28 }
  0x3f   :  { %1432 = vmatpush.bf16.msrb.mxu3 %v2864_v61  ;;  %v2217_v61 = vld [vmem:[%s5044_s1 + $0x54] sm:$0xf0]  ;;  %v3234_v44 = vld [vmem:[%s5044_s1 + $0x184] sm:$0xf]  ;;  %v2469_v48 = vld [vmem:[%s5044_s1 + $0x24c] sm:$0xf0] }
  0x40   :  { %1394 = vmatpush.bf16.msrb.mxu0 %v2564_v4  ;;  %v2505_v4 = vld [vmem:[%s5044_s1 + $0x294] sm:$0xf0]  ;;  %v2220_v5 = vor.u32 %v3195_v60, %v2217_v61  ;;  %v3303_v49 = vld [vmem:[%s5044_s1 + $0x3ac] sm:$0xf] }
  0x41   :  { %1407 = vmatpush.bf16.msrb.mxu1 %v2660_v8  ;;  %v3192_v8 = vld [vmem:[%s5044_s1 + $0x34] sm:$0xf]  ;;  %v2508_v11 = vor.u32 %v3267_v3, %v2505_v4  ;;  %v2649_v50 = vld [vmem:[%s5044_s1 + $0x3b4] sm:$0xf0] }
  0x42   :  { %1420 = vmatpush.bf16.msrb.mxu2 %v2756_v9  ;;  %v2205_v9 = vld [vmem:[%s5044_s1 + $0x3c] sm:$0xf0] }
  0x43   :  { %1433 = vmatpush.bf16.msrb.mxu3 %v2852_v12  ;;  %1395 = vmatmul.bf16.vlgmr.msrb.gmra.mxu0 %v3965_v32  ;;  %v2301_v12 = vld [vmem:[%s5044_s1 + $0xfc] sm:$0xf0]  ;;  %v2208_v17 = vor.u32 %v3192_v8, %v2205_v9 }
  0x44   :  { %1439 = vmatpush.bf16.msra.mxu0 %v2268_v13  ;;  %1408 = vmatmul.bf16.vlgmr.msrb.gmra.mxu1 %v3975_v38  ;;  %v3240_v13 = vld [vmem:[%s5044_s1 + $0x1b4] sm:$0xf]  ;;  %v2304_v18 = vor.u32 %v3216_v10, %v2301_v12 }
  0x45   :  { %1452 = vmatpush.bf16.msra.mxu1 %v2364_v14  ;;  %1421 = vmatmul.bf16.vlgmr.msrb.gmra.mxu2 %v3960_v29  ;;  %v2397_v14 = vld [vmem:[%s5044_s1 + $0x1bc] sm:$0xf0] }
  0x46   :  { %1465 = vmatpush.bf16.msra.mxu2 %v2460_v15  ;;  %1434 = vmatmul.bf16.vlgmr.msrb.gmra.mxu3 %v3967_v33  ;;  %v3264_v15 = vld [vmem:[%s5044_s1 + $0x274] sm:$0xf] }
  0x47   :  { %1478 = vmatpush.bf16.msra.mxu3 %v2556_v19  ;;  %v2400_v19 = vor.u32 %v3240_v13, %v2397_v14  ;;  %v2496_v27 = vor.u32 %v3264_v15, %v2493_v16 }
  0x48   :  { %1440 = vmatpush.bf16.msra.mxu0 %v2256_v30  ;;  %v3237_v30 = vld [vmem:[%s5044_s1 + $0x19c] sm:$0xf] }
  0x49   :  { %1453 = vmatpush.bf16.msra.mxu1 %v2352_v34  ;;  %v3261_v34 = vld [vmem:[%s5044_s1 + $0x25c] sm:$0xf]  ;;  %v2388_v43 = vor.u32 %v3237_v30, %v2385_v31 }
  0x4a   :  { %1466 = vmatpush.bf16.msra.mxu2 %v2448_v35  ;;  %v2481_v35 = vld [vmem:[%s5044_s1 + $0x264] sm:$0xf0] }
  0x4b   :  { %1479 = vmatpush.bf16.msra.mxu3 %v2544_v39  ;;  %v2181_v39 = vld [vmem:[%s5044_s1 + $0xc] sm:$0xf0] }
  0x4c   :  { %1441 = vmatpush.bf16.msra.mxu0 %v2244_v45  ;;  %v2373_v45 = vld [vmem:[%s5044_s1 + $0x18c] sm:$0xf0] }
  0x4d   :  { %1454 = vmatpush.bf16.msra.mxu1 %v2340_v46  ;;  %v3258_v46 = vld [vmem:[%s5044_s1 + $0x244] sm:$0xf] }
  0x4e   :  { %1467 = vmatpush.bf16.msra.mxu2 %v2436_v47  ;;  %v2484_v47 = vor.u32 %v3261_v34, %v2481_v35 }
  0x4f   :  { %1480 = vmatpush.bf16.msra.mxu3 %v2532_v51  ;;  %v3327_v51 = vld [vmem:[%s5044_s1 + $0x46c] sm:$0xf] }
  0x50   :  { %1442 = vmatpush.bf16.msra.mxu0 %v2232_v57 }
  0x51   :  { %1455 = vmatpush.bf16.msra.mxu1 %v2328_v58 }
  0x52   :  { %1468 = vmatpush.bf16.msra.mxu2 %v2424_v59 }
  0x53   :  { %1481 = vmatpush.bf16.msra.mxu3 %v2520_v63 }
  0x54   :  { %1443 = vmatpush.bf16.msra.mxu0 %v2220_v5 }
  0x55   :  { %1456 = vmatpush.bf16.msra.mxu1 %v2316_v6 }
  0x56   :  { %1469 = vmatpush.bf16.msra.mxu2 %v2412_v7 }
  0x57   :  { %1482 = vmatpush.bf16.msra.mxu3 %v2508_v11 }
  0x58   :  { %1444 = vmatpush.bf16.msra.mxu0 %v2208_v17 }
  0x59   :  { %1457 = vmatpush.bf16.msra.mxu1 %v2304_v18 }
  0x5a   :  { %1470 = vmatpush.bf16.msra.mxu2 %v2400_v19 }
  0x5b   :  { %1483 = vmatpush.bf16.msra.mxu3 %v2496_v27 }
  0x5c   :  { %12 = vsyncpa [#allocation3], 0  ;;  %1445 = vmatpush.bf16.msra.mxu0 %v2196_v37  ;;  %v2184_v52 = vor.u32 %v3186_v36, %v2181_v39  ;;  %v2745_v53 = vld [vmem:[%s5044_s1 + $0x474] sm:$0xf0]  ;;  %v3351_v54 = vld [vmem:[%s5044_s1 + $0x52c] sm:$0xf]  ;;  %v2280_v56 = vor.u32 %v3210_v40, %v2277_v41  ;;  %v2376_v57 = vor.u32 %v3234_v44, %v2373_v45  ;;  %v2472_v60 = vor.u32 %v3258_v46, %v2469_v48 }
  0x5d   :  { %v2841_v55 = vld [vmem:[%s5044_s1 + $0x534] sm:$0xf0]  ;;  %1458 = vmatpush.bf16.msra.mxu1 %v2292_v42  ;;  %v3375_v58 = vld [vmem:[%s5044_s1 + $0x5ec] sm:$0xf]  ;;  %v2652_v61 = vor.u32 %v3303_v49, %v2649_v50  ;;  %v2748_v62 = vor.u32 %v3327_v51, %v2745_v53  ;;  %v3300_v0 = vld [vmem:[%s5044_s1 + $0x394] sm:$0xf] }
  0x5e   :  { %1471 = vmatpush.bf16.msra.mxu2 %v2388_v43  ;;  %v2937_v59 = vld [vmem:[%s5044_s1 + $0x5f4] sm:$0xf0]  ;;  %v2844_v63 = vor.u32 %v3351_v54, %v2841_v55  ;;  %v2637_v1 = vld [vmem:[%s5044_s1 + $0x39c] sm:$0xf0]  ;;  %v3324_v2 = vld [vmem:[%s5044_s1 + $0x454] sm:$0xf] }
  0x5f   :  { %1484 = vmatpush.bf16.msra.mxu3 %v2484_v47  ;;  %v2940_v3 = vor.u32 %v3375_v58, %v2937_v59  ;;  %v2733_v4 = vld [vmem:[%s5044_s1 + $0x45c] sm:$0xf0]  ;;  %v3348_v5 = vld [vmem:[%s5044_s1 + $0x514] sm:$0xf]  ;;  %v2640_v9 = vor.u32 %v3300_v0, %v2637_v1  ;;  %v3297_v12 = vld [vmem:[%s5044_s1 + $0x37c] sm:$0xf] }
  0x60   :  { %1446 = vmatpush.bf16.msra.mxu0 %v2184_v52  ;;  %v2829_v6 = vld [vmem:[%s5044_s1 + $0x51c] sm:$0xf0]  ;;  %v3372_v7 = vld [vmem:[%s5044_s1 + $0x5d4] sm:$0xf]  ;;  %v2736_v10 = vor.u32 %v3324_v2, %v2733_v4  ;;  %v2625_v13 = vld [vmem:[%s5044_s1 + $0x384] sm:$0xf0] }
  0x61   :  { %1459 = vmatpush.bf16.msra.mxu1 %v2280_v56  ;;  %v2925_v8 = vld [vmem:[%s5044_s1 + $0x5dc] sm:$0xf0]  ;;  %v2832_v11 = vor.u32 %v3348_v5, %v2829_v6  ;;  %v3321_v14 = vld [vmem:[%s5044_s1 + $0x43c] sm:$0xf]  ;;  %v2721_v16 = vld [vmem:[%s5044_s1 + $0x444] sm:$0xf0]  ;;  %v2628_v24 = vor.u32 %v3297_v12, %v2625_v13 }
  0x62   :  { %1472 = vmatpush.bf16.msra.mxu2 %v2376_v57  ;;  %v2928_v15 = vor.u32 %v3372_v7, %v2925_v8  ;;  %v3345_v17 = vld [vmem:[%s5044_s1 + $0x4fc] sm:$0xf]  ;;  %v2817_v18 = vld [vmem:[%s5044_s1 + $0x504] sm:$0xf0]  ;;  %v2724_v25 = vor.u32 %v3321_v14, %v2721_v16  ;;  %v3294_v28 = vld [vmem:[%s5044_s1 + $0x364] sm:$0xf] }
  0x63   :  { %1485 = vmatpush.bf16.msra.mxu3 %v2472_v60  ;;  %v3369_v19 = vld [vmem:[%s5044_s1 + $0x5bc] sm:$0xf]  ;;  %v2913_v23 = vld [vmem:[%s5044_s1 + $0x5c4] sm:$0xf0]  ;;  %1447 = vmatmul.bf16.vlgmr.msra.gmra.mxu0 %v3818_v21  ;;  %v2820_v27 = vor.u32 %v3345_v17, %v2817_v18  ;;  %v2613_v30 = vld [vmem:[%s5044_s1 + $0x36c] sm:$0xf0] }
  0x64   :  { %1491 = vmatpush.bf16.msrb.mxu0 %v2652_v61  ;;  %1460 = vmatmul.bf16.vlgmr.msra.gmra.mxu1 %v3829_v26  ;;  %v3318_v21 = vld [vmem:[%s5044_s1 + $0x424] sm:$0xf]  ;;  %v2709_v31 = vld [vmem:[%s5044_s1 + $0x42c] sm:$0xf0]  ;;  %v2616_v39 = vor.u32 %v3294_v28, %v2613_v30  ;;  %v3291_v42 = vld [vmem:[%s5044_s1 + $0x34c] sm:$0xf] }
  0x65   :  { %1504 = vmatpush.bf16.msrb.mxu1 %v2748_v62  ;;  %1473 = vmatmul.bf16.vlgmr.msra.gmra.mxu2 %v3816_v20  ;;  %v3342_v34 = vld [vmem:[%s5044_s1 + $0x4e4] sm:$0xf]  ;;  %v2805_v35 = vld [vmem:[%s5044_s1 + $0x4ec] sm:$0xf0]  ;;  %v2712_v40 = vor.u32 %v3318_v21, %v2709_v31  ;;  %v2601_v43 = vld [vmem:[%s5044_s1 + $0x354] sm:$0xf0] }
  0x66   :  { %1517 = vmatpush.bf16.msrb.mxu2 %v2844_v63  ;;  %1486 = vmatmul.bf16.vlgmr.msra.gmra.mxu3 %v3820_v22  ;;  %v2916_v22 = vor.u32 %v3369_v19, %v2913_v23  ;;  %v3366_v36 = vld [vmem:[%s5044_s1 + $0x5a4] sm:$0xf]  ;;  %v2901_v37 = vld [vmem:[%s5044_s1 + $0x5ac] sm:$0xf0]  ;;  %v2808_v41 = vor.u32 %v3342_v34, %v2805_v35  ;;  %v3315_v44 = vld [vmem:[%s5044_s1 + $0x40c] sm:$0xf]  ;;  %v2604_v51 = vor.u32 %v3291_v42, %v2601_v43 }
  0x67   :  { %1530 = vmatpush.bf16.msrb.mxu3 %v2940_v3  ;;  %v2904_v45 = vor.u32 %v3366_v36, %v2901_v37  ;;  %v2697_v46 = vld [vmem:[%s5044_s1 + $0x414] sm:$0xf0]  ;;  %v3339_v47 = vld [vmem:[%s5044_s1 + $0x4cc] sm:$0xf]  ;;  %v3288_v54 = vld [vmem:[%s5044_s1 + $0x334] sm:$0xf] }
  0x68   :  { %1492 = vmatpush.bf16.msrb.mxu0 %v2640_v9  ;;  %v2793_v48 = vld [vmem:[%s5044_s1 + $0x4d4] sm:$0xf0]  ;;  %v3363_v49 = vld [vmem:[%s5044_s1 + $0x58c] sm:$0xf]  ;;  %v2700_v52 = vor.u32 %v3315_v44, %v2697_v46  ;;  %v2589_v55 = vld [vmem:[%s5044_s1 + $0x33c] sm:$0xf0] }
  0x69   :  { %1505 = vmatpush.bf16.msrb.mxu1 %v2736_v10  ;;  %v2889_v50 = vld [vmem:[%s5044_s1 + $0x594] sm:$0xf0]  ;;  %v2796_v53 = vor.u32 %v3339_v47, %v2793_v48  ;;  %v3312_v56 = vld [vmem:[%s5044_s1 + $0x3f4] sm:$0xf]  ;;  %v2685_v58 = vld [vmem:[%s5044_s1 + $0x3fc] sm:$0xf0]  ;;  %v2592_v63 = vor.u32 %v3288_v54, %v2589_v55 }
  0x6a   :  { %1518 = vmatpush.bf16.msrb.mxu2 %v2832_v11  ;;  %v2892_v57 = vor.u32 %v3363_v49, %v2889_v50  ;;  %v3336_v59 = vld [vmem:[%s5044_s1 + $0x4b4] sm:$0xf]  ;;  %v2781_v60 = vld [vmem:[%s5044_s1 + $0x4bc] sm:$0xf0]  ;;  %v2688_v0 = vor.u32 %v3312_v56, %v2685_v58  ;;  %v3285_v2 = vld [vmem:[%s5044_s1 + $0x31c] sm:$0xf] }
  0x6b   :  { %1531 = vmatpush.bf16.msrb.mxu3 %v2928_v15  ;;  %v3360_v61 = vld [vmem:[%s5044_s1 + $0x574] sm:$0xf]  ;;  %v2877_v62 = vld [vmem:[%s5044_s1 + $0x57c] sm:$0xf0]  ;;  %v2784_v1 = vor.u32 %v3336_v59, %v2781_v60  ;;  %v2577_v3 = vld [vmem:[%s5044_s1 + $0x324] sm:$0xf0] }
  0x6c   :  { %1493 = vmatpush.bf16.msrb.mxu0 %v2628_v24  ;;  %v3309_v4 = vld [vmem:[%s5044_s1 + $0x3dc] sm:$0xf]  ;;  %v2880_v5 = vor.u32 %v3360_v61, %v2877_v62  ;;  %v2673_v6 = vld [vmem:[%s5044_s1 + $0x3e4] sm:$0xf0]  ;;  %v2580_v11 = vor.u32 %v3285_v2, %v2577_v3  ;;  %v3282_v12 = vld [vmem:[%s5044_s1 + $0x304] sm:$0xf] }
  0x6d   :  { %1506 = vmatpush.bf16.msrb.mxu1 %v2724_v25  ;;  %v3333_v7 = vld [vmem:[%s5044_s1 + $0x49c] sm:$0xf]  ;;  %v2769_v8 = vld [vmem:[%s5044_s1 + $0x4a4] sm:$0xf0]  ;;  %v2565_v13 = vld [vmem:[%s5044_s1 + $0x30c] sm:$0xf0]  ;;  %v2676_v14 = vor.u32 %v3309_v4, %v2673_v6 }
  0x6e   :  { %1519 = vmatpush.bf16.msrb.mxu2 %v2820_v27  ;;  %v3357_v9 = vld [vmem:[%s5044_s1 + $0x55c] sm:$0xf]  ;;  %v2865_v10 = vld [vmem:[%s5044_s1 + $0x564] sm:$0xf0]  ;;  %v2772_v15 = vor.u32 %v3333_v7, %v2769_v8  ;;  %v3306_v16 = vld [vmem:[%s5044_s1 + $0x3c4] sm:$0xf]  ;;  %v2568_v21 = vor.u32 %v3282_v12, %v2565_v13 }
  0x6f   :  { %1532 = vmatpush.bf16.msrb.mxu3 %v2916_v22  ;;  %v2661_v17 = vld [vmem:[%s5044_s1 + $0x3cc] sm:$0xf0]  ;;  %v3330_v18 = vld [vmem:[%s5044_s1 + $0x484] sm:$0xf]  ;;  %v2868_v19 = vor.u32 %v3357_v9, %v2865_v10  ;;  %v3209_v28 = vld [vmem:[%s5044_s1 + $0xb8] sm:$0xf0] }
  0x70   :  { %1494 = vmatpush.bf16.msrb.mxu0 %v2616_v39  ;;  %v2757_v23 = vld [vmem:[%s5044_s1 + $0x48c] sm:$0xf0]  ;;  %v3354_v24 = vld [vmem:[%s5044_s1 + $0x544] sm:$0xf]  ;;  %v3233_v22 = vld [vmem:[%s5044_s1 + $0x178] sm:$0xf0]  ;;  %v2664_v35 = vor.u32 %v3306_v16, %v2661_v17 }
  0x71   :  { %1507 = vmatpush.bf16.msrb.mxu1 %v2712_v40  ;;  %v2853_v25 = vld [vmem:[%s5044_s1 + $0x54c] sm:$0xf0]  ;;  %v3257_v34 = vld [vmem:[%s5044_s1 + $0x238] sm:$0xf0]  ;;  %v2760_v36 = vor.u32 %v3330_v18, %v2757_v23  ;;  %v2259_v44 = vld [vmem:[%s5044_s1 + $0x98] sm:$0xf] }
  0x72   :  { %1520 = vmatpush.bf16.msrb.mxu2 %v2808_v41  ;;  %v2271_v27 = vld [vmem:[%s5044_s1 + $0xb0] sm:$0xf]  ;;  %v3281_v39 = vld [vmem:[%s5044_s1 + $0x2f8] sm:$0xf0]  ;;  %v2856_v40 = vor.u32 %v3354_v24, %v2853_v25  ;;  %v2355_v46 = vld [vmem:[%s5044_s1 + $0x158] sm:$0xf] }
  0x73   :  { %1533 = vmatpush.bf16.msrb.mxu3 %v2904_v45  ;;  %v2367_v30 = vld [vmem:[%s5044_s1 + $0x170] sm:$0xf]  ;;  %v2272_v41 = vor.u32 %v3209_v28, %v2271_v27  ;;  %v3206_v45 = vld [vmem:[%s5044_s1 + $0xa0] sm:$0xf0]  ;;  %v2451_v49 = vld [vmem:[%s5044_s1 + $0x218] sm:$0xf] }
  0x74   :  { %1495 = vmatpush.bf16.msrb.mxu0 %v2604_v51  ;;  %v2463_v31 = vld [vmem:[%s5044_s1 + $0x230] sm:$0xf]  ;;  %v2368_v42 = vor.u32 %v3233_v22, %v2367_v30  ;;  %v3230_v48 = vld [vmem:[%s5044_s1 + $0x160] sm:$0xf0]  ;;  %v2547_v51 = vld [vmem:[%s5044_s1 + $0x2d8] sm:$0xf] }
  0x75   :  { %1508 = vmatpush.bf16.msrb.mxu1 %v2700_v52  ;;  %v2559_v37 = vld [vmem:[%s5044_s1 + $0x2f0] sm:$0xf]  ;;  %v2464_v43 = vor.u32 %v3257_v34, %v2463_v31  ;;  %v3254_v50 = vld [vmem:[%s5044_s1 + $0x220] sm:$0xf0]  ;;  %v2356_v54 = vor.u32 %v3230_v48, %v2355_v46  ;;  %v2247_v56 = vld [vmem:[%s5044_s1 + $0x80] sm:$0xf] }
  0x76   :  { %1521 = vmatpush.bf16.msrb.mxu2 %v2796_v53  ;;  %v2560_v47 = vor.u32 %v3281_v39, %v2559_v37  ;;  %v3278_v52 = vld [vmem:[%s5044_s1 + $0x2e0] sm:$0xf0]  ;;  %v2260_v53 = vor.u32 %v3206_v45, %v2259_v44  ;;  %v2452_v55 = vor.u32 %v3254_v50, %v2451_v49  ;;  %v2343_v58 = vld [vmem:[%s5044_s1 + $0x140] sm:$0xf]  ;;  %v3227_v60 = vld [vmem:[%s5044_s1 + $0x148] sm:$0xf0] }
  0x77   :  { %1534 = vmatpush.bf16.msrb.mxu3 %v2892_v57  ;;  %v3203_v57 = vld [vmem:[%s5044_s1 + $0x88] sm:$0xf0]  ;;  %v2548_v59 = vor.u32 %v3278_v52, %v2547_v51  ;;  %v2439_v61 = vld [vmem:[%s5044_s1 + $0x200] sm:$0xf]  ;;  %v2331_v3 = vld [vmem:[%s5044_s1 + $0x128] sm:$0xf] }
  0x78   :  { %1496 = vmatpush.bf16.msrb.mxu0 %v2592_v63  ;;  %v3251_v62 = vld [vmem:[%s5044_s1 + $0x208] sm:$0xf0]  ;;  %v3248_v6 = vld [vmem:[%s5044_s1 + $0x1f0] sm:$0xf0]  ;;  %v2523_v7 = vld [vmem:[%s5044_s1 + $0x2a8] sm:$0xf] }
  0x79   :  { %1509 = vmatpush.bf16.msrb.mxu1 %v2688_v0  ;;  %v3275_v63 = vld [vmem:[%s5044_s1 + $0x2c8] sm:$0xf0]  ;;  %v2248_v0 = vor.u32 %v3203_v57, %v2247_v56  ;;  %v2440_v2 = vor.u32 %v3251_v62, %v2439_v61  ;;  %v3272_v8 = vld [vmem:[%s5044_s1 + $0x2b0] sm:$0xf0]  ;;  %v2223_v12 = vld [vmem:[%s5044_s1 + $0x50] sm:$0xf] }
  0x7a   :  { %1522 = vmatpush.bf16.msrb.mxu2 %v2784_v1  ;;  %v2344_v1 = vor.u32 %v3227_v60, %v2343_v58  ;;  %v3197_v13 = vld [vmem:[%s5044_s1 + $0x58] sm:$0xf0]  ;;  %v2415_v17 = vld [vmem:[%s5044_s1 + $0x1d0] sm:$0xf]  ;;  %v2211_v28 = vld [vmem:[%s5044_s1 + $0x38] sm:$0xf] }
  0x7b   :  { %1535 = vmatpush.bf16.msrb.mxu3 %v2880_v5  ;;  %v2427_v5 = vld [vmem:[%s5044_s1 + $0x1e8] sm:$0xf]  ;;  %v3221_v16 = vld [vmem:[%s5044_s1 + $0x118] sm:$0xf0]  ;;  %v2224_v24 = vor.u32 %v3197_v13, %v2223_v12  ;;  %v3194_v30 = vld [vmem:[%s5044_s1 + $0x40] sm:$0xf0] }
  0x7c   :  { %1497 = vmatpush.bf16.msrb.mxu0 %v2580_v11  ;;  %v2428_v11 = vor.u32 %v3248_v6, %v2427_v5  ;;  %v3245_v18 = vld [vmem:[%s5044_s1 + $0x1d8] sm:$0xf0]  ;;  %v3218_v31 = vld [vmem:[%s5044_s1 + $0x100] sm:$0xf0]  ;;  %v2403_v34 = vld [vmem:[%s5044_s1 + $0x1b8] sm:$0xf]  ;;  %v2212_v39 = vor.u32 %v3194_v30, %v2211_v28 }
  0x7d   :  { %1510 = vmatpush.bf16.msrb.mxu1 %v2676_v14  ;;  %v2319_v14 = vld [vmem:[%s5044_s1 + $0x110] sm:$0xf]  ;;  %v3269_v23 = vld [vmem:[%s5044_s1 + $0x298] sm:$0xf0]  ;;  %v2416_v27 = vor.u32 %v3245_v18, %v2415_v17  ;;  %v3266_v37 = vld [vmem:[%s5044_s1 + $0x280] sm:$0xf0] }
  0x7e   :  { %1523 = vmatpush.bf16.msrb.mxu2 %v2772_v15  ;;  %v2524_v15 = vor.u32 %v3272_v8, %v2523_v7  ;;  %v2320_v25 = vor.u32 %v3221_v16, %v2319_v14  ;;  %v2295_v44 = vld [vmem:[%s5044_s1 + $0xe0] sm:$0xf]  ;;  %v3215_v46 = vld [vmem:[%s5044_s1 + $0xe8] sm:$0xf0]  ;;  %v2187_v52 = vld [vmem:[%s5044_s1 + $0x8] sm:$0xf] }
  0x7f   :  { %1536 = vmatpush.bf16.msrb.mxu3 %v2868_v19  ;;  %v2511_v19 = vld [vmem:[%s5044_s1 + $0x290] sm:$0xf]  ;;  %v3239_v48 = vld [vmem:[%s5044_s1 + $0x1a8] sm:$0xf0]  ;;  %v2487_v49 = vld [vmem:[%s5044_s1 + $0x260] sm:$0xf] }
  0x80   :  { %1498 = vmatpush.bf16.msrb.mxu0 %v2568_v21  ;;  %v2307_v21 = vld [vmem:[%s5044_s1 + $0xf8] sm:$0xf]  ;;  %v2512_v22 = vor.u32 %v3269_v23, %v2511_v19  ;;  %v3263_v50 = vld [vmem:[%s5044_s1 + $0x268] sm:$0xf0]  ;;  %v2283_v56 = vld [vmem:[%s5044_s1 + $0xc8] sm:$0xf] }
  0x81   :  { %1511 = vmatpush.bf16.msrb.mxu1 %v2664_v35  ;;  %v3242_v35 = vld [vmem:[%s5044_s1 + $0x1c0] sm:$0xf0]  ;;  %v3212_v57 = vld [vmem:[%s5044_s1 + $0xd0] sm:$0xf0]  ;;  %v2379_v58 = vld [vmem:[%s5044_s1 + $0x188] sm:$0xf] }
  0x82   :  { %1524 = vmatpush.bf16.msrb.mxu2 %v2760_v36  ;;  %v2499_v36 = vld [vmem:[%s5044_s1 + $0x278] sm:$0xf]  ;;  %v3236_v60 = vld [vmem:[%s5044_s1 + $0x190] sm:$0xf0]  ;;  %v2475_v61 = vld [vmem:[%s5044_s1 + $0x248] sm:$0xf] }
  0x83   :  { %1537 = vmatpush.bf16.msrb.mxu3 %v2856_v40  ;;  %1499 = vmatmul.bf16.vlgmr.msrb.gmra.mxu0 %v3965_v32  ;;  %v2235_v32 = vld [vmem:[%s5044_s1 + $0x68] sm:$0xf]  ;;  %v2308_v40 = vor.u32 %v3218_v31, %v2307_v21  ;;  %v2500_v45 = vor.u32 %v3266_v37, %v2499_v36  ;;  %v3260_v62 = vld [vmem:[%s5044_s1 + $0x250] sm:$0xf0]  ;;  %v3377_v5 = vld [vmem:[%s5044_s1 + $0x5f8] sm:$0xf0] }
  0x84   :  { %1543 = vmatpush.bf16.msra.mxu0 %v2272_v41  ;;  %1512 = vmatmul.bf16.vlgmr.msrb.gmra.mxu1 %v3975_v38  ;;  %v3224_v38 = vld [vmem:[%s5044_s1 + $0x130] sm:$0xf0]  ;;  %v2404_v41 = vor.u32 %v3242_v35, %v2403_v34  ;;  %v2476_v6 = vor.u32 %v3260_v62, %v2475_v61  ;;  %v2739_v12 = vld [vmem:[%s5044_s1 + $0x458] sm:$0xf]  ;;  %v3326_v14 = vld [vmem:[%s5044_s1 + $0x460] sm:$0xf0] }
  0x85   :  { %1556 = vmatpush.bf16.msra.mxu1 %v2368_v42  ;;  %1525 = vmatmul.bf16.vlgmr.msrb.gmra.mxu2 %v3960_v29  ;;  %v2535_v29 = vld [vmem:[%s5044_s1 + $0x2c0] sm:$0xf]  ;;  %v2332_v10 = vor.u32 %v3224_v38, %v2331_v3  ;;  %v2284_v3 = vor.u32 %v3212_v57, %v2283_v56  ;;  %v2943_v38 = vld [vmem:[%s5044_s1 + $0x5f0] sm:$0xf]  ;;  %v3350_v16 = vld [vmem:[%s5044_s1 + $0x520] sm:$0xf0]  ;;  %v2740_v23 = vor.u32 %v3326_v14, %v2739_v12 }
  0x86   :  { %1569 = vmatpush.bf16.msra.mxu2 %v2464_v43  ;;  %1538 = vmatmul.bf16.vlgmr.msrb.gmra.mxu3 %v3967_v33  ;;  %v3200_v33 = vld [vmem:[%s5044_s1 + $0x70] sm:$0xf0]  ;;  %v2536_v4 = vor.u32 %v3275_v63, %v2535_v29  ;;  %v2199_v42 = vld [vmem:[%s5044_s1 + $0x20] sm:$0xf]  ;;  %v3191_v43 = vld [vmem:[%s5044_s1 + $0x28] sm:$0xf0]  ;;  %v2944_v13 = vor.u32 %v3377_v5, %v2943_v38 }
  0x87   :  { %1582 = vmatpush.bf16.msra.mxu3 %v2560_v47  ;;  %v2236_v9 = vor.u32 %v3200_v33, %v2235_v32  ;;  %v2391_v47 = vld [vmem:[%s5044_s1 + $0x1a0] sm:$0xf]  ;;  %v2200_v51 = vor.u32 %v3191_v43, %v2199_v42  ;;  %v2655_v29 = vld [vmem:[%s5044_s1 + $0x3b0] sm:$0xf]  ;;  %v3305_v63 = vld [vmem:[%s5044_s1 + $0x3b8] sm:$0xf0] }
  0x88   :  { %1544 = vmatpush.bf16.msra.mxu0 %v2260_v53  ;;  %v3188_v53 = vld [vmem:[%s5044_s1 + $0x10] sm:$0xf0]  ;;  %v2847_v32 = vld [vmem:[%s5044_s1 + $0x530] sm:$0xf]  ;;  %v3353_v33 = vld [vmem:[%s5044_s1 + $0x538] sm:$0xf0]  ;;  %v2656_v7 = vor.u32 %v3305_v63, %v2655_v29 }
  0x89   :  { %1557 = vmatpush.bf16.msra.mxu1 %v2356_v54  ;;  %v2296_v54 = vor.u32 %v3215_v46, %v2295_v44  ;;  %v2931_v17 = vld [vmem:[%s5044_s1 + $0x5d8] sm:$0xf]  ;;  %v3374_v18 = vld [vmem:[%s5044_s1 + $0x5e0] sm:$0xf0]  ;;  %v2727_v28 = vld [vmem:[%s5044_s1 + $0x440] sm:$0xf] }
  0x8a   :  { %1570 = vmatpush.bf16.msra.mxu2 %v2452_v55  ;;  %v2392_v55 = vor.u32 %v3239_v48, %v2391_v47  ;;  %v2932_v30 = vor.u32 %v3374_v18, %v2931_v17  ;;  %v3323_v21 = vld [vmem:[%s5044_s1 + $0x448] sm:$0xf0]  ;;  %v2919_v34 = vld [vmem:[%s5044_s1 + $0x5c0] sm:$0xf]  ;;  %v3296_v42 = vld [vmem:[%s5044_s1 + $0x370] sm:$0xf0] }
  0x8b   :  { %1583 = vmatpush.bf16.msra.mxu3 %v2548_v59  ;;  %v2488_v59 = vor.u32 %v3263_v50, %v2487_v49  ;;  %v3347_v31 = vld [vmem:[%s5044_s1 + $0x508] sm:$0xf0]  ;;  %v3440_v35 = vld [vmem:[#allocation1] sm:$0xff]  ;;  %v2715_v43 = vld [vmem:[%s5044_s1 + $0x428] sm:$0xf]  ;;  %vm2129_vm0 = vcmask 523264  }
  0x8c   :  { %1545 = vmatpush.bf16.msra.mxu0 %v2248_v0  ;;  %v2751_v0 = vld [vmem:[%s5044_s1 + $0x470] sm:$0xf]  ;;  %v3441_v36 = vld [vmem:[#allocation1 + $0x1b] sm:$0xff]  ;;  %v3344_v46 = vld [vmem:[%s5044_s1 + $0x4f0] sm:$0xf0]  ;;  %s3472_s0 = smov [#allocation2]  }
  0x8d   :  { %1558 = vmatpush.bf16.msra.mxu1 %v2344_v1  ;;  %v2188_v1 = vor.u32 %v3188_v53, %v2187_v52  ;;  %v2907_v47 = vld [vmem:[%s5044_s1 + $0x5a8] sm:$0xf]  ;;  %v3368_v48 = vld [vmem:[%s5044_s1 + $0x5b0] sm:$0xf0]  ;;  %v2607_v52 = vld [vmem:[%s5044_s1 + $0x350] sm:$0xf] }
  0x8e   :  { %1571 = vmatpush.bf16.msra.mxu2 %v2440_v2  ;;  %v3329_v2 = vld [vmem:[%s5044_s1 + $0x478] sm:$0xf0]  ;;  %v2799_v57 = vld [vmem:[%s5044_s1 + $0x4d0] sm:$0xf]  ;;  %v2595_v63 = vld [vmem:[%s5044_s1 + $0x338] sm:$0xf] }
  0x8f   :  { %1584 = vmatpush.bf16.msra.mxu3 %v2536_v4  ;;  %v2380_v4 = vor.u32 %v3236_v60, %v2379_v58  ;;  %v2752_v8 = vor.u32 %v3329_v2, %v2751_v0  ;;  %v3293_v53 = vld [vmem:[%s5044_s1 + $0x358] sm:$0xf0]  ;;  %v3290_v0 = vld [vmem:[%s5044_s1 + $0x340] sm:$0xf0]  ;;  %v2679_v12 = vld [vmem:[%s5044_s1 + $0x3e0] sm:$0xf] }
  0x90   :  { %1546 = vmatpush.bf16.msra.mxu0 %v2236_v9  ;;  %v2848_v9 = vor.u32 %v3353_v33, %v2847_v32  ;;  %v3317_v56 = vld [vmem:[%s5044_s1 + $0x418] sm:$0xf0]  ;;  %v2608_v61 = vor.u32 %v3293_v53, %v2607_v52  ;;  %v3314_v32 = vld [vmem:[%s5044_s1 + $0x400] sm:$0xf0]  ;;  %v2787_v33 = vld [vmem:[%s5044_s1 + $0x4b8] sm:$0xf]  ;;  %v2596_v5 = vor.u32 %v3290_v0, %v2595_v63 }
  0x91   :  { %1559 = vmatpush.bf16.msra.mxu1 %v2332_v10  ;;  %v2643_v10 = vld [vmem:[%s5044_s1 + $0x398] sm:$0xf]  ;;  %v3341_v58 = vld [vmem:[%s5044_s1 + $0x4d8] sm:$0xf0]  ;;  %v3362_v38 = vld [vmem:[%s5044_s1 + $0x580] sm:$0xf0] }
  0x92   :  { %1572 = vmatpush.bf16.msra.mxu2 %v2428_v11  ;;  %v3302_v11 = vld [vmem:[%s5044_s1 + $0x3a0] sm:$0xf0]  ;;  %v3365_v60 = vld [vmem:[%s5044_s1 + $0x598] sm:$0xf0]  ;;  %v2800_v29 = vor.u32 %v3341_v58, %v2799_v57  ;;  %v3335_v17 = vld [vmem:[%s5044_s1 + $0x4a8] sm:$0xf0] }
  0x93   :  { %1585 = vmatpush.bf16.msra.mxu3 %v2524_v15  ;;  %v2835_v15 = vld [vmem:[%s5044_s1 + $0x518] sm:$0xf]  ;;  %v2644_v19 = vor.u32 %v3302_v11, %v2643_v10  ;;  %v2583_v10 = vld [vmem:[%s5044_s1 + $0x320] sm:$0xf]  ;;  %v3287_v11 = vld [vmem:[%s5044_s1 + $0x328] sm:$0xf0] }
  0x94   :  { %1547 = vmatpush.bf16.msra.mxu0 %v2224_v24  ;;  %v2836_v24 = vor.u32 %v3350_v16, %v2835_v15  ;;  %v3311_v15 = vld [vmem:[%s5044_s1 + $0x3e8] sm:$0xf0]  ;;  %v2775_v16 = vld [vmem:[%s5044_s1 + $0x4a0] sm:$0xf]  ;;  %v2987_v0 = vld [vmem:[%s5046_s3 + $0x50] sm:$0xf] }
  0x95   :  { %1560 = vmatpush.bf16.msra.mxu1 %v2320_v25  ;;  %v2631_v25 = vld [vmem:[%s5044_s1 + $0x380] sm:$0xf]  ;;  %s2168_s20 = sshll.u32 %s5050_s7, 4  ;;  %vm2159_vm1 = vcmask 74752   ;;  %s2169_s20 = int_to_ptr.hbm [resolvable:$true] %s2168_s20 }
  0x96   :  { %1573 = vmatpush.bf16.msra.mxu2 %v2416_v27  ;;  %v3299_v27 = vld [vmem:[%s5044_s1 + $0x388] sm:$0xf0]  ;;  %v2871_v18 = vld [vmem:[%s5044_s1 + $0x560] sm:$0xf] }
  0x97   :  { %1586 = vmatpush.bf16.msra.mxu3 %v2512_v22  ;;  %v2823_v22 = vld [vmem:[%s5044_s1 + $0x500] sm:$0xf]  ;;  %v2632_v37 = vor.u32 %v3299_v27, %v2631_v25  ;;  %v2571_v25 = vld [vmem:[%s5044_s1 + $0x308] sm:$0xf]  ;;  %v2680_v27 = vor.u32 %v3311_v15, %v2679_v12  ;;  %v2981_v12 = vld [vmem:[%s5046_s3 + $0x48] sm:$0xf0] }
  0x98   :  { %1548 = vmatpush.bf16.msra.mxu0 %v2212_v39  ;;  %v2728_v39 = vor.u32 %v3323_v21, %v2727_v28  ;;  %v2776_v28 = vor.u32 %v3335_v17, %v2775_v16  ;;  %v2667_v21 = vld [vmem:[%s5044_s1 + $0x3c8] sm:$0xf]  ;;  %v2995_v53 = vld [vmem:[%s5046_s3 + $0x60] sm:$0xf]  ;;  %v3385_v17 = vld [vmem:[%s5046_s3 + $0x34] sm:$0xf0] }
  0x99   :  { %1561 = vmatpush.bf16.msra.mxu1 %v2308_v40  ;;  %v2824_v40 = vor.u32 %v3347_v31, %v2823_v22  ;;  %v3308_v22 = vld [vmem:[%s5044_s1 + $0x3d0] sm:$0xf0] }
  0x9a   :  { %1574 = vmatpush.bf16.msra.mxu2 %v2404_v41  ;;  %v2619_v41 = vld [vmem:[%s5044_s1 + $0x368] sm:$0xf] }
  0x9b   :  { %1587 = vmatpush.bf16.msra.mxu3 %v2500_v45  ;;  %v2811_v45 = vld [vmem:[%s5044_s1 + $0x4e8] sm:$0xf]  ;;  %v2620_v49 = vor.u32 %v3296_v42, %v2619_v41  ;;  %v3393_v41 = vld [vmem:[%s5046_s3 + $0x74] sm:$0xf0] }
  0x9c   :  { %1549 = vmatpush.bf16.msra.mxu0 %v2200_v51  ;;  %v2812_v51 = vor.u32 %v3344_v46, %v2811_v45  ;;  %v2668_v46 = vor.u32 %v3308_v22, %v2667_v21 }
  0x9d   :  { %1562 = vmatpush.bf16.msra.mxu1 %v2296_v54  ;;  %v2703_v54 = vld [vmem:[%s5044_s1 + $0x410] sm:$0xf] }
  0x9e   :  { %1575 = vmatpush.bf16.msra.mxu2 %v2392_v55  ;;  %v2908_v55 = vor.u32 %v3368_v48, %v2907_v47  ;;  %v2704_v62 = vor.u32 %v3317_v56, %v2703_v54  ;;  %v3391_v54 = vld [vmem:[%s5046_s3 + $0x64] sm:$0xf0]  ;;  %v2997_v56 = vld [vmem:[%s5046_s3 + $0x68] sm:$0xf0] }
  0x9f   :  { %1588 = vmatpush.bf16.msra.mxu3 %v2488_v59  ;;  %v2895_v59 = vld [vmem:[%s5044_s1 + $0x590] sm:$0xf]  ;;  %v2996_v58 = vor.u32 %v3391_v54, %v2995_v53 }
  0xa0   :  { %1550 = vmatpush.bf16.msra.mxu0 %v2188_v1  ;;  %v2691_v1 = vld [vmem:[%s5044_s1 + $0x3f8] sm:$0xf]  ;;  %v2896_v2 = vor.u32 %v3365_v60, %v2895_v59  ;;  %v3067_v60 = vld [vmem:[%s5046_s3 + $0xf0] sm:$0xf] }
  0xa1   :  { %1563 = vmatpush.bf16.msra.mxu1 %v2284_v3  ;;  %v3338_v3 = vld [vmem:[%s5044_s1 + $0x4c0] sm:$0xf0] }
  0xa2   :  { %1576 = vmatpush.bf16.msra.mxu2 %v2380_v4  ;;  %v2883_v4 = vld [vmem:[%s5044_s1 + $0x578] sm:$0xf] }
  0xa3   :  { %1589 = vmatpush.bf16.msra.mxu3 %v2476_v6  ;;  %1551 = vmatmul.bf16.vlgmr.msra.gmra.mxu0 %v3440_v35  ;;  %v4657_v6 = vld [vmem:[%s5045_s2] sm:$0x7]  ;;  %v2884_v14 = vor.u32 %v3362_v38, %v2883_v4  ;;  %v3332_v35 = vld [vmem:[%s5044_s1 + $0x490] sm:$0xf0]  ;;  %v2989_v4 = vld [vmem:[%s5046_s3 + $0x58] sm:$0xf0] }
  0xa4   :  { %1595 = vmatpush.bf16.msrb.mxu0 %v2656_v7  ;;  %1564 = vmatmul.bf16.vlgmr.msra.gmra.mxu1 %v3829_v26  ;;  %v3320_v26 = vld [vmem:[%s5044_s1 + $0x430] sm:$0xf0]  ;;  %v1344_v7 = vpop.f32.mrf.mxu0  ;;  %v3445_v38 = vld [vmem:[#allocation1 + $0x3f] sm:$0xff] }
  0xa5   :  { %1608 = vmatpush.bf16.msrb.mxu1 %v2752_v8  ;;  %1577 = vmatmul.bf16.vlgmr.msra.gmra.mxu2 %v3816_v20  ;;  %v3371_v20 = vld [vmem:[%s5044_s1 + $0x5c8] sm:$0xf0]  ;;  %v2716_v50 = vor.u32 %v3320_v26, %v2715_v43  ;;  %v2692_v8 = vor.u32 %v3314_v32, %v2691_v1  ;;  %v3005_v26 = vld [vmem:[%s5046_s3 + $0x78] sm:$0xf0]  ;;  %v3389_v1 = vld [vmem:[%s5046_s3 + $0x54] sm:$0xf0] }
  0xa6   :  { %1621 = vmatpush.bf16.msrb.mxu2 %v2848_v9  ;;  %1590 = vmatmul.bf16.vlgmr.msra.gmra.mxu3 %v3441_v36  ;;  %v2920_v44 = vor.u32 %v3371_v20, %v2919_v34  ;;  %v2788_v9 = vor.u32 %v3338_v3, %v2787_v33  ;;  %v2763_v20 = vld [vmem:[%s5044_s1 + $0x488] sm:$0xf]  ;;  %v3443_v32 = vld [vmem:[#allocation1 + $0x2d] sm:$0xff]  ;;  %v3444_v33 = vld [vmem:[#allocation1 + $0x36] sm:$0xff] }
  0xa7   :  { %1634 = vmatpush.bf16.msrb.mxu3 %v2944_v13  ;;  %v1357_v13 = vpop.f32.mrf.mxu1  ;;  %v2859_v36 = vld [vmem:[%s5044_s1 + $0x548] sm:$0xf]  ;;  %v2764_v47 = vor.u32 %v3332_v35, %v2763_v20  ;;  %v3388_v3 = vld [vmem:[%s5046_s3 + $0x54] sm:$0xf]  ;;  %v3382_v20 = vld [vmem:[%s5046_s3 + $0x24] sm:$0xf] }
  0xa8   :  { %1596 = vmatpush.bf16.msrb.mxu0 %v2644_v19  ;;  %v3359_v19 = vld [vmem:[%s5044_s1 + $0x568] sm:$0xf0] }
  0xa9   :  { %1609 = vmatpush.bf16.msrb.mxu1 %v2740_v23  ;;  %v287_v23 = vperm.slane %v4657_v6, 0  ;;  %v2872_v34 = vor.u32 %v3359_v19, %v2871_v18 }
  0xaa   :  { %1622 = vmatpush.bf16.msrb.mxu2 %v2836_v24  ;;  %v2584_v24 = vor.u32 %v3287_v11, %v2583_v10  ;;  %v1370_v31 = vpop.f32.mrf.mxu2  ;;  %v3387_v10 = vld [vmem:[%s5046_s3 + $0x44] sm:$0xf0]  ;;  %v3386_v11 = vld [vmem:[%s5046_s3 + $0x44] sm:$0xf] }
  0xab   :  { %1635 = vmatpush.bf16.msrb.mxu3 %v2932_v30  ;;  %v3284_v30 = vld [vmem:[%s5044_s1 + $0x310] sm:$0xf0]  ;;  %v1345_v42 = vadd.f32 %v1344_v7, %v287_v23  ;;  %v2984_v16 = vor.u32 %v3386_v11, %v2981_v12  ;;  %v3059_v23 = vld [vmem:[%s5046_s3 + $0xe0] sm:$0xf]  ;;  %v3402_v11 = vld [vmem:[%s5046_s3 + $0xc4] sm:$0xf] }
  0xac   :  { %1597 = vmatpush.bf16.msrb.mxu0 %v2632_v37  ;;  %v1383_v37 = vpop.f32.mrf.mxu3  ;;  %v2572_v43 = vor.u32 %v3284_v30, %v2571_v25  ;;  %v1346_v45 = vpop.f32.mrf.mxu0  ;;  %v3384_v25 = vld [vmem:[%s5046_s3 + $0x34] sm:$0xf]  ;;  %v3045_v12 = vld [vmem:[%s5046_s3 + $0xc8] sm:$0xf0] }
  0xad   :  { %1610 = vmatpush.bf16.msrb.mxu1 %v2728_v39  ;;  %v3356_v39 = vld [vmem:[%s5044_s1 + $0x550] sm:$0xf0]  ;;  %v1358_v52 = vadd.f32 %v1357_v13, %v1345_v42 }
  0xae   :  { %1623 = vmatpush.bf16.msrb.mxu2 %v2824_v40  ;;  %v3003_v40 = vld [vmem:[%s5046_s3 + $0x70] sm:$0xf] }
  0xaf   :  { %1636 = vmatpush.bf16.msrb.mxu3 %v2920_v44  ;;  %v3392_v44 = vld [vmem:[%s5046_s3 + $0x74] sm:$0xf]  ;;  %v1359_v48 = vpop.f32.mrf.mxu1  ;;  %v1371_v63 = vadd.f32 %v1370_v31, %v1358_v52  ;;  %v2963_v31 = vld [vmem:[%s5046_s3 + $0x20] sm:$0xf]  ;;  %v2957_v52 = vld [vmem:[%s5046_s3 + $0x18] sm:$0xf0] }
  0xb0   :  { %1598 = vmatpush.bf16.msrb.mxu0 %v2620_v49  ;;  %v2860_v49 = vor.u32 %v3356_v39, %v2859_v36  ;;  %v2965_v36 = vld [vmem:[%s5046_s3 + $0x28] sm:$0xf0]  ;;  %v3051_v39 = vld [vmem:[%s5046_s3 + $0xd0] sm:$0xf]  ;;  %v3381_v48 = vld [vmem:[%s5046_s3 + $0x14] sm:$0xf0] }
  0xb1   :  { %1611 = vmatpush.bf16.msrb.mxu1 %v2716_v50  ;;  %v3004_v50 = vor.u32 %v3393_v41, %v3003_v40  ;;  %v1384_v7 = vadd.f32 %v1383_v37, %v1371_v63  ;;  %v3405_v40 = vld [vmem:[%s5046_s3 + $0xd4] sm:$0xf0] }
  0xb2   :  { %1624 = vmatpush.bf16.msrb.mxu2 %v2812_v51  ;;  %v3008_v51 = vor.u32 %v3392_v44, %v3005_v26  ;;  %v1372_v57 = vpop.f32.mrf.mxu2  ;;  %v3052_v42 = vor.u32 %v3405_v40, %v3051_v39  ;;  %v3403_v44 = vld [vmem:[%s5046_s3 + $0xc4] sm:$0xf0]  ;;  %v3011_v39 = vld [vmem:[%s5046_s3 + $0x80] sm:$0xf] }
  0xb3   :  { %1637 = vmatpush.bf16.msrb.mxu3 %v2908_v55  ;;  %v3390_v55 = vld [vmem:[%s5046_s3 + $0x64] sm:$0xf]  ;;  %v3395_v40 = vld [vmem:[%s5046_s3 + $0x84] sm:$0xf0] }
  0xb4   :  { %1599 = vmatpush.bf16.msrb.mxu0 %v2608_v61  ;;  %v1385_v59 = vpop.f32.mrf.mxu3  ;;  %v3409_v61 = vld [vmem:[%s5046_s3 + $0xf4] sm:$0xf0] }
  0xb5   :  { %1612 = vmatpush.bf16.msrb.mxu1 %v2704_v62  ;;  %v3442_v62 = vld [vmem:[#allocation1 + $0x24] sm:$0xff] }
  0xb6   :  { %1625 = vmatpush.bf16.msrb.mxu2 %v2800_v29  ;;  %v3000_v29 = vor.u32 %v3390_v55, %v2997_v56  ;;  %v3035_v55 = vld [vmem:[%s5046_s3 + $0xb0] sm:$0xf]  ;;  %v3401_v56 = vld [vmem:[%s5046_s3 + $0xb4] sm:$0xf0]  ;;  %v3379_v59 = vld [vmem:[%s5046_s3 + $0x4] sm:$0xf0] }
  0xb7   :  { %1638 = vmatpush.bf16.msrb.mxu3 %v2896_v2  ;;  %v3068_v2 = vor.u32 %v3409_v61, %v3067_v60  ;;  %v3378_v60 = vld [vmem:[%s5046_s3 + $0x4] sm:$0xf] }
  0xb8   :  { %1600 = vmatpush.bf16.msrb.mxu0 %v2596_v5  ;;  %v2988_v5 = vor.u32 %v3389_v1, %v2987_v0  ;;  %v3408_v0 = vld [vmem:[%s5046_s3 + $0xf4] sm:$0xf]  ;;  %v3069_v1 = vld [vmem:[%s5046_s3 + $0xf8] sm:$0xf0] }
  0xb9   :  { %1613 = vmatpush.bf16.msrb.mxu1 %v2692_v8  ;;  %v2992_v8 = vor.u32 %v3388_v3, %v2989_v4  ;;  %v3072_v3 = vor.u32 %v3408_v0, %v3069_v1  ;;  %v3406_v4 = vld [vmem:[%s5046_s3 + $0xe4] sm:$0xf]  ;;  %v3423_v0 = vld [vmem:[%s5046_s3 + $0x164] sm:$0xf0] }
  0xba   :  { %1626 = vmatpush.bf16.msrb.mxu2 %v2788_v9  ;;  %v2979_v9 = vld [vmem:[%s5046_s3 + $0x40] sm:$0xf] }
  0xbb   :  { %1639 = vmatpush.bf16.msrb.mxu3 %v2884_v14  ;;  %v2980_v13 = vor.u32 %v3387_v10, %v2979_v9  ;;  %v2971_v14 = vld [vmem:[%s5046_s3 + $0x30] sm:$0xf]  ;;  %v3053_v9 = vld [vmem:[%s5046_s3 + $0xd8] sm:$0xf0] }
  0xbc   :  { %1601 = vmatpush.bf16.msrb.mxu0 %v2584_v24  ;;  %v3407_v24 = vld [vmem:[%s5046_s3 + $0xe4] sm:$0xf0]  ;;  %v2972_v21 = vor.u32 %v3385_v17, %v2971_v14 }
  0xbd   :  { %1614 = vmatpush.bf16.msrb.mxu1 %v2680_v27  ;;  %v2973_v27 = vld [vmem:[%s5046_s3 + $0x38] sm:$0xf0] }
  0xbe   :  { %1627 = vmatpush.bf16.msrb.mxu2 %v2776_v28  ;;  %v3060_v28 = vor.u32 %v3407_v24, %v3059_v23  ;;  %v2976_v22 = vor.u32 %v3384_v25, %v2973_v27  ;;  %v3398_v25 = vld [vmem:[%s5046_s3 + $0xa4] sm:$0xf]  ;;  %v3029_v27 = vld [vmem:[%s5046_s3 + $0xa8] sm:$0xf0] }
  0xbf   :  { %1640 = vmatpush.bf16.msrb.mxu3 %v2872_v34  ;;  %v3383_v34 = vld [vmem:[%s5046_s3 + $0x24] sm:$0xf0] }
  0xc0   :  { %1602 = vmatpush.bf16.msrb.mxu0 %v2572_v43  ;;  %v1396_v15 = vpop.f32.mrf.mxu0  ;;  %v3043_v43 = vld [vmem:[%s5046_s3 + $0xc0] sm:$0xf]  ;;  %v2964_v26 = vor.u32 %v3383_v34, %v2963_v31  ;;  %v3032_v34 = vor.u32 %v3398_v25, %v3029_v27  ;;  %v3099_v27 = vld [vmem:[%s5046_s3 + $0x130] sm:$0xf] }
  0xc1   :  { %1615 = vmatpush.bf16.msrb.mxu1 %v2668_v46  ;;  %v1397_v18 = vadd.f32 %v1396_v15, %v1384_v7  ;;  %v1409_v19 = vpop.f32.mrf.mxu1  ;;  %v2968_v46 = vor.u32 %v3382_v20, %v2965_v36  ;;  %v3400_v15 = vld [vmem:[%s5046_s3 + $0xb4] sm:$0xf]  ;;  %v3021_v36 = vld [vmem:[%s5046_s3 + $0x98] sm:$0xf0] }
  0xc2   :  { %1628 = vmatpush.bf16.msrb.mxu2 %v2764_v47  ;;  %v2955_v47 = vld [vmem:[%s5046_s3 + $0x10] sm:$0xf] }
  0xc3   :  { %1641 = vmatpush.bf16.msrb.mxu3 %v2860_v49  ;;  %1603 = vmatmul.bf16.vlgmr.msrb.gmra.mxu0 %v3442_v62  ;;  %v1410_v30 = vadd.f32 %v1409_v19, %v1397_v18  ;;  %v2956_v54 = vor.u32 %v3381_v48, %v2955_v47  ;;  %v3036_v62 = vor.u32 %v3401_v56, %v3035_v55  ;;  %v3027_v18 = vld [vmem:[%s5046_s3 + $0xa0] sm:$0xf]  ;;  %v3399_v19 = vld [vmem:[%s5046_s3 + $0xa4] sm:$0xf0] }
  0xc4   :  { %1947 = vmatpush.bf16.msra.mxu0 %v3004_v50  ;;  %1616 = vmatmul.bf16.vlgmr.msrb.gmra.mxu1 %v3443_v32  ;;  %v3044_v50 = vor.u32 %v3403_v44, %v3043_v43  ;;  %v3028_v23 = vor.u32 %v3399_v19, %v3027_v18  ;;  %v3394_v44 = vld [vmem:[%s5046_s3 + $0x84] sm:$0xf] }
  0xc5   :  { %1629 = vmatmul.bf16.vlgmr.msrb.gmra.mxu2 %v3444_v33  ;;  %1960 = vmatpush.bf16.msra.mxu1 %v3068_v2  ;;  %v3418_v19 = vld [vmem:[%s5046_s3 + $0x144] sm:$0xf] }
  0xc6   :  { %1642 = vmatmul.bf16.vlgmr.msrb.gmra.mxu3 %v3445_v38  ;;  %v3061_v38 = vld [vmem:[%s5046_s3 + $0xe8] sm:$0xf0] }
  0xc7   :  { %1986 = vmatpush.bf16.msra.mxu3 %v3008_v51  ;;  %v3380_v51 = vld [vmem:[%s5046_s3 + $0x14] sm:$0xf]  ;;  %v3064_v7 = vor.u32 %v3406_v4, %v3061_v38 }
  0xc8   :  { %1948 = vmatpush.bf16.msra.mxu0 %v2996_v58  ;;  %v1422_v35 = vpop.f32.mrf.mxu2  ;;  %v1398_v45 = vpop.f32.mrf.mxu0  ;;  %v2960_v57 = vor.u32 %v3380_v51, %v2957_v52  ;;  %v2947_v58 = vld [vmem:[%s5046_s3] sm:$0xf] }
  0xc9   :  { %1961 = vmatpush.bf16.msra.mxu1 %v3060_v28  ;;  %v1435_v37 = vpop.f32.mrf.mxu3  ;;  %v1423_v41 = vadd.f32 %v1422_v35, %v1410_v30  ;;  %v1411_v49 = vpop.f32.mrf.mxu1  ;;  %v2948_v32 = vor.u32 %v3379_v59, %v2947_v58  ;;  %v3019_v30 = vld [vmem:[%s5046_s3 + $0x90] sm:$0xf]  ;;  %v3396_v35 = vld [vmem:[%s5046_s3 + $0x94] sm:$0xf] }
  0xca   :  { %v3024_v43 = vor.u32 %v3396_v35, %v3021_v36  ;;  %v3131_v59 = vld [vmem:[%s5046_s3 + $0x170] sm:$0xf]  ;;  %v3414_v35 = vld [vmem:[%s5046_s3 + $0x124] sm:$0xf] }
  0xcb   :  { %1987 = vmatpush.bf16.msra.mxu3 %v3000_v29  ;;  %v1436_v53 = vadd.f32 %v1435_v37, %v1423_v41  ;;  %v2949_v29 = vld [vmem:[%s5046_s3 + $0x8] sm:$0xf0]  ;;  %v3012_v41 = vor.u32 %v3395_v40, %v3011_v39 }
  0xcc   :  { %1949 = vmatpush.bf16.msra.mxu0 %v2988_v5  ;;  %v2952_v33 = vor.u32 %v3378_v60, %v2949_v29  ;;  %v3425_v60 = vld [vmem:[%s5046_s3 + $0x174] sm:$0xf0]  ;;  %v3133_v29 = vld [vmem:[%s5046_s3 + $0x178] sm:$0xf0]  ;;  %v3093_v39 = vld [vmem:[%s5046_s3 + $0x128] sm:$0xf0] }
  0xcd   :  { %1962 = vmatpush.bf16.msra.mxu1 %v3052_v42  ;;  %v1647_v2 = vmax.f32 %v1436_v53, 0.0  ;;  %v288_v42 = vperm.slane %v4657_v6, 1 }
  0xcf   :  { %1988 = vmatpush.bf16.msra.mxu3 %v2992_v8  ;;  %v1650_v5 = vpack.c.bf16 %v1647_v2, %v1647_v2  ;;  %v3404_v8 = vld [vmem:[%s5046_s3 + $0xd4] sm:$0xf] }
  0xd0   :  { %1950 = vmatpush.bf16.msra.mxu0 %v2980_v13  ;;  %v1424_v61 = vpop.f32.mrf.mxu2  ;;  %v3056_v10 = vor.u32 %v3404_v8, %v3053_v9  ;;  %v3048_v13 = vor.u32 %v3402_v11, %v3045_v12  ;;  %v3115_v9 = vld [vmem:[%s5046_s3 + $0x150] sm:$0xf]  ;;  %v3420_v11 = vld [vmem:[%s5046_s3 + $0x154] sm:$0xf] }
  0xd1   :  { %1963 = vmatpush.bf16.msra.mxu1 %v3044_v50  ;;  %v1437_v63 = vpop.f32.mrf.mxu3  ;;  %v3424_v61 = vld [vmem:[%s5046_s3 + $0x174] sm:$0xf] }
  0xd2   :  { %v3123_v63 = vld [vmem:[%s5046_s3 + $0x160] sm:$0xf] }
  0xd3   :  { %1989 = vmatpush.bf16.msra.mxu3 %v2984_v16  ;;  %v3037_v16 = vld [vmem:[%s5046_s3 + $0xb8] sm:$0xf0]  ;;  %v3124_v38 = vor.u32 %v3423_v0, %v3123_v63 }
  0xd4   :  { %1951 = vmatpush.bf16.msra.mxu0 %v2972_v21  ;;  %v3040_v24 = vor.u32 %v3400_v15, %v3037_v16  ;;  %v3397_v21 = vld [vmem:[%s5046_s3 + $0x94] sm:$0xf0]  ;;  %v3107_v16 = vld [vmem:[%s5046_s3 + $0x140] sm:$0xf] }
  0xd5   :  { %1964 = vmatpush.bf16.msra.mxu1 %v3036_v62  ;;  %v3020_v31 = vor.u32 %v3397_v21, %v3019_v30  ;;  %v3132_v62 = vor.u32 %v3425_v60, %v3131_v59  ;;  %v3416_v30 = vld [vmem:[%s5046_s3 + $0x134] sm:$0xf] }
  0xd7   :  { %1990 = vmatpush.bf16.msra.mxu3 %v2976_v22  ;;  %1973 = vmatpush.bf16.msra.mxu2 %v3132_v62 }
  0xd8   :  { %1952 = vmatpush.bf16.msra.mxu0 %v2964_v26  ;;  %v3013_v26 = vld [vmem:[%s5046_s3 + $0x88] sm:$0xf0] }
  0xd9   :  { %1965 = vmatpush.bf16.msra.mxu1 %v3028_v23  ;;  %v3016_v48 = vor.u32 %v3394_v44, %v3013_v26  ;;  %v3109_v23 = vld [vmem:[%s5046_s3 + $0x148] sm:$0xf0]  ;;  %v3412_v44 = vld [vmem:[%s5046_s3 + $0x114] sm:$0xf] }
  0xda   :  { %v3112_v25 = vor.u32 %v3418_v19, %v3109_v23  ;;  %v3430_v19 = vld [vmem:[%s5048_s5 + $0x20] sm:$0xff]  ;;  %v3429_v23 = vld [vmem:[%s5048_s5 + $0x18] sm:$0xff] }
  0xdb   :  { %1991 = vmatpush.bf16.msra.mxu3 %v2968_v46  ;;  %1974 = vmatpush.bf16.msra.mxu2 %v3124_v38 }
  0xdc   :  { %1953 = vmatpush.bf16.msra.mxu0 %v2956_v54 }
  0xdd   :  { %1966 = vmatpush.bf16.msra.mxu1 %v3020_v31 }
  0xdf   :  { %1992 = vmatpush.bf16.msra.mxu3 %v2960_v57 }
  0xe0   :  { %1954 = vmatpush.bf16.msra.mxu0 %v2948_v32  ;;  %v1448_v14 = vpop.f32.mrf.mxu0  ;;  %v3136_v32 = vor.u32 %v3424_v61, %v3133_v29 }
  0xe1   :  { %v1461_v17 = vpop.f32.mrf.mxu1  ;;  %1967 = vmatpush.bf16.msra.mxu1 %v3012_v41  ;;  %v1449_v47 = vadd.f32 %v1448_v14, %v288_v42  ;;  %v3117_v14 = vld [vmem:[%s5046_s3 + $0x158] sm:$0xf0]  ;;  %v3096_v41 = vor.u32 %v3414_v35, %v3093_v39  ;;  %v3083_v42 = vld [vmem:[%s5046_s3 + $0x110] sm:$0xf]  ;;  %v3434_v35 = vld [vmem:[%s5048_s5 + $0x40] sm:$0xff] }
  0xe2   :  { %v3120_v18 = vor.u32 %v3420_v11, %v3117_v14  ;;  %v3433_v14 = vld [vmem:[%s5048_s5 + $0x38] sm:$0xff] }
  0xe3   :  { %1993 = vmatpush.bf16.msra.mxu3 %v2952_v33  ;;  %1955 = vmatmul.bf16.vlgmr.msra.gmra.mxu0 %v1650_v5  ;;  %v1462_v49 = vadd.f32 %v1461_v17, %v1449_v47  ;;  %v3422_v33 = vld [vmem:[%s5046_s3 + $0x164] sm:$0xf]  ;;  %v3419_v17 = vld [vmem:[%s5046_s3 + $0x144] sm:$0xf0] }
  0xe4   :  { %1999 = vmatpush.bf16.msrb.mxu0 %v3072_v3  ;;  %v3125_v3 = vld [vmem:[%s5046_s3 + $0x168] sm:$0xf0] }
  0xe5   :  { %2012 = vmatpush.bf16.msrb.mxu1 %v3136_v32 }
  0xe6   :  { %1994 = vmatmul.bf16.vlgmr.msra.gmra.mxu3 %v1650_v5 }
  0xe8   :  { %2000 = vmatpush.bf16.msrb.mxu0 %v3064_v7  ;;  %v1474_v28 = vpop.f32.mrf.mxu2  ;;  %v1450_v20 = vpop.f32.mrf.mxu0  ;;  %v3128_v7 = vor.u32 %v3422_v33, %v3125_v3 }
  0xe9   :  { %v1487_v22 = vpop.f32.mrf.mxu3  ;;  %v1463_v37 = vpop.f32.mrf.mxu1  ;;  %v1475_v50 = vadd.f32 %v1474_v28, %v1462_v49  ;;  %v3417_v28 = vld [vmem:[%s5046_s3 + $0x134] sm:$0xf0]  ;;  %v3415_v20 = vld [vmem:[%s5046_s3 + $0x124] sm:$0xf0]  ;;  %v3075_v49 = vld [vmem:[%s5046_s3 + $0x100] sm:$0xf] }
  0xea   :  { %2013 = vmatpush.bf16.msrb.mxu1 %v3128_v7  ;;  %v3100_v21 = vor.u32 %v3417_v28, %v3099_v27 }
  0xeb   :  { %v1488_v51 = vadd.f32 %v1487_v22, %v1475_v50  ;;  %v3101_v22 = vld [vmem:[%s5046_s3 + $0x138] sm:$0xf0]  ;;  %v3411_v50 = vld [vmem:[%s5046_s3 + $0x104] sm:$0xf0] }
  0xec   :  { %2001 = vmatpush.bf16.msrb.mxu0 %v3056_v10  ;;  %v3421_v10 = vld [vmem:[%s5046_s3 + $0x154] sm:$0xf0]  ;;  %v3104_v31 = vor.u32 %v3416_v30, %v3101_v22 }
  0xee   :  { %2014 = vmatpush.bf16.msrb.mxu1 %v3120_v18  ;;  %v3431_v18 = vld [vmem:[%s5048_s5 + $0x28] sm:$0xff] }
  0xf0   :  { %2002 = vmatpush.bf16.msrb.mxu0 %v3048_v13  ;;  %v1476_v45 = vpop.f32.mrf.mxu2  ;;  %v3116_v13 = vor.u32 %v3421_v10, %v3115_v9 }
  0xf1   :  { %v1489_v46 = vpop.f32.mrf.mxu3  ;;  %v3085_v45 = vld [vmem:[%s5046_s3 + $0x118] sm:$0xf0] }
  0xf2   :  { %1975 = vmatpush.bf16.msra.mxu2 %v3116_v13  ;;  %2015 = vmatpush.bf16.msrb.mxu1 %v3112_v25  ;;  %v3088_v47 = vor.u32 %v3412_v44, %v3085_v45 }
  0xf4   :  { %2003 = vmatpush.bf16.msrb.mxu0 %v3040_v24  ;;  %v3108_v24 = vor.u32 %v3419_v17, %v3107_v16  ;;  %v3432_v16 = vld [vmem:[%s5048_s5 + $0x30] sm:$0xff] }
  0xf5   :  { %v3436_v17 = vld [vmem:[%s5048_s5 + $0x50] sm:$0xff] }
  0xf6   :  { %1976 = vmatpush.bf16.msra.mxu2 %v3108_v24  ;;  %2016 = vmatpush.bf16.msrb.mxu1 %v3104_v31  ;;  %v1701_v24 = vld [vmem:[%s5047_s4] sm:$0x3] }
  0xf7   :  { %v1703_v25 = vperm.slane %v1701_v24, 0  ;;  %v1704_v39 = vperm.slane %v1701_v24, 1 }
  0xf8   :  { %2004 = vmatpush.bf16.msrb.mxu0 %v3032_v34  ;;  %v3091_v34 = vld [vmem:[%s5046_s3 + $0x120] sm:$0xf] }
  0xf9   :  { %v3092_v37 = vor.u32 %v3415_v20, %v3091_v34  ;;  %v3435_v34 = vld [vmem:[%s5048_s5 + $0x48] sm:$0xff]  ;;  %v3428_v20 = vld [vmem:[%s5048_s5 + $0x10] sm:$0xff] }
  0xfa   :  { %1977 = vmatpush.bf16.msra.mxu2 %v3100_v21  ;;  %2017 = vmatpush.bf16.msrb.mxu1 %v3096_v41 }
  0xfc   :  { %2005 = vmatpush.bf16.msrb.mxu0 %v3024_v43  ;;  %v3413_v43 = vld [vmem:[%s5046_s3 + $0x114] sm:$0xf0] }
  0xfd   :  { %v3084_v26 = vor.u32 %v3413_v43, %v3083_v42 }
  0xfe   :  { %1978 = vmatpush.bf16.msra.mxu2 %v3092_v37  ;;  %2018 = vmatpush.bf16.msrb.mxu1 %v3088_v47  ;;  %v3426_v37 = vld [vmem:[%s5048_s5] sm:$0xff] }
 0x100   :  { %2006 = vmatpush.bf16.msrb.mxu0 %v3016_v48  ;;  %v1500_v52 = vpop.f32.mrf.mxu0 }
 0x101   :  { %v1501_v53 = vadd.f32 %v1500_v52, %v1488_v51  ;;  %v1513_v54 = vpop.f32.mrf.mxu1  ;;  %v3410_v51 = vld [vmem:[%s5046_s3 + $0x104] sm:$0xf] }
 0x102   :  { %1979 = vmatpush.bf16.msra.mxu2 %v3084_v26 }
 0x103   :  { %v1514_v55 = vadd.f32 %v1513_v54, %v1501_v53  ;;  %v3076_v53 = vor.u32 %v3411_v50, %v3075_v49  ;;  %v3077_v54 = vld [vmem:[%s5046_s3 + $0x108] sm:$0xf0]  ;;  %s2166_s3 = sshll.u32 %s3472_s0, 4  ;;  %s2167_s3 = int_to_ptr.vmem [resolvable:$true] %s2166_s3 }
 0x106   :  { %1980 = vmatpush.bf16.msra.mxu2 %v3076_v53 }
 0x108   :  { %v1526_v56 = vpop.f32.mrf.mxu2  ;;  %v1502_v2 = vpop.f32.mrf.mxu0 }
 0x109   :  { %v1527_v57 = vadd.f32 %v1526_v56, %v1514_v55  ;;  %v1539_v58 = vpop.f32.mrf.mxu3  ;;  %v1515_v4 = vpop.f32.mrf.mxu1  ;;  %v3080_v56 = vor.u32 %v3410_v51, %v3077_v54 }
 0x10a   :  { %2133 = vmatpush.bf16.msrb.mxu2 %v3433_v14 }
 0x10b   :  { %v1540_v1 = vadd.f32 %v1539_v58, %v1527_v57  ;;  %2019 = vmatpush.bf16.msrb.mxu1 %v3080_v56  ;;  %v289_v57 = vperm.slane %v4657_v6, 2 }
 0x10d   :  { %v1648_v5 = vmax.f32 %v1540_v1, 0.0 }
 0x10e   :  { %2134 = vmatpush.bf16.msrb.mxu2 %v3432_v16 }
 0x10f   :  { %v1651_v8 = vpack.c.bf16 %v1648_v5, %v1648_v5 }
 0x110   :  { %v1528_v12 = vpop.f32.mrf.mxu2 }
 0x111   :  { %1968 = vmatmul.bf16.vlgmr.msra.gmra.mxu1 %v1651_v8  ;;  %2007 = vmatmul.bf16.vlgmr.msrb.gmra.mxu0 %v1651_v8  ;;  %v1541_v15 = vpop.f32.mrf.mxu3 }
 0x112   :  { %v3437_v15 = vld [vmem:[%s5048_s5 + $0x58] sm:$0xff]  ;;  %2135 = vmatpush.bf16.msrb.mxu2 %v3431_v18 }
 0x113   :  { %2150 = vmatpush.bf16.msrb.mxu3 %v3437_v15 }
 0x116   :  { %2136 = vmatpush.bf16.msrb.mxu2 %v3430_v19 }
 0x117   :  { %2151 = vmatpush.bf16.msrb.mxu3 %v3436_v17 }
 0x11a   :  { %2137 = vmatpush.bf16.msrb.mxu2 %v3429_v23 }
 0x11b   :  { %2152 = vmatpush.bf16.msrb.mxu3 %v3435_v34 }
 0x11e   :  { %2138 = vmatpush.bf16.msrb.mxu2 %v3428_v20 }
 0x11f   :  { %2153 = vmatpush.bf16.msrb.mxu3 %v3434_v35 }
 0x120   :  { %v1552_v36 = vpop.f32.mrf.mxu0 }
 0x121   :  { %v1565_v40 = vpop.f32.mrf.mxu1  ;;  %v1553_v60 = vadd.f32 %v1552_v36, %v289_v57  ;;  %v3427_v36 = vld [vmem:[%s5048_s5 + $0x8] sm:$0xff] }
 0x122   :  { %2139 = vmatpush.bf16.msrb.mxu2 %v3427_v36 }
 0x123   :  { %v1566_v61 = vadd.f32 %v1565_v40, %v1553_v60 }
 0x126   :  { %2140 = vmatpush.bf16.msrb.mxu2 %v3426_v37 }
 0x128   :  { %v1578_v46 = vpop.f32.mrf.mxu2  ;;  %v1554_v52 = vpop.f32.mrf.mxu0 }
 0x129   :  { %v1591_v48 = vpop.f32.mrf.mxu3  ;;  %v1567_v55 = vpop.f32.mrf.mxu1  ;;  %v1579_v62 = vadd.f32 %v1578_v46, %v1566_v61  ;;  %v3439_v52 = vld [vmem:[%s5049_s6] ss:$0 sm:$0xff] }
 0x12b   :  { %v1592_v29 = vadd.f32 %v1591_v48, %v1579_v62 }
 0x130   :  { %v1580_v58 = vpop.f32.mrf.mxu2 }
 0x131   :  { %v1593_v59 = vpop.f32.mrf.mxu3 }
 0x140   :  { %v1604_v63 = vpop.f32.mrf.mxu0 }
 0x141   :  { %v1617_v0 = vpop.f32.mrf.mxu1  ;;  %v1605_v1 = vadd.f32 %v1604_v63, %v1592_v29 }
 0x143   :  { %v1618_v2 = vadd.f32 %v1617_v0, %v1605_v1 }
 0x148   :  { %v1630_v32 = vpop.f32.mrf.mxu2  ;;  %v1606_v4 = vpop.f32.mrf.mxu0 }
 0x149   :  { %v1631_v33 = vadd.f32 %v1630_v32, %v1618_v2  ;;  %v1643_v3 = vpop.f32.mrf.mxu3  ;;  %v1619_v38 = vpop.f32.mrf.mxu1 }
 0x14b   :  { %v1644_v5 = vadd.f32 %v1643_v3, %v1631_v33 }
 0x14d   :  { %v1649_v7 = vmax.f32 %v1644_v5, 0.0 }
 0x14f   :  { %v1652_v8 = vpack.c.bf16 %v1649_v7, %v1649_v7 }
 0x150   :  { %v1632_v9 = vpop.f32.mrf.mxu2 }
 0x151   :  { %v1645_v6 = vpop.f32.mrf.mxu3  ;;  %1981 = vmatmul.bf16.vlgmr.msra.gmra.mxu2 %v1652_v8  ;;  %2020 = vmatmul.bf16.vlgmr.msrb.gmra.mxu1 %v1652_v8 }
 0x160   :  { %v1956_v10 = vpop.f32.mrf.mxu0 }
 0x161   :  { %v1957_v27 = vadd.f32 %v1956_v10, %v1703_v25 }
 0x168   :  { %v1958_v12 = vpop.f32.mrf.mxu0 }
 0x169   :  { %v1995_v11 = vpop.f32.mrf.mxu3 }
 0x16a   :  { %v1996_v40 = vadd.f32 %v1995_v11, %v1704_v39 }
 0x171   :  { %v1997_v13 = vpop.f32.mrf.mxu3 }
 0x18e   :  { %v1969_v28 = vpop.f32.mrf.mxu1  ;;  %v2008_v30 = vpop.f32.mrf.mxu0 }
 0x18f   :  { %v1970_v21 = vadd.f32 %v1969_v28, %v1957_v27  ;;  %v2009_v41 = vadd.f32 %v2008_v30, %v1996_v40 }
 0x196   :  { %v1971_v22 = vpop.f32.mrf.mxu1  ;;  %v2010_v31 = vpop.f32.mrf.mxu0 }
 0x1ce   :  { %v2021_v42 = vpop.f32.mrf.mxu1 }
 0x1cf   :  { %v2022_v43 = vadd.f32 %v2021_v42, %v2009_v41 }
 0x1d1   :  { %v2026_v44 = vmax.f32 %v2022_v43, 0.0 }
 0x1d3   :  { %v2028_v26 = vpack.c.bf16 %v2026_v44, %v2026_v44 }
 0x1d4   :  { %v1982_v45 = vpop.f32.mrf.mxu2 }
 0x1d5   :  { %v1983_v46 = vadd.f32 %v1982_v45, %v1970_v21  ;;  %3185 = vmatmul.msk.bf16.vlgmr.msrb.gmra.mxu3 %vm2129_vm0, %v2028_v26 }
 0x1d6   :  { %v2023_v47 = vpop.f32.mrf.mxu1 }
 0x1d7   :  { %v2025_v48 = vmax.f32 %v1983_v46, 0.0 }
 0x1d9   :  { %v2027_v49 = vpack.c.bf16 %v2025_v48, %v2025_v48 }
 0x1db   :  { %2141 = vmatmul.bf16.vlgmr.msrb.gmra.mxu2 %v2027_v49 }
 0x1dc   :  { %v1984_v50 = vpop.f32.mrf.mxu2 }
 0x258   :  { %v2155_v51 = vpop.f32.mrf.mxu3 }
 0x25e   :  { %v2142_v53 = vpop.f32.mrf.mxu2 }
 0x25f   :  { %v2143_v54 = vadd.f32 %v3439_v52, %v2142_v53 }
 0x260   :  { %v2157_v55 = vpop.f32.mrf.mxu3 }
 0x261   :  { %v2156_v56 = vadd.f32 %v2155_v51, %v2143_v54 }
 0x263   :  { %2160 = vst.msk [vmem:[#allocation2] sm:$0x3] %vm2159_vm1, %v2156_v56 }
 0x264   :  { %2171 = dma.vmem_to_hbm [thread:$0]  %s2167_s3, 32, %s2169_s20, [#allocation3]  }
 0x266   :  { %v2144_v57 = vpop.f32.mrf.mxu2 }
 0x267   :  { %3470 = dma.done.wait [#allocation3], 32  }
 0x268   :  { %3471 = vsyncadd [#allocation3], 4294967264 }
 0x269   :  { %2176 = vsyncpa [#allocation3], 1 }

</bundles_post_ra>
